<compile_context>
chip_gen: v6e
topology: v6e:2x2x1
jax: 0.10.0
libtpu: 0.0.40
codegen_flags: <defaults>
</compile_context>

<pallas_src>
import functools
import math

import jax
import jax.numpy as jnp
from jax.experimental import pallas as pl
from jax.experimental.pallas import tpu as pltpu

LN_EPS = 1e-5


# ---------------------------- in-kernel helpers ----------------------------

def _layernorm(x, g, b, eps=LN_EPS):
    mean = jnp.mean(x, axis=-1, keepdims=True)
    xc = x - mean
    var = jnp.mean(xc * xc, axis=-1, keepdims=True)
    return xc * jax.lax.rsqrt(var + eps) * g + b


def _mha(q, k, v, num_heads, scale):
    """q: (B, Sq, D), k/v: (B, Skv, D) -> (B, Sq, D). Heads unrolled in-kernel."""
    D = q.shape[-1]
    dh = D // num_heads
    outs = []
    for h in range(num_heads):
        sl = slice(h * dh, (h + 1) * dh)
        qh, kh, vh = q[:, :, sl], k[:, :, sl], v[:, :, sl]
        s = jnp.einsum("bqd,bkd->bqk", qh, kh,
                       preferred_element_type=jnp.float32) * scale
        s = s - jnp.max(s, axis=-1, keepdims=True)
        p = jnp.exp(s)
        p = p * pl.reciprocal(jnp.sum(p, axis=-1, keepdims=True), approx=True)
        outs.append(jnp.einsum("bqk,bkd->bqd", p, vh,
                               preferred_element_type=jnp.float32))
    return jnp.concatenate(outs, axis=-1)


def _ffn(h, w1_ref, b1_ref, w2_ref, b2_ref):
    # bf16 MXU inputs, f32 accumulation, f32 elementwise.
    ff = jnp.dot(h.astype(jnp.bfloat16), w1_ref[...],
                 preferred_element_type=jnp.float32) + b1_ref[...]
    ff = jnp.maximum(ff, 0.0)
    ff = jnp.dot(ff.astype(jnp.bfloat16), w2_ref[...],
                 preferred_element_type=jnp.float32) + b2_ref[...]
    return ff


# ---------------------------- fused Pallas kernels ----------------------------

def _encoder_layer_kernel(x_ref, wqkv_ref, bqkv_ref, wo_ref, bo_ref,
                          ln1g_ref, ln1b_ref,
                          w1_ref, b1_ref, w2_ref, b2_ref,
                          ln2g_ref, ln2b_ref,
                          o_ref, *, num_heads):
    B, S, D = x_ref.shape
    scale = 1.0 / math.sqrt(D // num_heads)
    x = x_ref[...].reshape(B * S, D)

    # fused QKV projection -> per-head attention -> output projection
    qkv = jnp.dot(x, wqkv_ref[...], preferred_element_type=jnp.float32) + bqkv_ref[...]
    q = qkv[:, :D].reshape(B, S, D)
    k = qkv[:, D:2 * D].reshape(B, S, D)
    v = qkv[:, 2 * D:].reshape(B, S, D)
    sa = _mha(q, k, v, num_heads, scale).reshape(B * S, D)
    sa = jnp.dot(sa, wo_ref[...], preferred_element_type=jnp.float32) + bo_ref[...]
    h = _layernorm(x + sa, ln1g_ref[...], ln1b_ref[...])

    # FFN + residual + LN (post-norm)
    ff = _ffn(h, w1_ref, b1_ref, w2_ref, b2_ref)
    y = _layernorm(h + ff, ln2g_ref[...], ln2b_ref[...])
    o_ref[...] = y.reshape(B, S, D)


def _decoder_layer_kernel(x_ref, mem_ref,
                          sa_wqkv_ref, sa_bqkv_ref, sa_wo_ref, sa_bo_ref,
                          ln1g_ref, ln1b_ref,
                          ca_wqkv_ref, ca_bqkv_ref, ca_wo_ref, ca_bo_ref,
                          ln2g_ref, ln2b_ref,
                          w1_ref, b1_ref, w2_ref, b2_ref,
                          ln3g_ref, ln3b_ref,
                          o_ref, *, num_heads):
    B, S, D = x_ref.shape
    scale = 1.0 / math.sqrt(D // num_heads)
    x = x_ref[...].reshape(B * S, D)
    mem = mem_ref[...].reshape(B * S, D)

    # self-attention + residual + LN1
    qkv = jnp.dot(x, sa_wqkv_ref[...], preferred_element_type=jnp.float32) + sa_bqkv_ref[...]
    q = qkv[:, :D].reshape(B, S, D)
    k = qkv[:, D:2 * D].reshape(B, S, D)
    v = qkv[:, 2 * D:].reshape(B, S, D)
    sa = _mha(q, k, v, num_heads, scale).reshape(B * S, D)
    sa = jnp.dot(sa, sa_wo_ref[...], preferred_element_type=jnp.float32) + sa_bo_ref[...]
    h1 = _layernorm(x + sa, ln1g_ref[...], ln1b_ref[...])

    # cross-attention (q from tgt stream, k/v from encoder memory) + residual + LN2
    ca_wqkv = ca_wqkv_ref[...]
    ca_bqkv = ca_bqkv_ref[...]
    q = (jnp.dot(h1, ca_wqkv[:, :D], preferred_element_type=jnp.float32)
         + ca_bqkv[:, :D]).reshape(B, S, D)
    kv = jnp.dot(mem, ca_wqkv[:, D:], preferred_element_type=jnp.float32) + ca_bqkv[:, D:]
    k = kv[:, :D].reshape(B, S, D)
    v = kv[:, D:].reshape(B, S, D)
    ca = _mha(q, k, v, num_heads, scale).reshape(B * S, D)
    ca = jnp.dot(ca, ca_wo_ref[...], preferred_element_type=jnp.float32) + ca_bo_ref[...]
    h2 = _layernorm(h1 + ca, ln2g_ref[...], ln2b_ref[...])

    # FFN + residual + LN3
    ff = _ffn(h2, w1_ref, b1_ref, w2_ref, b2_ref)
    y = _layernorm(h2 + ff, ln3g_ref[...], ln3b_ref[...])
    o_ref[...] = y.reshape(B, S, D)


def _layernorm_kernel(x_ref, g_ref, b_ref, o_ref):
    o_ref[...] = _layernorm(x_ref[...], g_ref[...], b_ref[...])


def _head_kernel(x_ref, g_ref, b_ref, w_ref, bias_ref, o_ref):
    # final decoder LayerNorm fused with fc_out (lane-dense padded output)
    h = _layernorm(x_ref[...], g_ref[...], b_ref[...])
    o_ref[...] = jnp.dot(h, w_ref[...], preferred_element_type=jnp.float32) + bias_ref[...]


# ---------------------------- pallas_call wrappers ----------------------------

def _spec(shape):
    zeros = (0,) * len(shape)
    return pl.BlockSpec(shape, lambda i, _z=zeros: _z)


def _call_fused(kernel_fn, args, out_shape):
    """Single-grid-point fused call: every array is one full-extent VMEM block."""
    return pl.pallas_call(
        kernel_fn,
        out_shape=jax.ShapeDtypeStruct(out_shape, jnp.float32),
        grid=(1,),
        in_specs=[_spec(tuple(a.shape)) for a in args],
        out_specs=_spec(out_shape),
        compiler_params=pltpu.CompilerParams(
            dimension_semantics=("arbitrary",),
            vmem_limit_bytes=64 * 1024 * 1024,
        ),
    )(*args)


def encoder_layer(x, p, num_heads):
    args = (x, p["wqkv"], p["bqkv"], p["wo"], p["bo"],
            p["ln1_g"], p["ln1_b"],
            p["w1"], p["b1"], p["w2"], p["b2"],
            p["ln2_g"], p["ln2_b"])
    return _call_fused(functools.partial(_encoder_layer_kernel, num_heads=num_heads),
                       args, x.shape)


def decoder_layer(x, memory, p, num_heads):
    args = (x, memory,
            p["sa_wqkv"], p["sa_bqkv"], p["sa_wo"], p["sa_bo"],
            p["ln1_g"], p["ln1_b"],
            p["ca_wqkv"], p["ca_bqkv"], p["ca_wo"], p["ca_bo"],
            p["ln2_g"], p["ln2_b"],
            p["w1"], p["b1"], p["w2"], p["b2"],
            p["ln3_g"], p["ln3_b"])
    return _call_fused(functools.partial(_decoder_layer_kernel, num_heads=num_heads),
                       args, x.shape)


# ---------------------------- forward ----------------------------

@functools.partial(jax.jit, static_argnums=(2, 3))
def simple_transformer_forward(src, params, num_heads, num_tokens):
    # src: (S, B) int32 token ids (torch seq-first layout)
    S, B = src.shape
    emb = jnp.take(params["embedding"], src, axis=0)        # (S, B, D) — gather glue
    D = emb.shape[-1]
    x = emb.transpose(1, 0, 2)                              # (B, S, D) for the kernels

    # encoder stack + final encoder norm
    for lp in params["encoder_layers"]:
        x = encoder_layer(x, lp, num_heads)
    mem_flat = _call_fused(
        _layernorm_kernel,
        (x.reshape(B * S, D), params["enc_norm_g"], params["enc_norm_b"]),
        (B * S, D))
    memory = mem_flat.reshape(B, S, D)

    # decoder stack (tgt = src_emb, as in the PyTorch forward)
    y = emb.transpose(1, 0, 2)
    for lp in params["decoder_layers"]:
        y = decoder_layer(y, memory, lp, num_heads)

    # final decoder norm + fc_out, padded to a lane-dense 128-wide output
    v_pad = params["fc_w"].shape[1]
    logits_p = _call_fused(
        _head_kernel,
        (y.reshape(B * S, D), params["dec_norm_g"], params["dec_norm_b"],
         params["fc_w"], params["fc_b"]),
        (B * S, v_pad))
    logits = logits_p[:, :num_tokens].reshape(B, S, num_tokens).transpose(1, 0, 2)
    return logits                                           # (S, B, num_tokens)


# ---------------------------- deterministic init ----------------------------

class _KeyGen:
    def __init__(self, seed):
        self._key = jax.random.PRNGKey(seed)

    def __call__(self):
        self._key, k = jax.random.split(self._key)
        return k


def _nrm(kg, shape, scale=0.02, dtype=jnp.float32):
    return (scale * jax.random.normal(kg(), shape, dtype=jnp.float32)).astype(dtype)


def _init_enc_layer(kg, d, ff):
    # weights stored pre-transposed (in, out); biases pre-reshaped to (1, N)
    return {
        "wqkv": _nrm(kg, (d, 3 * d)), "bqkv": jnp.zeros((1, 3 * d), jnp.float32),
        "wo": _nrm(kg, (d, d)), "bo": jnp.zeros((1, d), jnp.float32),
        "ln1_g": jnp.ones((1, d), jnp.float32), "ln1_b": jnp.zeros((1, d), jnp.float32),
        "w1": _nrm(kg, (d, ff), dtype=jnp.bfloat16), "b1": jnp.zeros((1, ff), jnp.float32),
        "w2": _nrm(kg, (ff, d), dtype=jnp.bfloat16), "b2": jnp.zeros((1, d), jnp.float32),
        "ln2_g": jnp.ones((1, d), jnp.float32), "ln2_b": jnp.zeros((1, d), jnp.float32),
    }


def _init_dec_layer(kg, d, ff):
    return {
        "sa_wqkv": _nrm(kg, (d, 3 * d)), "sa_bqkv": jnp.zeros((1, 3 * d), jnp.float32),
        "sa_wo": _nrm(kg, (d, d)), "sa_bo": jnp.zeros((1, d), jnp.float32),
        "ln1_g": jnp.ones((1, d), jnp.float32), "ln1_b": jnp.zeros((1, d), jnp.float32),
        "ca_wqkv": _nrm(kg, (d, 3 * d)), "ca_bqkv": jnp.zeros((1, 3 * d), jnp.float32),
        "ca_wo": _nrm(kg, (d, d)), "ca_bo": jnp.zeros((1, d), jnp.float32),
        "ln2_g": jnp.ones((1, d), jnp.float32), "ln2_b": jnp.zeros((1, d), jnp.float32),
        "w1": _nrm(kg, (d, ff), dtype=jnp.bfloat16), "b1": jnp.zeros((1, ff), jnp.float32),
        "w2": _nrm(kg, (ff, d), dtype=jnp.bfloat16), "b2": jnp.zeros((1, d), jnp.float32),
        "ln3_g": jnp.ones((1, d), jnp.float32), "ln3_b": jnp.zeros((1, d), jnp.float32),
    }


def init_params(num_tokens, d_model, num_enc_layers, num_dec_layers, dim_ff, seed=0):
    kg = _KeyGen(seed)
    v_pad = ((num_tokens + 127) // 128) * 128
    fc_w = _nrm(kg, (d_model, num_tokens))
    fc_w = jnp.pad(fc_w, ((0, 0), (0, v_pad - num_tokens)))   # lane-dense output slab
    return {
        "embedding": _nrm(kg, (num_tokens, d_model), scale=1.0),
        "encoder_layers": [_init_enc_layer(kg, d_model, dim_ff) for _ in range(num_enc_layers)],
        "enc_norm_g": jnp.ones((1, d_model), jnp.float32),
        "enc_norm_b": jnp.zeros((1, d_model), jnp.float32),
        "decoder_layers": [_init_dec_layer(kg, d_model, dim_ff) for _ in range(num_dec_layers)],
        "dec_norm_g": jnp.ones((1, d_model), jnp.float32),
        "dec_norm_b": jnp.zeros((1, d_model), jnp.float32),
        "fc_w": fc_w,
        "fc_b": jnp.zeros((1, v_pad), jnp.float32),
    }


# ---------------------------- main ----------------------------

if __name__ == "__main__":
    NUM_TOKENS = 50
    DIM_MODEL = 32
    NUM_HEADS = 4
    NUM_LAYERS = 2          # encoder layers (constructor arg)
    NUM_DEC_LAYERS = 6      # nn.Transformer default (not overridden in the module)
    DIM_FF = 2048           # nn.Transformer default dim_feedforward
    SEQ_LEN = 8
    BATCH = 2

    params = init_params(NUM_TOKENS, DIM_MODEL, NUM_LAYERS, NUM_DEC_LAYERS, DIM_FF, seed=0)

    key = jax.random.PRNGKey(0)
    src = jax.random.randint(key, (SEQ_LEN, BATCH), 0, NUM_TOKENS, dtype=jnp.int32)

    out = simple_transformer_forward(src, params, NUM_HEADS, NUM_TOKENS)
    out = jax.block_until_ready(out)

    assert out.shape == (SEQ_LEN, BATCH, NUM_TOKENS), out.shape
    assert bool(jnp.all(jnp.isfinite(out)))
    print("KERNEL_OK")
</pallas_src>

<mosaic_0001>
module attributes {stable_mosaic.version = 11 : i64} {
  func.func @_layernorm_kernel(%arg0: i32, %arg1: memref<16x32xf32, #tpu.memory_space<vmem>>, %arg2: memref<1x32xf32, #tpu.memory_space<vmem>>, %arg3: memref<1x32xf32, #tpu.memory_space<vmem>>, %arg4: memref<16x32xf32, #tpu.memory_space<vmem>>) attributes {dimension_semantics = [#tpu.dimension_semantics<arbitrary>], iteration_bounds = array<i64: 1>, scalar_prefetch = 0 : i64, scratch_operands = 0 : i64, tpu.core_type = #tpu.core_type<tc>, window_params = [{pipeline_mode = #tpu.pipeline_mode<synchronous>, transform_indices = @transform_0, window_bounds = array<i64: 16, 32>}, {pipeline_mode = #tpu.pipeline_mode<synchronous>, transform_indices = @transform_1, window_bounds = array<i64: 1, 32>}, {pipeline_mode = #tpu.pipeline_mode<synchronous>, transform_indices = @transform_2, window_bounds = array<i64: 1, 32>}, {pipeline_mode = #tpu.pipeline_mode<synchronous>, transform_indices = @transform_3, window_bounds = array<i64: 16, 32>}]} {
    %c0 = arith.constant 0 : index
    %c0_0 = arith.constant 0 : index
    %0 = vector.load %arg1[%c0, %c0_0] : memref<16x32xf32, #tpu.memory_space<vmem>>, vector<16x32xf32>
    %c0_1 = arith.constant 0 : index
    %c0_2 = arith.constant 0 : index
    %1 = vector.load %arg2[%c0_1, %c0_2] : memref<1x32xf32, #tpu.memory_space<vmem>>, vector<1x32xf32>
    %c0_3 = arith.constant 0 : index
    %c0_4 = arith.constant 0 : index
    %2 = vector.load %arg3[%c0_3, %c0_4] : memref<1x32xf32, #tpu.memory_space<vmem>>, vector<1x32xf32>
    %cst = arith.constant dense<0.000000e+00> : vector<16xf32>
    %3 = vector.multi_reduction <add>, %0, %cst [1] : vector<16x32xf32> to vector<16xf32>
    %4 = vector.shape_cast %3 : vector<16xf32> to vector<16x1xf32>
    %cst_5 = arith.constant 3.200000e+01 : f32
    %5 = vector.broadcast %cst_5 : f32 to vector<16x1xf32>
    %6 = arith.divf %4, %5 : vector<16x1xf32>
    %7 = vector.broadcast %6 : vector<16x1xf32> to vector<16x32xf32>
    %8 = arith.subf %0, %7 : vector<16x32xf32>
    %9 = arith.mulf %8, %8 : vector<16x32xf32>
    %cst_6 = arith.constant dense<0.000000e+00> : vector<16xf32>
    %10 = vector.multi_reduction <add>, %9, %cst_6 [1] : vector<16x32xf32> to vector<16xf32>
    %11 = vector.shape_cast %10 : vector<16xf32> to vector<16x1xf32>
    %cst_7 = arith.constant 3.200000e+01 : f32
    %12 = vector.broadcast %cst_7 : f32 to vector<16x1xf32>
    %13 = arith.divf %11, %12 : vector<16x1xf32>
    %cst_8 = arith.constant 9.99999974E-6 : f32
    %14 = vector.broadcast %cst_8 : f32 to vector<16x1xf32>
    %15 = arith.addf %13, %14 : vector<16x1xf32>
    %16 = math.rsqrt %15 : vector<16x1xf32>
    %17 = vector.broadcast %16 : vector<16x1xf32> to vector<16x32xf32>
    %18 = arith.mulf %8, %17 : vector<16x32xf32>
    %19 = vector.broadcast %1 : vector<1x32xf32> to vector<16x32xf32>
    %20 = arith.mulf %18, %19 : vector<16x32xf32>
    %21 = vector.broadcast %2 : vector<1x32xf32> to vector<16x32xf32>
    %22 = arith.addf %20, %21 : vector<16x32xf32>
    %c0_9 = arith.constant 0 : index
    %c0_10 = arith.constant 0 : index
    %23 = vector.load %arg4[%c0_9, %c0_10] : memref<16x32xf32, #tpu.memory_space<vmem>>, vector<16x32xf32>
    tpu.vector_store %arg4[%c0_9, %c0_10], %22 {strides = array<i32>} : memref<16x32xf32, #tpu.memory_space<vmem>>, vector<16x32xf32>,
    return
  }
  func.func @transform_0(%arg0: i32) -> (i32, i32) {
    %c0_i32 = arith.constant 0 : i32
    %c0_i32_0 = arith.constant 0 : i32
    %c0_i32_1 = arith.constant 0 : i32
    return %c0_i32, %c0_i32_0 : i32, i32
  }
  func.func @transform_1(%arg0: i32) -> (i32, i32) {
    %c0_i32 = arith.constant 0 : i32
    %c0_i32_0 = arith.constant 0 : i32
    %c0_i32_1 = arith.constant 0 : i32
    return %c0_i32, %c0_i32_0 : i32, i32
  }
  func.func @transform_2(%arg0: i32) -> (i32, i32) {
    %c0_i32 = arith.constant 0 : i32
    %c0_i32_0 = arith.constant 0 : i32
    %c0_i32_1 = arith.constant 0 : i32
    return %c0_i32, %c0_i32_0 : i32, i32
  }
  func.func @transform_3(%arg0: i32) -> (i32, i32) {
    %c0_i32 = arith.constant 0 : i32
    %c0_i32_0 = arith.constant 0 : i32
    %c0_i32_1 = arith.constant 0 : i32
    return %c0_i32, %c0_i32_0 : i32, i32
  }
}

module attributes {stable_mosaic.version = 11 : i64} {
  func.func @_encoder_layer_kernel(%arg0: i32, %arg1: memref<2x8x32xf32, #tpu.memory_space<vmem>>, %arg2: memref<32x96xf32, #tpu.memory_space<vmem>>, %arg3: memref<1x96xf32, #tpu.memory_space<vmem>>, %arg4: memref<32x32xf32, #tpu.memory_space<vmem>>, %arg5: memref<1x32xf32, #tpu.memory_space<vmem>>, %arg6: memref<1x32xf32, #tpu.memory_space<vmem>>, %arg7: memref<1x32xf32, #tpu.memory_space<vmem>>, %arg8: memref<32x2048xbf16, #tpu.memory_space<vmem>>, %arg9: memref<1x2048xf32, #tpu.memory_space<vmem>>, %arg10: memref<2048x32xbf16, #tpu.memory_space<vmem>>, %arg11: memref<1x32xf32, #tpu.memory_space<vmem>>, %arg12: memref<1x32xf32, #tpu.memory_space<vmem>>, %arg13: memref<1x32xf32, #tpu.memory_space<vmem>>, %arg14: memref<2x8x32xf32, #tpu.memory_space<vmem>>) attributes {dimension_semantics = [#tpu.dimension_semantics<arbitrary>], iteration_bounds = array<i64: 1>, scalar_prefetch = 0 : i64, scratch_operands = 0 : i64, tpu.core_type = #tpu.core_type<tc>, window_params = [{pipeline_mode = #tpu.pipeline_mode<synchronous>, transform_indices = @transform_0, window_bounds = array<i64: 2, 8, 32>}, {pipeline_mode = #tpu.pipeline_mode<synchronous>, transform_indices = @transform_1, window_bounds = array<i64: 32, 96>}, {pipeline_mode = #tpu.pipeline_mode<synchronous>, transform_indices = @transform_2, window_bounds = array<i64: 1, 96>}, {pipeline_mode = #tpu.pipeline_mode<synchronous>, transform_indices = @transform_3, window_bounds = array<i64: 32, 32>}, {pipeline_mode = #tpu.pipeline_mode<synchronous>, transform_indices = @transform_4, window_bounds = array<i64: 1, 32>}, {pipeline_mode = #tpu.pipeline_mode<synchronous>, transform_indices = @transform_5, window_bounds = array<i64: 1, 32>}, {pipeline_mode = #tpu.pipeline_mode<synchronous>, transform_indices = @transform_6, window_bounds = array<i64: 1, 32>}, {pipeline_mode = #tpu.pipeline_mode<synchronous>, transform_indices = @transform_7, window_bounds = array<i64: 32, 2048>}, {pipeline_mode = #tpu.pipeline_mode<synchronous>, transform_indices = @transform_8, window_bounds = array<i64: 1, 2048>}, {pipeline_mode = #tpu.pipeline_mode<synchronous>, transform_indices = @transform_9, window_bounds = array<i64: 2048, 32>}, {pipeline_mode = #tpu.pipeline_mode<synchronous>, transform_indices = @transform_10, window_bounds = array<i64: 1, 32>}, {pipeline_mode = #tpu.pipeline_mode<synchronous>, transform_indices = @transform_11, window_bounds = array<i64: 1, 32>}, {pipeline_mode = #tpu.pipeline_mode<synchronous>, transform_indices = @transform_12, window_bounds = array<i64: 1, 32>}, {pipeline_mode = #tpu.pipeline_mode<synchronous>, transform_indices = @transform_13, window_bounds = array<i64: 2, 8, 32>}]} {
    %c0 = arith.constant 0 : index
    %c0_0 = arith.constant 0 : index
    %c0_1 = arith.constant 0 : index
    %0 = vector.load %arg1[%c0, %c0_0, %c0_1] : memref<2x8x32xf32, #tpu.memory_space<vmem>>, vector<2x8x32xf32>
    %1 = vector.shape_cast %0 : vector<2x8x32xf32> to vector<16x32xf32>
    %c0_2 = arith.constant 0 : index
    %c0_3 = arith.constant 0 : index
    %2 = vector.load %arg2[%c0_2, %c0_3] : memref<32x96xf32, #tpu.memory_space<vmem>>, vector<32x96xf32>
    %cst = arith.constant dense<0.000000e+00> : vector<16x96xf32>
    %3 = tpu.matmul %1, %2, %cst {dimension_numbers = #tpu.dot_dimension_numbers<[1], [0], [0], [1], [0, 0, 1, 1], [], []>} : vector<16x32xf32>, vector<32x96xf32>, vector<16x96xf32> -> vector<16x96xf32>
    %c0_4 = arith.constant 0 : index
    %c0_5 = arith.constant 0 : index
    %4 = vector.load %arg3[%c0_4, %c0_5] : memref<1x96xf32, #tpu.memory_space<vmem>>, vector<1x96xf32>
    %5 = vector.broadcast %4 : vector<1x96xf32> to vector<16x96xf32>
    %6 = arith.addf %3, %5 : vector<16x96xf32>
    %7 = vector.extract_strided_slice %6 {offsets = [0, 0], sizes = [16, 32], strides = [1, 1]} : vector<16x96xf32> to vector<16x32xf32>
    %8 = vector.shape_cast %7 : vector<16x32xf32> to vector<2x8x32xf32>
    %9 = vector.extract_strided_slice %6 {offsets = [0, 32], sizes = [16, 32], strides = [1, 1]} : vector<16x96xf32> to vector<16x32xf32>
    %10 = vector.shape_cast %9 : vector<16x32xf32> to vector<2x8x32xf32>
    %11 = vector.extract_strided_slice %6 {offsets = [0, 64], sizes = [16, 32], strides = [1, 1]} : vector<16x96xf32> to vector<16x32xf32>
    %12 = vector.shape_cast %11 : vector<16x32xf32> to vector<2x8x32xf32>
    %13 = vector.extract_strided_slice %8 {offsets = [0, 0, 0], sizes = [2, 8, 8], strides = [1, 1, 1]} : vector<2x8x32xf32> to vector<2x8x8xf32>
    %14 = vector.extract_strided_slice %10 {offsets = [0, 0, 0], sizes = [2, 8, 8], strides = [1, 1, 1]} : vector<2x8x32xf32> to vector<2x8x8xf32>
    %15 = vector.extract_strided_slice %12 {offsets = [0, 0, 0], sizes = [2, 8, 8], strides = [1, 1, 1]} : vector<2x8x32xf32> to vector<2x8x8xf32>
    "tpu.trace_start"() <{level = 10 : i32, message = "bqd,bkd->bqk"}> : () -> ()
    %cst_6 = arith.constant dense<0.000000e+00> : vector<2x8x8xf32>
    %16 = tpu.matmul %13, %14, %cst_6 {dimension_numbers = #tpu.dot_dimension_numbers<[2], [2], [1], [1], [0, 0, 0, 1, 1, 1], [0], [0]>} : vector<2x8x8xf32>, vector<2x8x8xf32>, vector<2x8x8xf32> -> vector<2x8x8xf32>
    "tpu.trace_stop"() : () -> ()
    %cst_7 = arith.constant 0.353553385 : f32
    %17 = vector.broadcast %cst_7 : f32 to vector<2x8x8xf32>
    %18 = arith.mulf %16, %17 : vector<2x8x8xf32>
    %cst_8 = arith.constant dense<0xFF800000> : vector<2x8xf32>
    %19 = vector.multi_reduction <maximumf>, %18, %cst_8 [2] : vector<2x8x8xf32> to vector<2x8xf32>
    %20 = vector.shape_cast %19 : vector<2x8xf32> to vector<2x8x1xf32>
    %21 = vector.broadcast %20 : vector<2x8x1xf32> to vector<2x8x8xf32>
    %22 = arith.subf %18, %21 : vector<2x8x8xf32>
    %23 = math.exp %22 : vector<2x8x8xf32>
    %cst_9 = arith.constant dense<0.000000e+00> : vector<2x8xf32>
    %24 = vector.multi_reduction <add>, %23, %cst_9 [2] : vector<2x8x8xf32> to vector<2x8xf32>
    %25 = vector.shape_cast %24 : vector<2x8xf32> to vector<2x8x1xf32>
    %26 = tpu.reciprocal %25 {approx = true} : vector<2x8x1xf32> -> vector<2x8x1xf32>
    %27 = vector.broadcast %26 : vector<2x8x1xf32> to vector<2x8x8xf32>
    %28 = arith.mulf %23, %27 : vector<2x8x8xf32>
    "tpu.trace_start"() <{level = 10 : i32, message = "bqk,bkd->bqd"}> : () -> ()
    %cst_10 = arith.constant dense<0.000000e+00> : vector<2x8x8xf32>
    %29 = tpu.matmul %28, %15, %cst_10 {dimension_numbers = #tpu.dot_dimension_numbers<[2], [1], [1], [2], [0, 0, 0, 1, 1, 2], [0], [0]>} : vector<2x8x8xf32>, vector<2x8x8xf32>, vector<2x8x8xf32> -> vector<2x8x8xf32>
    "tpu.trace_stop"() : () -> ()
    %30 = vector.extract_strided_slice %8 {offsets = [0, 0, 8], sizes = [2, 8, 8], strides = [1, 1, 1]} : vector<2x8x32xf32> to vector<2x8x8xf32>
    %31 = vector.extract_strided_slice %10 {offsets = [0, 0, 8], sizes = [2, 8, 8], strides = [1, 1, 1]} : vector<2x8x32xf32> to vector<2x8x8xf32>
    %32 = vector.extract_strided_slice %12 {offsets = [0, 0, 8], sizes = [2, 8, 8], strides = [1, 1, 1]} : vector<2x8x32xf32> to vector<2x8x8xf32>
    "tpu.trace_start"() <{level = 10 : i32, message = "bqd,bkd->bqk"}> : () -> ()
    %cst_11 = arith.constant dense<0.000000e+00> : vector<2x8x8xf32>
    %33 = tpu.matmul %30, %31, %cst_11 {dimension_numbers = #tpu.dot_dimension_numbers<[2], [2], [1], [1], [0, 0, 0, 1, 1, 1], [0], [0]>} : vector<2x8x8xf32>, vector<2x8x8xf32>, vector<2x8x8xf32> -> vector<2x8x8xf32>
    "tpu.trace_stop"() : () -> ()
    %cst_12 = arith.constant 0.353553385 : f32
    %34 = vector.broadcast %cst_12 : f32 to vector<2x8x8xf32>
    %35 = arith.mulf %33, %34 : vector<2x8x8xf32>
    %cst_13 = arith.constant dense<0xFF800000> : vector<2x8xf32>
    %36 = vector.multi_reduction <maximumf>, %35, %cst_13 [2] : vector<2x8x8xf32> to vector<2x8xf32>
    %37 = vector.shape_cast %36 : vector<2x8xf32> to vector<2x8x1xf32>
    %38 = vector.broadcast %37 : vector<2x8x1xf32> to vector<2x8x8xf32>
    %39 = arith.subf %35, %38 : vector<2x8x8xf32>
    %40 = math.exp %39 : vector<2x8x8xf32>
    %cst_14 = arith.constant dense<0.000000e+00> : vector<2x8xf32>
    %41 = vector.multi_reduction <add>, %40, %cst_14 [2] : vector<2x8x8xf32> to vector<2x8xf32>
    %42 = vector.shape_cast %41 : vector<2x8xf32> to vector<2x8x1xf32>
    %43 = tpu.reciprocal %42 {approx = true} : vector<2x8x1xf32> -> vector<2x8x1xf32>
    %44 = vector.broadcast %43 : vector<2x8x1xf32> to vector<2x8x8xf32>
    %45 = arith.mulf %40, %44 : vector<2x8x8xf32>
    "tpu.trace_start"() <{level = 10 : i32, message = "bqk,bkd->bqd"}> : () -> ()
    %cst_15 = arith.constant dense<0.000000e+00> : vector<2x8x8xf32>
    %46 = tpu.matmul %45, %32, %cst_15 {dimension_numbers = #tpu.dot_dimension_numbers<[2], [1], [1], [2], [0, 0, 0, 1, 1, 2], [0], [0]>} : vector<2x8x8xf32>, vector<2x8x8xf32>, vector<2x8x8xf32> -> vector<2x8x8xf32>
    "tpu.trace_stop"() : () -> ()
    %47 = vector.extract_strided_slice %8 {offsets = [0, 0, 16], sizes = [2, 8, 8], strides = [1, 1, 1]} : vector<2x8x32xf32> to vector<2x8x8xf32>
    %48 = vector.extract_strided_slice %10 {offsets = [0, 0, 16], sizes = [2, 8, 8], strides = [1, 1, 1]} : vector<2x8x32xf32> to vector<2x8x8xf32>
    %49 = vector.extract_strided_slice %12 {offsets = [0, 0, 16], sizes = [2, 8, 8], strides = [1, 1, 1]} : vector<2x8x32xf32> to vector<2x8x8xf32>
    "tpu.trace_start"() <{level = 10 : i32, message = "bqd,bkd->bqk"}> : () -> ()
    %cst_16 = arith.constant dense<0.000000e+00> : vector<2x8x8xf32>
    %50 = tpu.matmul %47, %48, %cst_16 {dimension_numbers = #tpu.dot_dimension_numbers<[2], [2], [1], [1], [0, 0, 0, 1, 1, 1], [0], [0]>} : vector<2x8x8xf32>, vector<2x8x8xf32>, vector<2x8x8xf32> -> vector<2x8x8xf32>
    "tpu.trace_stop"() : () -> ()
    %cst_17 = arith.constant 0.353553385 : f32
    %51 = vector.broadcast %cst_17 : f32 to vector<2x8x8xf32>
    %52 = arith.mulf %50, %51 : vector<2x8x8xf32>
    %cst_18 = arith.constant dense<0xFF800000> : vector<2x8xf32>
    %53 = vector.multi_reduction <maximumf>, %52, %cst_18 [2] : vector<2x8x8xf32> to vector<2x8xf32>
    %54 = vector.shape_cast %53 : vector<2x8xf32> to vector<2x8x1xf32>
    %55 = vector.broadcast %54 : vector<2x8x1xf32> to vector<2x8x8xf32>
    %56 = arith.subf %52, %55 : vector<2x8x8xf32>
    %57 = math.exp %56 : vector<2x8x8xf32>
    %cst_19 = arith.constant dense<0.000000e+00> : vector<2x8xf32>
    %58 = vector.multi_reduction <add>, %57, %cst_19 [2] : vector<2x8x8xf32> to vector<2x8xf32>
    %59 = vector.shape_cast %58 : vector<2x8xf32> to vector<2x8x1xf32>
    %60 = tpu.reciprocal %59 {approx = true} : vector<2x8x1xf32> -> vector<2x8x1xf32>
    %61 = vector.broadcast %60 : vector<2x8x1xf32> to vector<2x8x8xf32>
    %62 = arith.mulf %57, %61 : vector<2x8x8xf32>
    "tpu.trace_start"() <{level = 10 : i32, message = "bqk,bkd->bqd"}> : () -> ()
    %cst_20 = arith.constant dense<0.000000e+00> : vector<2x8x8xf32>
    %63 = tpu.matmul %62, %49, %cst_20 {dimension_numbers = #tpu.dot_dimension_numbers<[2], [1], [1], [2], [0, 0, 0, 1, 1, 2], [0], [0]>} : vector<2x8x8xf32>, vector<2x8x8xf32>, vector<2x8x8xf32> -> vector<2x8x8xf32>
    "tpu.trace_stop"() : () -> ()
    %64 = vector.extract_strided_slice %8 {offsets = [0, 0, 24], sizes = [2, 8, 8], strides = [1, 1, 1]} : vector<2x8x32xf32> to vector<2x8x8xf32>
    %65 = vector.extract_strided_slice %10 {offsets = [0, 0, 24], sizes = [2, 8, 8], strides = [1, 1, 1]} : vector<2x8x32xf32> to vector<2x8x8xf32>
    %66 = vector.extract_strided_slice %12 {offsets = [0, 0, 24], sizes = [2, 8, 8], strides = [1, 1, 1]} : vector<2x8x32xf32> to vector<2x8x8xf32>
    "tpu.trace_start"() <{level = 10 : i32, message = "bqd,bkd->bqk"}> : () -> ()
    %cst_21 = arith.constant dense<0.000000e+00> : vector<2x8x8xf32>
    %67 = tpu.matmul %64, %65, %cst_21 {dimension_numbers = #tpu.dot_dimension_numbers<[2], [2], [1], [1], [0, 0, 0, 1, 1, 1], [0], [0]>} : vector<2x8x8xf32>, vector<2x8x8xf32>, vector<2x8x8xf32> -> vector<2x8x8xf32>
    "tpu.trace_stop"() : () -> ()
    %cst_22 = arith.constant 0.353553385 : f32
    %68 = vector.broadcast %cst_22 : f32 to vector<2x8x8xf32>
    %69 = arith.mulf %67, %68 : vector<2x8x8xf32>
    %cst_23 = arith.constant dense<0xFF800000> : vector<2x8xf32>
    %70 = vector.multi_reduction <maximumf>, %69, %cst_23 [2] : vector<2x8x8xf32> to vector<2x8xf32>
    %71 = vector.shape_cast %70 : vector<2x8xf32> to vector<2x8x1xf32>
    %72 = vector.broadcast %71 : vector<2x8x1xf32> to vector<2x8x8xf32>
    %73 = arith.subf %69, %72 : vector<2x8x8xf32>
    %74 = math.exp %73 : vector<2x8x8xf32>
    %cst_24 = arith.constant dense<0.000000e+00> : vector<2x8xf32>
    %75 = vector.multi_reduction <add>, %74, %cst_24 [2] : vector<2x8x8xf32> to vector<2x8xf32>
    %76 = vector.shape_cast %75 : vector<2x8xf32> to vector<2x8x1xf32>
    %77 = tpu.reciprocal %76 {approx = true} : vector<2x8x1xf32> -> vector<2x8x1xf32>
    %78 = vector.broadcast %77 : vector<2x8x1xf32> to vector<2x8x8xf32>
    %79 = arith.mulf %74, %78 : vector<2x8x8xf32>
    "tpu.trace_start"() <{level = 10 : i32, message = "bqk,bkd->bqd"}> : () -> ()
    %cst_25 = arith.constant dense<0.000000e+00> : vector<2x8x8xf32>
    %80 = tpu.matmul %79, %66, %cst_25 {dimension_numbers = #tpu.dot_dimension_numbers<[2], [1], [1], [2], [0, 0, 0, 1, 1, 2], [0], [0]>} : vector<2x8x8xf32>, vector<2x8x8xf32>, vector<2x8x8xf32> -> vector<2x8x8xf32>
    "tpu.trace_stop"() : () -> ()
    %81 = tpu.concatenate %29, %46, %63, %80 in 2 : vector<2x8x8xf32>, vector<2x8x8xf32>, vector<2x8x8xf32>, vector<2x8x8xf32> -> vector<2x8x32xf32>
    %82 = vector.shape_cast %81 : vector<2x8x32xf32> to vector<16x32xf32>
    %c0_26 = arith.constant 0 : index
    %c0_27 = arith.constant 0 : index
    %83 = vector.load %arg4[%c0_26, %c0_27] : memref<32x32xf32, #tpu.memory_space<vmem>>, vector<32x32xf32>
    %cst_28 = arith.constant dense<0.000000e+00> : vector<16x32xf32>
    %84 = tpu.matmul %82, %83, %cst_28 {dimension_numbers = #tpu.dot_dimension_numbers<[1], [0], [0], [1], [0, 0, 1, 1], [], []>} : vector<16x32xf32>, vector<32x32xf32>, vector<16x32xf32> -> vector<16x32xf32>
    %c0_29 = arith.constant 0 : index
    %c0_30 = arith.constant 0 : index
    %85 = vector.load %arg5[%c0_29, %c0_30] : memref<1x32xf32, #tpu.memory_space<vmem>>, vector<1x32xf32>
    %86 = vector.broadcast %85 : vector<1x32xf32> to vector<16x32xf32>
    %87 = arith.addf %84, %86 : vector<16x32xf32>
    %88 = arith.addf %1, %87 : vector<16x32xf32>
    %c0_31 = arith.constant 0 : index
    %c0_32 = arith.constant 0 : index
    %89 = vector.load %arg6[%c0_31, %c0_32] : memref<1x32xf32, #tpu.memory_space<vmem>>, vector<1x32xf32>
    %c0_33 = arith.constant 0 : index
    %c0_34 = arith.constant 0 : index
    %90 = vector.load %arg7[%c0_33, %c0_34] : memref<1x32xf32, #tpu.memory_space<vmem>>, vector<1x32xf32>
    %cst_35 = arith.constant dense<0.000000e+00> : vector<16xf32>
    %91 = vector.multi_reduction <add>, %88, %cst_35 [1] : vector<16x32xf32> to vector<16xf32>
    %92 = vector.shape_cast %91 : vector<16xf32> to vector<16x1xf32>
    %cst_36 = arith.constant 3.200000e+01 : f32
    %93 = vector.broadcast %cst_36 : f32 to vector<16x1xf32>
    %94 = arith.divf %92, %93 : vector<16x1xf32>
    %95 = vector.broadcast %94 : vector<16x1xf32> to vector<16x32xf32>
    %96 = arith.subf %88, %95 : vector<16x32xf32>
    %97 = arith.mulf %96, %96 : vector<16x32xf32>
    %cst_37 = arith.constant dense<0.000000e+00> : vector<16xf32>
    %98 = vector.multi_reduction <add>, %97, %cst_37 [1] : vector<16x32xf32> to vector<16xf32>
    %99 = vector.shape_cast %98 : vector<16xf32> to vector<16x1xf32>
    %cst_38 = arith.constant 3.200000e+01 : f32
    %100 = vector.broadcast %cst_38 : f32 to vector<16x1xf32>
    %101 = arith.divf %99, %100 : vector<16x1xf32>
    %cst_39 = arith.constant 9.99999974E-6 : f32
    %102 = vector.broadcast %cst_39 : f32 to vector<16x1xf32>
    %103 = arith.addf %101, %102 : vector<16x1xf32>
    %104 = math.rsqrt %103 : vector<16x1xf32>
    %105 = vector.broadcast %104 : vector<16x1xf32> to vector<16x32xf32>
    %106 = arith.mulf %96, %105 : vector<16x32xf32>
    %107 = vector.broadcast %89 : vector<1x32xf32> to vector<16x32xf32>
    %108 = arith.mulf %106, %107 : vector<16x32xf32>
    %109 = vector.broadcast %90 : vector<1x32xf32> to vector<16x32xf32>
    %110 = arith.addf %108, %109 : vector<16x32xf32>
    %111 = arith.truncf %110 : vector<16x32xf32> to vector<16x32xbf16>
    %c0_40 = arith.constant 0 : index
    %c0_41 = arith.constant 0 : index
    %112 = vector.load %arg8[%c0_40, %c0_41] : memref<32x2048xbf16, #tpu.memory_space<vmem>>, vector<32x2048xbf16>
    %cst_42 = arith.constant dense<0.000000e+00> : vector<16x2048xf32>
    %113 = tpu.matmul %111, %112, %cst_42 {dimension_numbers = #tpu.dot_dimension_numbers<[1], [0], [0], [1], [0, 0, 1, 1], [], []>} : vector<16x32xbf16>, vector<32x2048xbf16>, vector<16x2048xf32> -> vector<16x2048xf32>
    %c0_43 = arith.constant 0 : index
    %c0_44 = arith.constant 0 : index
    %114 = vector.load %arg9[%c0_43, %c0_44] : memref<1x2048xf32, #tpu.memory_space<vmem>>, vector<1x2048xf32>
    %115 = vector.broadcast %114 : vector<1x2048xf32> to vector<16x2048xf32>
    %116 = arith.addf %113, %115 : vector<16x2048xf32>
    %cst_45 = arith.constant 0.000000e+00 : f32
    %117 = vector.broadcast %cst_45 : f32 to vector<16x2048xf32>
    %118 = arith.maximumf %116, %117 : vector<16x2048xf32>
    %119 = arith.truncf %118 : vector<16x2048xf32> to vector<16x2048xbf16>
    %c0_46 = arith.constant 0 : index
    %c0_47 = arith.constant 0 : index
    %120 = vector.load %arg10[%c0_46, %c0_47] : memref<2048x32xbf16, #tpu.memory_space<vmem>>, vector<2048x32xbf16>
    %cst_48 = arith.constant dense<0.000000e+00> : vector<16x32xf32>
    %121 = tpu.matmul %119, %120, %cst_48 {dimension_numbers = #tpu.dot_dimension_numbers<[1], [0], [0], [1], [0, 0, 1, 1], [], []>} : vector<16x2048xbf16>, vector<2048x32xbf16>, vector<16x32xf32> -> vector<16x32xf32>
    %c0_49 = arith.constant 0 : index
    %c0_50 = arith.constant 0 : index
    %122 = vector.load %arg11[%c0_49, %c0_50] : memref<1x32xf32, #tpu.memory_space<vmem>>, vector<1x32xf32>
    %123 = vector.broadcast %122 : vector<1x32xf32> to vector<16x32xf32>
    %124 = arith.addf %121, %123 : vector<16x32xf32>
    %125 = arith.addf %110, %124 : vector<16x32xf32>
    %c0_51 = arith.constant 0 : index
    %c0_52 = arith.constant 0 : index
    %126 = vector.load %arg12[%c0_51, %c0_52] : memref<1x32xf32, #tpu.memory_space<vmem>>, vector<1x32xf32>
    %c0_53 = arith.constant 0 : index
    %c0_54 = arith.constant 0 : index
    %127 = vector.load %arg13[%c0_53, %c0_54] : memref<1x32xf32, #tpu.memory_space<vmem>>, vector<1x32xf32>
    %cst_55 = arith.constant dense<0.000000e+00> : vector<16xf32>
    %128 = vector.multi_reduction <add>, %125, %cst_55 [1] : vector<16x32xf32> to vector<16xf32>
    %129 = vector.shape_cast %128 : vector<16xf32> to vector<16x1xf32>
    %cst_56 = arith.constant 3.200000e+01 : f32
    %130 = vector.broadcast %cst_56 : f32 to vector<16x1xf32>
    %131 = arith.divf %129, %130 : vector<16x1xf32>
    %132 = vector.broadcast %131 : vector<16x1xf32> to vector<16x32xf32>
    %133 = arith.subf %125, %132 : vector<16x32xf32>
    %134 = arith.mulf %133, %133 : vector<16x32xf32>
    %cst_57 = arith.constant dense<0.000000e+00> : vector<16xf32>
    %135 = vector.multi_reduction <add>, %134, %cst_57 [1] : vector<16x32xf32> to vector<16xf32>
    %136 = vector.shape_cast %135 : vector<16xf32> to vector<16x1xf32>
    %cst_58 = arith.constant 3.200000e+01 : f32
    %137 = vector.broadcast %cst_58 : f32 to vector<16x1xf32>
    %138 = arith.divf %136, %137 : vector<16x1xf32>
    %cst_59 = arith.constant 9.99999974E-6 : f32
    %139 = vector.broadcast %cst_59 : f32 to vector<16x1xf32>
    %140 = arith.addf %138, %139 : vector<16x1xf32>
    %141 = math.rsqrt %140 : vector<16x1xf32>
    %142 = vector.broadcast %141 : vector<16x1xf32> to vector<16x32xf32>
    %143 = arith.mulf %133, %142 : vector<16x32xf32>
    %144 = vector.broadcast %126 : vector<1x32xf32> to vector<16x32xf32>
    %145 = arith.mulf %143, %144 : vector<16x32xf32>
    %146 = vector.broadcast %127 : vector<1x32xf32> to vector<16x32xf32>
    %147 = arith.addf %145, %146 : vector<16x32xf32>
    %148 = vector.shape_cast %147 : vector<16x32xf32> to vector<2x8x32xf32>
    %c0_60 = arith.constant 0 : index
    %c0_61 = arith.constant 0 : index
    %c0_62 = arith.constant 0 : index
    %149 = vector.load %arg14[%c0_60, %c0_61, %c0_62] : memref<2x8x32xf32, #tpu.memory_space<vmem>>, vector<2x8x32xf32>
    tpu.vector_store %arg14[%c0_60, %c0_61, %c0_62], %148 {strides = array<i32>} : memref<2x8x32xf32, #tpu.memory_space<vmem>>, vector<2x8x32xf32>,
    return
  }
  func.func @transform_0(%arg0: i32) -> (i32, i32, i32) {
    %c0_i32 = arith.constant 0 : i32
    %c0_i32_0 = arith.constant 0 : i32
    %c0_i32_1 = arith.constant 0 : i32
    %c0_i32_2 = arith.constant 0 : i32
    return %c0_i32, %c0_i32_0, %c0_i32_1 : i32, i32, i32
  }
  func.func @transform_1(%arg0: i32) -> (i32, i32) {
    %c0_i32 = arith.constant 0 : i32
    %c0_i32_0 = arith.constant 0 : i32
    %c0_i32_1 = arith.constant 0 : i32
    return %c0_i32, %c0_i32_0 : i32, i32
  }
  func.func @transform_2(%arg0: i32) -> (i32, i32) {
    %c0_i32 = arith.constant 0 : i32
    %c0_i32_0 = arith.constant 0 : i32
    %c0_i32_1 = arith.constant 0 : i32
    return %c0_i32, %c0_i32_0 : i32, i32
  }
  func.func @transform_3(%arg0: i32) -> (i32, i32) {
    %c0_i32 = arith.constant 0 : i32
    %c0_i32_0 = arith.constant 0 : i32
    %c0_i32_1 = arith.constant 0 : i32
    return %c0_i32, %c0_i32_0 : i32, i32
  }
  func.func @transform_4(%arg0: i32) -> (i32, i32) {
    %c0_i32 = arith.constant 0 : i32
    %c0_i32_0 = arith.constant 0 : i32
    %c0_i32_1 = arith.constant 0 : i32
    return %c0_i32, %c0_i32_0 : i32, i32
  }
  func.func @transform_5(%arg0: i32) -> (i32, i32) {
    %c0_i32 = arith.constant 0 : i32
    %c0_i32_0 = arith.constant 0 : i32
    %c0_i32_1 = arith.constant 0 : i32
    return %c0_i32, %c0_i32_0 : i32, i32
  }
  func.func @transform_6(%arg0: i32) -> (i32, i32) {
    %c0_i32 = arith.constant 0 : i32
    %c0_i32_0 = arith.constant 0 : i32
    %c0_i32_1 = arith.constant 0 : i32
    return %c0_i32, %c0_i32_0 : i32, i32
  }
  func.func @transform_7(%arg0: i32) -> (i32, i32) {
    %c0_i32 = arith.constant 0 : i32
    %c0_i32_0 = arith.constant 0 : i32
    %c0_i32_1 = arith.constant 0 : i32
    return %c0_i32, %c0_i32_0 : i32, i32
  }
  func.func @transform_8(%arg0: i32) -> (i32, i32) {
    %c0_i32 = arith.constant 0 : i32
    %c0_i32_0 = arith.constant 0 : i32
    %c0_i32_1 = arith.constant 0 : i32
    return %c0_i32, %c0_i32_0 : i32, i32
  }
  func.func @transform_9(%arg0: i32) -> (i32, i32) {
    %c0_i32 = arith.constant 0 : i32
    %c0_i32_0 = arith.constant 0 : i32
    %c0_i32_1 = arith.constant 0 : i32
    return %c0_i32, %c0_i32_0 : i32, i32
  }
  func.func @transform_10(%arg0: i32) -> (i32, i32) {
    %c0_i32 = arith.constant 0 : i32
    %c0_i32_0 = arith.constant 0 : i32
    %c0_i32_1 = arith.constant 0 : i32
    return %c0_i32, %c0_i32_0 : i32, i32
  }
  func.func @transform_11(%arg0: i32) -> (i32, i32) {
    %c0_i32 = arith.constant 0 : i32
    %c0_i32_0 = arith.constant 0 : i32
    %c0_i32_1 = arith.constant 0 : i32
    return %c0_i32, %c0_i32_0 : i32, i32
  }
  func.func @transform_12(%arg0: i32) -> (i32, i32) {
    %c0_i32 = arith.constant 0 : i32
    %c0_i32_0 = arith.constant 0 : i32
    %c0_i32_1 = arith.constant 0 : i32
    return %c0_i32, %c0_i32_0 : i32, i32
  }
  func.func @transform_13(%arg0: i32) -> (i32, i32, i32) {
    %c0_i32 = arith.constant 0 : i32
    %c0_i32_0 = arith.constant 0 : i32
    %c0_i32_1 = arith.constant 0 : i32
    %c0_i32_2 = arith.constant 0 : i32
    return %c0_i32, %c0_i32_0, %c0_i32_1 : i32, i32, i32
  }
}

module attributes {stable_mosaic.version = 11 : i64} {
  func.func @_decoder_layer_kernel(%arg0: i32, %arg1: memref<2x8x32xf32, #tpu.memory_space<vmem>>, %arg2: memref<2x8x32xf32, #tpu.memory_space<vmem>>, %arg3: memref<32x96xf32, #tpu.memory_space<vmem>>, %arg4: memref<1x96xf32, #tpu.memory_space<vmem>>, %arg5: memref<32x32xf32, #tpu.memory_space<vmem>>, %arg6: memref<1x32xf32, #tpu.memory_space<vmem>>, %arg7: memref<1x32xf32, #tpu.memory_space<vmem>>, %arg8: memref<1x32xf32, #tpu.memory_space<vmem>>, %arg9: memref<32x96xf32, #tpu.memory_space<vmem>>, %arg10: memref<1x96xf32, #tpu.memory_space<vmem>>, %arg11: memref<32x32xf32, #tpu.memory_space<vmem>>, %arg12: memref<1x32xf32, #tpu.memory_space<vmem>>, %arg13: memref<1x32xf32, #tpu.memory_space<vmem>>, %arg14: memref<1x32xf32, #tpu.memory_space<vmem>>, %arg15: memref<32x2048xbf16, #tpu.memory_space<vmem>>, %arg16: memref<1x2048xf32, #tpu.memory_space<vmem>>, %arg17: memref<2048x32xbf16, #tpu.memory_space<vmem>>, %arg18: memref<1x32xf32, #tpu.memory_space<vmem>>, %arg19: memref<1x32xf32, #tpu.memory_space<vmem>>, %arg20: memref<1x32xf32, #tpu.memory_space<vmem>>, %arg21: memref<2x8x32xf32, #tpu.memory_space<vmem>>) attributes {dimension_semantics = [#tpu.dimension_semantics<arbitrary>], iteration_bounds = array<i64: 1>, scalar_prefetch = 0 : i64, scratch_operands = 0 : i64, tpu.core_type = #tpu.core_type<tc>, window_params = [{pipeline_mode = #tpu.pipeline_mode<synchronous>, transform_indices = @transform_0, window_bounds = array<i64: 2, 8, 32>}, {pipeline_mode = #tpu.pipeline_mode<synchronous>, transform_indices = @transform_1, window_bounds = array<i64: 2, 8, 32>}, {pipeline_mode = #tpu.pipeline_mode<synchronous>, transform_indices = @transform_2, window_bounds = array<i64: 32, 96>}, {pipeline_mode = #tpu.pipeline_mode<synchronous>, transform_indices = @transform_3, window_bounds = array<i64: 1, 96>}, {pipeline_mode = #tpu.pipeline_mode<synchronous>, transform_indices = @transform_4, window_bounds = array<i64: 32, 32>}, {pipeline_mode = #tpu.pipeline_mode<synchronous>, transform_indices = @transform_5, window_bounds = array<i64: 1, 32>}, {pipeline_mode = #tpu.pipeline_mode<synchronous>, transform_indices = @transform_6, window_bounds = array<i64: 1, 32>}, {pipeline_mode = #tpu.pipeline_mode<synchronous>, transform_indices = @transform_7, window_bounds = array<i64: 1, 32>}, {pipeline_mode = #tpu.pipeline_mode<synchronous>, transform_indices = @transform_8, window_bounds = array<i64: 32, 96>}, {pipeline_mode = #tpu.pipeline_mode<synchronous>, transform_indices = @transform_9, window_bounds = array<i64: 1, 96>}, {pipeline_mode = #tpu.pipeline_mode<synchronous>, transform_indices = @transform_10, window_bounds = array<i64: 32, 32>}, {pipeline_mode = #tpu.pipeline_mode<synchronous>, transform_indices = @transform_11, window_bounds = array<i64: 1, 32>}, {pipeline_mode = #tpu.pipeline_mode<synchronous>, transform_indices = @transform_12, window_bounds = array<i64: 1, 32>}, {pipeline_mode = #tpu.pipeline_mode<synchronous>, transform_indices = @transform_13, window_bounds = array<i64: 1, 32>}, {pipeline_mode = #tpu.pipeline_mode<synchronous>, transform_indices = @transform_14, window_bounds = array<i64: 32, 2048>}, {pipeline_mode = #tpu.pipeline_mode<synchronous>, transform_indices = @transform_15, window_bounds = array<i64: 1, 2048>}, {pipeline_mode = #tpu.pipeline_mode<synchronous>, transform_indices = @transform_16, window_bounds = array<i64: 2048, 32>}, {pipeline_mode = #tpu.pipeline_mode<synchronous>, transform_indices = @transform_17, window_bounds = array<i64: 1, 32>}, {pipeline_mode = #tpu.pipeline_mode<synchronous>, transform_indices = @transform_18, window_bounds = array<i64: 1, 32>}, {pipeline_mode = #tpu.pipeline_mode<synchronous>, transform_indices = @transform_19, window_bounds = array<i64: 1, 32>}, {pipeline_mode = #tpu.pipeline_mode<synchronous>, transform_indices = @transform_20, window_bounds = array<i64: 2, 8, 32>}]} {
    %c0 = arith.constant 0 : index
    %c0_0 = arith.constant 0 : index
    %c0_1 = arith.constant 0 : index
    %0 = vector.load %arg1[%c0, %c0_0, %c0_1] : memref<2x8x32xf32, #tpu.memory_space<vmem>>, vector<2x8x32xf32>
    %1 = vector.shape_cast %0 : vector<2x8x32xf32> to vector<16x32xf32>
    %c0_2 = arith.constant 0 : index
    %c0_3 = arith.constant 0 : index
    %c0_4 = arith.constant 0 : index
    %2 = vector.load %arg2[%c0_2, %c0_3, %c0_4] : memref<2x8x32xf32, #tpu.memory_space<vmem>>, vector<2x8x32xf32>
    %3 = vector.shape_cast %2 : vector<2x8x32xf32> to vector<16x32xf32>
    %c0_5 = arith.constant 0 : index
    %c0_6 = arith.constant 0 : index
    %4 = vector.load %arg3[%c0_5, %c0_6] : memref<32x96xf32, #tpu.memory_space<vmem>>, vector<32x96xf32>
    %cst = arith.constant dense<0.000000e+00> : vector<16x96xf32>
    %5 = tpu.matmul %1, %4, %cst {dimension_numbers = #tpu.dot_dimension_numbers<[1], [0], [0], [1], [0, 0, 1, 1], [], []>} : vector<16x32xf32>, vector<32x96xf32>, vector<16x96xf32> -> vector<16x96xf32>
    %c0_7 = arith.constant 0 : index
    %c0_8 = arith.constant 0 : index
    %6 = vector.load %arg4[%c0_7, %c0_8] : memref<1x96xf32, #tpu.memory_space<vmem>>, vector<1x96xf32>
    %7 = vector.broadcast %6 : vector<1x96xf32> to vector<16x96xf32>
    %8 = arith.addf %5, %7 : vector<16x96xf32>
    %9 = vector.extract_strided_slice %8 {offsets = [0, 0], sizes = [16, 32], strides = [1, 1]} : vector<16x96xf32> to vector<16x32xf32>
    %10 = vector.shape_cast %9 : vector<16x32xf32> to vector<2x8x32xf32>
    %11 = vector.extract_strided_slice %8 {offsets = [0, 32], sizes = [16, 32], strides = [1, 1]} : vector<16x96xf32> to vector<16x32xf32>
    %12 = vector.shape_cast %11 : vector<16x32xf32> to vector<2x8x32xf32>
    %13 = vector.extract_strided_slice %8 {offsets = [0, 64], sizes = [16, 32], strides = [1, 1]} : vector<16x96xf32> to vector<16x32xf32>
    %14 = vector.shape_cast %13 : vector<16x32xf32> to vector<2x8x32xf32>
    %15 = vector.extract_strided_slice %10 {offsets = [0, 0, 0], sizes = [2, 8, 8], strides = [1, 1, 1]} : vector<2x8x32xf32> to vector<2x8x8xf32>
    %16 = vector.extract_strided_slice %12 {offsets = [0, 0, 0], sizes = [2, 8, 8], strides = [1, 1, 1]} : vector<2x8x32xf32> to vector<2x8x8xf32>
    %17 = vector.extract_strided_slice %14 {offsets = [0, 0, 0], sizes = [2, 8, 8], strides = [1, 1, 1]} : vector<2x8x32xf32> to vector<2x8x8xf32>
    "tpu.trace_start"() <{level = 10 : i32, message = "bqd,bkd->bqk"}> : () -> ()
    %cst_9 = arith.constant dense<0.000000e+00> : vector<2x8x8xf32>
    %18 = tpu.matmul %15, %16, %cst_9 {dimension_numbers = #tpu.dot_dimension_numbers<[2], [2], [1], [1], [0, 0, 0, 1, 1, 1], [0], [0]>} : vector<2x8x8xf32>, vector<2x8x8xf32>, vector<2x8x8xf32> -> vector<2x8x8xf32>
    "tpu.trace_stop"() : () -> ()
    %cst_10 = arith.constant 0.353553385 : f32
    %19 = vector.broadcast %cst_10 : f32 to vector<2x8x8xf32>
    %20 = arith.mulf %18, %19 : vector<2x8x8xf32>
    %cst_11 = arith.constant dense<0xFF800000> : vector<2x8xf32>
    %21 = vector.multi_reduction <maximumf>, %20, %cst_11 [2] : vector<2x8x8xf32> to vector<2x8xf32>
    %22 = vector.shape_cast %21 : vector<2x8xf32> to vector<2x8x1xf32>
    %23 = vector.broadcast %22 : vector<2x8x1xf32> to vector<2x8x8xf32>
    %24 = arith.subf %20, %23 : vector<2x8x8xf32>
    %25 = math.exp %24 : vector<2x8x8xf32>
    %cst_12 = arith.constant dense<0.000000e+00> : vector<2x8xf32>
    %26 = vector.multi_reduction <add>, %25, %cst_12 [2] : vector<2x8x8xf32> to vector<2x8xf32>
    %27 = vector.shape_cast %26 : vector<2x8xf32> to vector<2x8x1xf32>
    %28 = tpu.reciprocal %27 {approx = true} : vector<2x8x1xf32> -> vector<2x8x1xf32>
    %29 = vector.broadcast %28 : vector<2x8x1xf32> to vector<2x8x8xf32>
    %30 = arith.mulf %25, %29 : vector<2x8x8xf32>
    "tpu.trace_start"() <{level = 10 : i32, message = "bqk,bkd->bqd"}> : () -> ()
    %cst_13 = arith.constant dense<0.000000e+00> : vector<2x8x8xf32>
    %31 = tpu.matmul %30, %17, %cst_13 {dimension_numbers = #tpu.dot_dimension_numbers<[2], [1], [1], [2], [0, 0, 0, 1, 1, 2], [0], [0]>} : vector<2x8x8xf32>, vector<2x8x8xf32>, vector<2x8x8xf32> -> vector<2x8x8xf32>
    "tpu.trace_stop"() : () -> ()
    %32 = vector.extract_strided_slice %10 {offsets = [0, 0, 8], sizes = [2, 8, 8], strides = [1, 1, 1]} : vector<2x8x32xf32> to vector<2x8x8xf32>
    %33 = vector.extract_strided_slice %12 {offsets = [0, 0, 8], sizes = [2, 8, 8], strides = [1, 1, 1]} : vector<2x8x32xf32> to vector<2x8x8xf32>
    %34 = vector.extract_strided_slice %14 {offsets = [0, 0, 8], sizes = [2, 8, 8], strides = [1, 1, 1]} : vector<2x8x32xf32> to vector<2x8x8xf32>
    "tpu.trace_start"() <{level = 10 : i32, message = "bqd,bkd->bqk"}> : () -> ()
    %cst_14 = arith.constant dense<0.000000e+00> : vector<2x8x8xf32>
    %35 = tpu.matmul %32, %33, %cst_14 {dimension_numbers = #tpu.dot_dimension_numbers<[2], [2], [1], [1], [0, 0, 0, 1, 1, 1], [0], [0]>} : vector<2x8x8xf32>, vector<2x8x8xf32>, vector<2x8x8xf32> -> vector<2x8x8xf32>
    "tpu.trace_stop"() : () -> ()
    %cst_15 = arith.constant 0.353553385 : f32
    %36 = vector.broadcast %cst_15 : f32 to vector<2x8x8xf32>
    %37 = arith.mulf %35, %36 : vector<2x8x8xf32>
    %cst_16 = arith.constant dense<0xFF800000> : vector<2x8xf32>
    %38 = vector.multi_reduction <maximumf>, %37, %cst_16 [2] : vector<2x8x8xf32> to vector<2x8xf32>
    %39 = vector.shape_cast %38 : vector<2x8xf32> to vector<2x8x1xf32>
    %40 = vector.broadcast %39 : vector<2x8x1xf32> to vector<2x8x8xf32>
    %41 = arith.subf %37, %40 : vector<2x8x8xf32>
    %42 = math.exp %41 : vector<2x8x8xf32>
    %cst_17 = arith.constant dense<0.000000e+00> : vector<2x8xf32>
    %43 = vector.multi_reduction <add>, %42, %cst_17 [2] : vector<2x8x8xf32> to vector<2x8xf32>
    %44 = vector.shape_cast %43 : vector<2x8xf32> to vector<2x8x1xf32>
    %45 = tpu.reciprocal %44 {approx = true} : vector<2x8x1xf32> -> vector<2x8x1xf32>
    %46 = vector.broadcast %45 : vector<2x8x1xf32> to vector<2x8x8xf32>
    %47 = arith.mulf %42, %46 : vector<2x8x8xf32>
    "tpu.trace_start"() <{level = 10 : i32, message = "bqk,bkd->bqd"}> : () -> ()
    %cst_18 = arith.constant dense<0.000000e+00> : vector<2x8x8xf32>
    %48 = tpu.matmul %47, %34, %cst_18 {dimension_numbers = #tpu.dot_dimension_numbers<[2], [1], [1], [2], [0, 0, 0, 1, 1, 2], [0], [0]>} : vector<2x8x8xf32>, vector<2x8x8xf32>, vector<2x8x8xf32> -> vector<2x8x8xf32>
    "tpu.trace_stop"() : () -> ()
    %49 = vector.extract_strided_slice %10 {offsets = [0, 0, 16], sizes = [2, 8, 8], strides = [1, 1, 1]} : vector<2x8x32xf32> to vector<2x8x8xf32>
    %50 = vector.extract_strided_slice %12 {offsets = [0, 0, 16], sizes = [2, 8, 8], strides = [1, 1, 1]} : vector<2x8x32xf32> to vector<2x8x8xf32>
    %51 = vector.extract_strided_slice %14 {offsets = [0, 0, 16], sizes = [2, 8, 8], strides = [1, 1, 1]} : vector<2x8x32xf32> to vector<2x8x8xf32>
    "tpu.trace_start"() <{level = 10 : i32, message = "bqd,bkd->bqk"}> : () -> ()
    %cst_19 = arith.constant dense<0.000000e+00> : vector<2x8x8xf32>
    %52 = tpu.matmul %49, %50, %cst_19 {dimension_numbers = #tpu.dot_dimension_numbers<[2], [2], [1], [1], [0, 0, 0, 1, 1, 1], [0], [0]>} : vector<2x8x8xf32>, vector<2x8x8xf32>, vector<2x8x8xf32> -> vector<2x8x8xf32>
    "tpu.trace_stop"() : () -> ()
    %cst_20 = arith.constant 0.353553385 : f32
    %53 = vector.broadcast %cst_20 : f32 to vector<2x8x8xf32>
    %54 = arith.mulf %52, %53 : vector<2x8x8xf32>
    %cst_21 = arith.constant dense<0xFF800000> : vector<2x8xf32>
    %55 = vector.multi_reduction <maximumf>, %54, %cst_21 [2] : vector<2x8x8xf32> to vector<2x8xf32>
    %56 = vector.shape_cast %55 : vector<2x8xf32> to vector<2x8x1xf32>
    %57 = vector.broadcast %56 : vector<2x8x1xf32> to vector<2x8x8xf32>
    %58 = arith.subf %54, %57 : vector<2x8x8xf32>
    %59 = math.exp %58 : vector<2x8x8xf32>
    %cst_22 = arith.constant dense<0.000000e+00> : vector<2x8xf32>
    %60 = vector.multi_reduction <add>, %59, %cst_22 [2] : vector<2x8x8xf32> to vector<2x8xf32>
    %61 = vector.shape_cast %60 : vector<2x8xf32> to vector<2x8x1xf32>
    %62 = tpu.reciprocal %61 {approx = true} : vector<2x8x1xf32> -> vector<2x8x1xf32>
    %63 = vector.broadcast %62 : vector<2x8x1xf32> to vector<2x8x8xf32>
    %64 = arith.mulf %59, %63 : vector<2x8x8xf32>
    "tpu.trace_start"() <{level = 10 : i32, message = "bqk,bkd->bqd"}> : () -> ()
    %cst_23 = arith.constant dense<0.000000e+00> : vector<2x8x8xf32>
    %65 = tpu.matmul %64, %51, %cst_23 {dimension_numbers = #tpu.dot_dimension_numbers<[2], [1], [1], [2], [0, 0, 0, 1, 1, 2], [0], [0]>} : vector<2x8x8xf32>, vector<2x8x8xf32>, vector<2x8x8xf32> -> vector<2x8x8xf32>
    "tpu.trace_stop"() : () -> ()
    %66 = vector.extract_strided_slice %10 {offsets = [0, 0, 24], sizes = [2, 8, 8], strides = [1, 1, 1]} : vector<2x8x32xf32> to vector<2x8x8xf32>
    %67 = vector.extract_strided_slice %12 {offsets = [0, 0, 24], sizes = [2, 8, 8], strides = [1, 1, 1]} : vector<2x8x32xf32> to vector<2x8x8xf32>
    %68 = vector.extract_strided_slice %14 {offsets = [0, 0, 24], sizes = [2, 8, 8], strides = [1, 1, 1]} : vector<2x8x32xf32> to vector<2x8x8xf32>
    "tpu.trace_start"() <{level = 10 : i32, message = "bqd,bkd->bqk"}> : () -> ()
    %cst_24 = arith.constant dense<0.000000e+00> : vector<2x8x8xf32>
    %69 = tpu.matmul %66, %67, %cst_24 {dimension_numbers = #tpu.dot_dimension_numbers<[2], [2], [1], [1], [0, 0, 0, 1, 1, 1], [0], [0]>} : vector<2x8x8xf32>, vector<2x8x8xf32>, vector<2x8x8xf32> -> vector<2x8x8xf32>
    "tpu.trace_stop"() : () -> ()
    %cst_25 = arith.constant 0.353553385 : f32
    %70 = vector.broadcast %cst_25 : f32 to vector<2x8x8xf32>
    %71 = arith.mulf %69, %70 : vector<2x8x8xf32>
    %cst_26 = arith.constant dense<0xFF800000> : vector<2x8xf32>
    %72 = vector.multi_reduction <maximumf>, %71, %cst_26 [2] : vector<2x8x8xf32> to vector<2x8xf32>
    %73 = vector.shape_cast %72 : vector<2x8xf32> to vector<2x8x1xf32>
    %74 = vector.broadcast %73 : vector<2x8x1xf32> to vector<2x8x8xf32>
    %75 = arith.subf %71, %74 : vector<2x8x8xf32>
    %76 = math.exp %75 : vector<2x8x8xf32>
    %cst_27 = arith.constant dense<0.000000e+00> : vector<2x8xf32>
    %77 = vector.multi_reduction <add>, %76, %cst_27 [2] : vector<2x8x8xf32> to vector<2x8xf32>
    %78 = vector.shape_cast %77 : vector<2x8xf32> to vector<2x8x1xf32>
    %79 = tpu.reciprocal %78 {approx = true} : vector<2x8x1xf32> -> vector<2x8x1xf32>
    %80 = vector.broadcast %79 : vector<2x8x1xf32> to vector<2x8x8xf32>
    %81 = arith.mulf %76, %80 : vector<2x8x8xf32>
    "tpu.trace_start"() <{level = 10 : i32, message = "bqk,bkd->bqd"}> : () -> ()
    %cst_28 = arith.constant dense<0.000000e+00> : vector<2x8x8xf32>
    %82 = tpu.matmul %81, %68, %cst_28 {dimension_numbers = #tpu.dot_dimension_numbers<[2], [1], [1], [2], [0, 0, 0, 1, 1, 2], [0], [0]>} : vector<2x8x8xf32>, vector<2x8x8xf32>, vector<2x8x8xf32> -> vector<2x8x8xf32>
    "tpu.trace_stop"() : () -> ()
    %83 = tpu.concatenate %31, %48, %65, %82 in 2 : vector<2x8x8xf32>, vector<2x8x8xf32>, vector<2x8x8xf32>, vector<2x8x8xf32> -> vector<2x8x32xf32>
    %84 = vector.shape_cast %83 : vector<2x8x32xf32> to vector<16x32xf32>
    %c0_29 = arith.constant 0 : index
    %c0_30 = arith.constant 0 : index
    %85 = vector.load %arg5[%c0_29, %c0_30] : memref<32x32xf32, #tpu.memory_space<vmem>>, vector<32x32xf32>
    %cst_31 = arith.constant dense<0.000000e+00> : vector<16x32xf32>
    %86 = tpu.matmul %84, %85, %cst_31 {dimension_numbers = #tpu.dot_dimension_numbers<[1], [0], [0], [1], [0, 0, 1, 1], [], []>} : vector<16x32xf32>, vector<32x32xf32>, vector<16x32xf32> -> vector<16x32xf32>
    %c0_32 = arith.constant 0 : index
    %c0_33 = arith.constant 0 : index
    %87 = vector.load %arg6[%c0_32, %c0_33] : memref<1x32xf32, #tpu.memory_space<vmem>>, vector<1x32xf32>
    %88 = vector.broadcast %87 : vector<1x32xf32> to vector<16x32xf32>
    %89 = arith.addf %86, %88 : vector<16x32xf32>
    %90 = arith.addf %1, %89 : vector<16x32xf32>
    %c0_34 = arith.constant 0 : index
    %c0_35 = arith.constant 0 : index
    %91 = vector.load %arg7[%c0_34, %c0_35] : memref<1x32xf32, #tpu.memory_space<vmem>>, vector<1x32xf32>
    %c0_36 = arith.constant 0 : index
    %c0_37 = arith.constant 0 : index
    %92 = vector.load %arg8[%c0_36, %c0_37] : memref<1x32xf32, #tpu.memory_space<vmem>>, vector<1x32xf32>
    %cst_38 = arith.constant dense<0.000000e+00> : vector<16xf32>
    %93 = vector.multi_reduction <add>, %90, %cst_38 [1] : vector<16x32xf32> to vector<16xf32>
    %94 = vector.shape_cast %93 : vector<16xf32> to vector<16x1xf32>
    %cst_39 = arith.constant 3.200000e+01 : f32
    %95 = vector.broadcast %cst_39 : f32 to vector<16x1xf32>
    %96 = arith.divf %94, %95 : vector<16x1xf32>
    %97 = vector.broadcast %96 : vector<16x1xf32> to vector<16x32xf32>
    %98 = arith.subf %90, %97 : vector<16x32xf32>
    %99 = arith.mulf %98, %98 : vector<16x32xf32>
    %cst_40 = arith.constant dense<0.000000e+00> : vector<16xf32>
    %100 = vector.multi_reduction <add>, %99, %cst_40 [1] : vector<16x32xf32> to vector<16xf32>
    %101 = vector.shape_cast %100 : vector<16xf32> to vector<16x1xf32>
    %cst_41 = arith.constant 3.200000e+01 : f32
    %102 = vector.broadcast %cst_41 : f32 to vector<16x1xf32>
    %103 = arith.divf %101, %102 : vector<16x1xf32>
    %cst_42 = arith.constant 9.99999974E-6 : f32
    %104 = vector.broadcast %cst_42 : f32 to vector<16x1xf32>
    %105 = arith.addf %103, %104 : vector<16x1xf32>
    %106 = math.rsqrt %105 : vector<16x1xf32>
    %107 = vector.broadcast %106 : vector<16x1xf32> to vector<16x32xf32>
    %108 = arith.mulf %98, %107 : vector<16x32xf32>
    %109 = vector.broadcast %91 : vector<1x32xf32> to vector<16x32xf32>
    %110 = arith.mulf %108, %109 : vector<16x32xf32>
    %111 = vector.broadcast %92 : vector<1x32xf32> to vector<16x32xf32>
    %112 = arith.addf %110, %111 : vector<16x32xf32>
    %c0_43 = arith.constant 0 : index
    %c0_44 = arith.constant 0 : index
    %113 = vector.load %arg9[%c0_43, %c0_44] : memref<32x96xf32, #tpu.memory_space<vmem>>, vector<32x96xf32>
    %c0_45 = arith.constant 0 : index
    %c0_46 = arith.constant 0 : index
    %114 = vector.load %arg10[%c0_45, %c0_46] : memref<1x96xf32, #tpu.memory_space<vmem>>, vector<1x96xf32>
    %115 = vector.extract_strided_slice %113 {offsets = [0, 0], sizes = [32, 32], strides = [1, 1]} : vector<32x96xf32> to vector<32x32xf32>
    %cst_47 = arith.constant dense<0.000000e+00> : vector<16x32xf32>
    %116 = tpu.matmul %112, %115, %cst_47 {dimension_numbers = #tpu.dot_dimension_numbers<[1], [0], [0], [1], [0, 0, 1, 1], [], []>} : vector<16x32xf32>, vector<32x32xf32>, vector<16x32xf32> -> vector<16x32xf32>
    %117 = vector.extract_strided_slice %114 {offsets = [0, 0], sizes = [1, 32], strides = [1, 1]} : vector<1x96xf32> to vector<1x32xf32>
    %118 = vector.broadcast %117 : vector<1x32xf32> to vector<16x32xf32>
    %119 = arith.addf %116, %118 : vector<16x32xf32>
    %120 = vector.shape_cast %119 : vector<16x32xf32> to vector<2x8x32xf32>
    %121 = vector.extract_strided_slice %113 {offsets = [0, 32], sizes = [32, 64], strides = [1, 1]} : vector<32x96xf32> to vector<32x64xf32>
    %cst_48 = arith.constant dense<0.000000e+00> : vector<16x64xf32>
    %122 = tpu.matmul %3, %121, %cst_48 {dimension_numbers = #tpu.dot_dimension_numbers<[1], [0], [0], [1], [0, 0, 1, 1], [], []>} : vector<16x32xf32>, vector<32x64xf32>, vector<16x64xf32> -> vector<16x64xf32>
    %123 = vector.extract_strided_slice %114 {offsets = [0, 32], sizes = [1, 64], strides = [1, 1]} : vector<1x96xf32> to vector<1x64xf32>
    %124 = vector.broadcast %123 : vector<1x64xf32> to vector<16x64xf32>
    %125 = arith.addf %122, %124 : vector<16x64xf32>
    %126 = vector.extract_strided_slice %125 {offsets = [0, 0], sizes = [16, 32], strides = [1, 1]} : vector<16x64xf32> to vector<16x32xf32>
    %127 = vector.shape_cast %126 : vector<16x32xf32> to vector<2x8x32xf32>
    %128 = vector.extract_strided_slice %125 {offsets = [0, 32], sizes = [16, 32], strides = [1, 1]} : vector<16x64xf32> to vector<16x32xf32>
    %129 = vector.shape_cast %128 : vector<16x32xf32> to vector<2x8x32xf32>
    %130 = vector.extract_strided_slice %120 {offsets = [0, 0, 0], sizes = [2, 8, 8], strides = [1, 1, 1]} : vector<2x8x32xf32> to vector<2x8x8xf32>
    %131 = vector.extract_strided_slice %127 {offsets = [0, 0, 0], sizes = [2, 8, 8], strides = [1, 1, 1]} : vector<2x8x32xf32> to vector<2x8x8xf32>
    %132 = vector.extract_strided_slice %129 {offsets = [0, 0, 0], sizes = [2, 8, 8], strides = [1, 1, 1]} : vector<2x8x32xf32> to vector<2x8x8xf32>
    "tpu.trace_start"() <{level = 10 : i32, message = "bqd,bkd->bqk"}> : () -> ()
    %cst_49 = arith.constant dense<0.000000e+00> : vector<2x8x8xf32>
    %133 = tpu.matmul %130, %131, %cst_49 {dimension_numbers = #tpu.dot_dimension_numbers<[2], [2], [1], [1], [0, 0, 0, 1, 1, 1], [0], [0]>} : vector<2x8x8xf32>, vector<2x8x8xf32>, vector<2x8x8xf32> -> vector<2x8x8xf32>
    "tpu.trace_stop"() : () -> ()
    %cst_50 = arith.constant 0.353553385 : f32
    %134 = vector.broadcast %cst_50 : f32 to vector<2x8x8xf32>
    %135 = arith.mulf %133, %134 : vector<2x8x8xf32>
    %cst_51 = arith.constant dense<0xFF800000> : vector<2x8xf32>
    %136 = vector.multi_reduction <maximumf>, %135, %cst_51 [2] : vector<2x8x8xf32> to vector<2x8xf32>
    %137 = vector.shape_cast %136 : vector<2x8xf32> to vector<2x8x1xf32>
    %138 = vector.broadcast %137 : vector<2x8x1xf32> to vector<2x8x8xf32>
    %139 = arith.subf %135, %138 : vector<2x8x8xf32>
    %140 = math.exp %139 : vector<2x8x8xf32>
    %cst_52 = arith.constant dense<0.000000e+00> : vector<2x8xf32>
    %141 = vector.multi_reduction <add>, %140, %cst_52 [2] : vector<2x8x8xf32> to vector<2x8xf32>
    %142 = vector.shape_cast %141 : vector<2x8xf32> to vector<2x8x1xf32>
    %143 = tpu.reciprocal %142 {approx = true} : vector<2x8x1xf32> -> vector<2x8x1xf32>
    %144 = vector.broadcast %143 : vector<2x8x1xf32> to vector<2x8x8xf32>
    %145 = arith.mulf %140, %144 : vector<2x8x8xf32>
    "tpu.trace_start"() <{level = 10 : i32, message = "bqk,bkd->bqd"}> : () -> ()
    %cst_53 = arith.constant dense<0.000000e+00> : vector<2x8x8xf32>
    %146 = tpu.matmul %145, %132, %cst_53 {dimension_numbers = #tpu.dot_dimension_numbers<[2], [1], [1], [2], [0, 0, 0, 1, 1, 2], [0], [0]>} : vector<2x8x8xf32>, vector<2x8x8xf32>, vector<2x8x8xf32> -> vector<2x8x8xf32>
    "tpu.trace_stop"() : () -> ()
    %147 = vector.extract_strided_slice %120 {offsets = [0, 0, 8], sizes = [2, 8, 8], strides = [1, 1, 1]} : vector<2x8x32xf32> to vector<2x8x8xf32>
    %148 = vector.extract_strided_slice %127 {offsets = [0, 0, 8], sizes = [2, 8, 8], strides = [1, 1, 1]} : vector<2x8x32xf32> to vector<2x8x8xf32>
    %149 = vector.extract_strided_slice %129 {offsets = [0, 0, 8], sizes = [2, 8, 8], strides = [1, 1, 1]} : vector<2x8x32xf32> to vector<2x8x8xf32>
    "tpu.trace_start"() <{level = 10 : i32, message = "bqd,bkd->bqk"}> : () -> ()
    %cst_54 = arith.constant dense<0.000000e+00> : vector<2x8x8xf32>
    %150 = tpu.matmul %147, %148, %cst_54 {dimension_numbers = #tpu.dot_dimension_numbers<[2], [2], [1], [1], [0, 0, 0, 1, 1, 1], [0], [0]>} : vector<2x8x8xf32>, vector<2x8x8xf32>, vector<2x8x8xf32> -> vector<2x8x8xf32>
    "tpu.trace_stop"() : () -> ()
    %cst_55 = arith.constant 0.353553385 : f32
    %151 = vector.broadcast %cst_55 : f32 to vector<2x8x8xf32>
    %152 = arith.mulf %150, %151 : vector<2x8x8xf32>
    %cst_56 = arith.constant dense<0xFF800000> : vector<2x8xf32>
    %153 = vector.multi_reduction <maximumf>, %152, %cst_56 [2] : vector<2x8x8xf32> to vector<2x8xf32>
    %154 = vector.shape_cast %153 : vector<2x8xf32> to vector<2x8x1xf32>
    %155 = vector.broadcast %154 : vector<2x8x1xf32> to vector<2x8x8xf32>
    %156 = arith.subf %152, %155 : vector<2x8x8xf32>
    %157 = math.exp %156 : vector<2x8x8xf32>
    %cst_57 = arith.constant dense<0.000000e+00> : vector<2x8xf32>
    %158 = vector.multi_reduction <add>, %157, %cst_57 [2] : vector<2x8x8xf32> to vector<2x8xf32>
    %159 = vector.shape_cast %158 : vector<2x8xf32> to vector<2x8x1xf32>
    %160 = tpu.reciprocal %159 {approx = true} : vector<2x8x1xf32> -> vector<2x8x1xf32>
    %161 = vector.broadcast %160 : vector<2x8x1xf32> to vector<2x8x8xf32>
    %162 = arith.mulf %157, %161 : vector<2x8x8xf32>
    "tpu.trace_start"() <{level = 10 : i32, message = "bqk,bkd->bqd"}> : () -> ()
    %cst_58 = arith.constant dense<0.000000e+00> : vector<2x8x8xf32>
    %163 = tpu.matmul %162, %149, %cst_58 {dimension_numbers = #tpu.dot_dimension_numbers<[2], [1], [1], [2], [0, 0, 0, 1, 1, 2], [0], [0]>} : vector<2x8x8xf32>, vector<2x8x8xf32>, vector<2x8x8xf32> -> vector<2x8x8xf32>
    "tpu.trace_stop"() : () -> ()
    %164 = vector.extract_strided_slice %120 {offsets = [0, 0, 16], sizes = [2, 8, 8], strides = [1, 1, 1]} : vector<2x8x32xf32> to vector<2x8x8xf32>
    %165 = vector.extract_strided_slice %127 {offsets = [0, 0, 16], sizes = [2, 8, 8], strides = [1, 1, 1]} : vector<2x8x32xf32> to vector<2x8x8xf32>
    %166 = vector.extract_strided_slice %129 {offsets = [0, 0, 16], sizes = [2, 8, 8], strides = [1, 1, 1]} : vector<2x8x32xf32> to vector<2x8x8xf32>
    "tpu.trace_start"() <{level = 10 : i32, message = "bqd,bkd->bqk"}> : () -> ()
    %cst_59 = arith.constant dense<0.000000e+00> : vector<2x8x8xf32>
    %167 = tpu.matmul %164, %165, %cst_59 {dimension_numbers = #tpu.dot_dimension_numbers<[2], [2], [1], [1], [0, 0, 0, 1, 1, 1], [0], [0]>} : vector<2x8x8xf32>, vector<2x8x8xf32>, vector<2x8x8xf32> -> vector<2x8x8xf32>
    "tpu.trace_stop"() : () -> ()
    %cst_60 = arith.constant 0.353553385 : f32
    %168 = vector.broadcast %cst_60 : f32 to vector<2x8x8xf32>
    %169 = arith.mulf %167, %168 : vector<2x8x8xf32>
    %cst_61 = arith.constant dense<0xFF800000> : vector<2x8xf32>
    %170 = vector.multi_reduction <maximumf>, %169, %cst_61 [2] : vector<2x8x8xf32> to vector<2x8xf32>
    %171 = vector.shape_cast %170 : vector<2x8xf32> to vector<2x8x1xf32>
    %172 = vector.broadcast %171 : vector<2x8x1xf32> to vector<2x8x8xf32>
    %173 = arith.subf %169, %172 : vector<2x8x8xf32>
    %174 = math.exp %173 : vector<2x8x8xf32>
    %cst_62 = arith.constant dense<0.000000e+00> : vector<2x8xf32>
    %175 = vector.multi_reduction <add>, %174, %cst_62 [2] : vector<2x8x8xf32> to vector<2x8xf32>
    %176 = vector.shape_cast %175 : vector<2x8xf32> to vector<2x8x1xf32>
    %177 = tpu.reciprocal %176 {approx = true} : vector<2x8x1xf32> -> vector<2x8x1xf32>
    %178 = vector.broadcast %177 : vector<2x8x1xf32> to vector<2x8x8xf32>
    %179 = arith.mulf %174, %178 : vector<2x8x8xf32>
    "tpu.trace_start"() <{level = 10 : i32, message = "bqk,bkd->bqd"}> : () -> ()
    %cst_63 = arith.constant dense<0.000000e+00> : vector<2x8x8xf32>
    %180 = tpu.matmul %179, %166, %cst_63 {dimension_numbers = #tpu.dot_dimension_numbers<[2], [1], [1], [2], [0, 0, 0, 1, 1, 2], [0], [0]>} : vector<2x8x8xf32>, vector<2x8x8xf32>, vector<2x8x8xf32> -> vector<2x8x8xf32>
    "tpu.trace_stop"() : () -> ()
    %181 = vector.extract_strided_slice %120 {offsets = [0, 0, 24], sizes = [2, 8, 8], strides = [1, 1, 1]} : vector<2x8x32xf32> to vector<2x8x8xf32>
    %182 = vector.extract_strided_slice %127 {offsets = [0, 0, 24], sizes = [2, 8, 8], strides = [1, 1, 1]} : vector<2x8x32xf32> to vector<2x8x8xf32>
    %183 = vector.extract_strided_slice %129 {offsets = [0, 0, 24], sizes = [2, 8, 8], strides = [1, 1, 1]} : vector<2x8x32xf32> to vector<2x8x8xf32>
    "tpu.trace_start"() <{level = 10 : i32, message = "bqd,bkd->bqk"}> : () -> ()
    %cst_64 = arith.constant dense<0.000000e+00> : vector<2x8x8xf32>
    %184 = tpu.matmul %181, %182, %cst_64 {dimension_numbers = #tpu.dot_dimension_numbers<[2], [2], [1], [1], [0, 0, 0, 1, 1, 1], [0], [0]>} : vector<2x8x8xf32>, vector<2x8x8xf32>, vector<2x8x8xf32> -> vector<2x8x8xf32>
    "tpu.trace_stop"() : () -> ()
    %cst_65 = arith.constant 0.353553385 : f32
    %185 = vector.broadcast %cst_65 : f32 to vector<2x8x8xf32>
    %186 = arith.mulf %184, %185 : vector<2x8x8xf32>
    %cst_66 = arith.constant dense<0xFF800000> : vector<2x8xf32>
    %187 = vector.multi_reduction <maximumf>, %186, %cst_66 [2] : vector<2x8x8xf32> to vector<2x8xf32>
    %188 = vector.shape_cast %187 : vector<2x8xf32> to vector<2x8x1xf32>
    %189 = vector.broadcast %188 : vector<2x8x1xf32> to vector<2x8x8xf32>
    %190 = arith.subf %186, %189 : vector<2x8x8xf32>
    %191 = math.exp %190 : vector<2x8x8xf32>
    %cst_67 = arith.constant dense<0.000000e+00> : vector<2x8xf32>
    %192 = vector.multi_reduction <add>, %191, %cst_67 [2] : vector<2x8x8xf32> to vector<2x8xf32>
    %193 = vector.shape_cast %192 : vector<2x8xf32> to vector<2x8x1xf32>
    %194 = tpu.reciprocal %193 {approx = true} : vector<2x8x1xf32> -> vector<2x8x1xf32>
    %195 = vector.broadcast %194 : vector<2x8x1xf32> to vector<2x8x8xf32>
    %196 = arith.mulf %191, %195 : vector<2x8x8xf32>
    "tpu.trace_start"() <{level = 10 : i32, message = "bqk,bkd->bqd"}> : () -> ()
    %cst_68 = arith.constant dense<0.000000e+00> : vector<2x8x8xf32>
    %197 = tpu.matmul %196, %183, %cst_68 {dimension_numbers = #tpu.dot_dimension_numbers<[2], [1], [1], [2], [0, 0, 0, 1, 1, 2], [0], [0]>} : vector<2x8x8xf32>, vector<2x8x8xf32>, vector<2x8x8xf32> -> vector<2x8x8xf32>
    "tpu.trace_stop"() : () -> ()
    %198 = tpu.concatenate %146, %163, %180, %197 in 2 : vector<2x8x8xf32>, vector<2x8x8xf32>, vector<2x8x8xf32>, vector<2x8x8xf32> -> vector<2x8x32xf32>
    %199 = vector.shape_cast %198 : vector<2x8x32xf32> to vector<16x32xf32>
    %c0_69 = arith.constant 0 : index
    %c0_70 = arith.constant 0 : index
    %200 = vector.load %arg11[%c0_69, %c0_70] : memref<32x32xf32, #tpu.memory_space<vmem>>, vector<32x32xf32>
    %cst_71 = arith.constant dense<0.000000e+00> : vector<16x32xf32>
    %201 = tpu.matmul %199, %200, %cst_71 {dimension_numbers = #tpu.dot_dimension_numbers<[1], [0], [0], [1], [0, 0, 1, 1], [], []>} : vector<16x32xf32>, vector<32x32xf32>, vector<16x32xf32> -> vector<16x32xf32>
    %c0_72 = arith.constant 0 : index
    %c0_73 = arith.constant 0 : index
    %202 = vector.load %arg12[%c0_72, %c0_73] : memref<1x32xf32, #tpu.memory_space<vmem>>, vector<1x32xf32>
    %203 = vector.broadcast %202 : vector<1x32xf32> to vector<16x32xf32>
    %204 = arith.addf %201, %203 : vector<16x32xf32>
    %205 = arith.addf %112, %204 : vector<16x32xf32>
    %c0_74 = arith.constant 0 : index
    %c0_75 = arith.constant 0 : index
    %206 = vector.load %arg13[%c0_74, %c0_75] : memref<1x32xf32, #tpu.memory_space<vmem>>, vector<1x32xf32>
    %c0_76 = arith.constant 0 : index
    %c0_77 = arith.constant 0 : index
    %207 = vector.load %arg14[%c0_76, %c0_77] : memref<1x32xf32, #tpu.memory_space<vmem>>, vector<1x32xf32>
    %cst_78 = arith.constant dense<0.000000e+00> : vector<16xf32>
    %208 = vector.multi_reduction <add>, %205, %cst_78 [1] : vector<16x32xf32> to vector<16xf32>
    %209 = vector.shape_cast %208 : vector<16xf32> to vector<16x1xf32>
    %cst_79 = arith.constant 3.200000e+01 : f32
    %210 = vector.broadcast %cst_79 : f32 to vector<16x1xf32>
    %211 = arith.divf %209, %210 : vector<16x1xf32>
    %212 = vector.broadcast %211 : vector<16x1xf32> to vector<16x32xf32>
    %213 = arith.subf %205, %212 : vector<16x32xf32>
    %214 = arith.mulf %213, %213 : vector<16x32xf32>
    %cst_80 = arith.constant dense<0.000000e+00> : vector<16xf32>
    %215 = vector.multi_reduction <add>, %214, %cst_80 [1] : vector<16x32xf32> to vector<16xf32>
    %216 = vector.shape_cast %215 : vector<16xf32> to vector<16x1xf32>
    %cst_81 = arith.constant 3.200000e+01 : f32
    %217 = vector.broadcast %cst_81 : f32 to vector<16x1xf32>
    %218 = arith.divf %216, %217 : vector<16x1xf32>
    %cst_82 = arith.constant 9.99999974E-6 : f32
    %219 = vector.broadcast %cst_82 : f32 to vector<16x1xf32>
    %220 = arith.addf %218, %219 : vector<16x1xf32>
    %221 = math.rsqrt %220 : vector<16x1xf32>
    %222 = vector.broadcast %221 : vector<16x1xf32> to vector<16x32xf32>
    %223 = arith.mulf %213, %222 : vector<16x32xf32>
    %224 = vector.broadcast %206 : vector<1x32xf32> to vector<16x32xf32>
    %225 = arith.mulf %223, %224 : vector<16x32xf32>
    %226 = vector.broadcast %207 : vector<1x32xf32> to vector<16x32xf32>
    %227 = arith.addf %225, %226 : vector<16x32xf32>
    %228 = arith.truncf %227 : vector<16x32xf32> to vector<16x32xbf16>
    %c0_83 = arith.constant 0 : index
    %c0_84 = arith.constant 0 : index
    %229 = vector.load %arg15[%c0_83, %c0_84] : memref<32x2048xbf16, #tpu.memory_space<vmem>>, vector<32x2048xbf16>
    %cst_85 = arith.constant dense<0.000000e+00> : vector<16x2048xf32>
    %230 = tpu.matmul %228, %229, %cst_85 {dimension_numbers = #tpu.dot_dimension_numbers<[1], [0], [0], [1], [0, 0, 1, 1], [], []>} : vector<16x32xbf16>, vector<32x2048xbf16>, vector<16x2048xf32> -> vector<16x2048xf32>
    %c0_86 = arith.constant 0 : index
    %c0_87 = arith.constant 0 : index
    %231 = vector.load %arg16[%c0_86, %c0_87] : memref<1x2048xf32, #tpu.memory_space<vmem>>, vector<1x2048xf32>
    %232 = vector.broadcast %231 : vector<1x2048xf32> to vector<16x2048xf32>
    %233 = arith.addf %230, %232 : vector<16x2048xf32>
    %cst_88 = arith.constant 0.000000e+00 : f32
    %234 = vector.broadcast %cst_88 : f32 to vector<16x2048xf32>
    %235 = arith.maximumf %233, %234 : vector<16x2048xf32>
    %236 = arith.truncf %235 : vector<16x2048xf32> to vector<16x2048xbf16>
    %c0_89 = arith.constant 0 : index
    %c0_90 = arith.constant 0 : index
    %237 = vector.load %arg17[%c0_89, %c0_90] : memref<2048x32xbf16, #tpu.memory_space<vmem>>, vector<2048x32xbf16>
    %cst_91 = arith.constant dense<0.000000e+00> : vector<16x32xf32>
    %238 = tpu.matmul %236, %237, %cst_91 {dimension_numbers = #tpu.dot_dimension_numbers<[1], [0], [0], [1], [0, 0, 1, 1], [], []>} : vector<16x2048xbf16>, vector<2048x32xbf16>, vector<16x32xf32> -> vector<16x32xf32>
    %c0_92 = arith.constant 0 : index
    %c0_93 = arith.constant 0 : index
    %239 = vector.load %arg18[%c0_92, %c0_93] : memref<1x32xf32, #tpu.memory_space<vmem>>, vector<1x32xf32>
    %240 = vector.broadcast %239 : vector<1x32xf32> to vector<16x32xf32>
    %241 = arith.addf %238, %240 : vector<16x32xf32>
    %242 = arith.addf %227, %241 : vector<16x32xf32>
    %c0_94 = arith.constant 0 : index
    %c0_95 = arith.constant 0 : index
    %243 = vector.load %arg19[%c0_94, %c0_95] : memref<1x32xf32, #tpu.memory_space<vmem>>, vector<1x32xf32>
    %c0_96 = arith.constant 0 : index
    %c0_97 = arith.constant 0 : index
    %244 = vector.load %arg20[%c0_96, %c0_97] : memref<1x32xf32, #tpu.memory_space<vmem>>, vector<1x32xf32>
    %cst_98 = arith.constant dense<0.000000e+00> : vector<16xf32>
    %245 = vector.multi_reduction <add>, %242, %cst_98 [1] : vector<16x32xf32> to vector<16xf32>
    %246 = vector.shape_cast %245 : vector<16xf32> to vector<16x1xf32>
    %cst_99 = arith.constant 3.200000e+01 : f32
    %247 = vector.broadcast %cst_99 : f32 to vector<16x1xf32>
    %248 = arith.divf %246, %247 : vector<16x1xf32>
    %249 = vector.broadcast %248 : vector<16x1xf32> to vector<16x32xf32>
    %250 = arith.subf %242, %249 : vector<16x32xf32>
    %251 = arith.mulf %250, %250 : vector<16x32xf32>
    %cst_100 = arith.constant dense<0.000000e+00> : vector<16xf32>
    %252 = vector.multi_reduction <add>, %251, %cst_100 [1] : vector<16x32xf32> to vector<16xf32>
    %253 = vector.shape_cast %252 : vector<16xf32> to vector<16x1xf32>
    %cst_101 = arith.constant 3.200000e+01 : f32
    %254 = vector.broadcast %cst_101 : f32 to vector<16x1xf32>
    %255 = arith.divf %253, %254 : vector<16x1xf32>
    %cst_102 = arith.constant 9.99999974E-6 : f32
    %256 = vector.broadcast %cst_102 : f32 to vector<16x1xf32>
    %257 = arith.addf %255, %256 : vector<16x1xf32>
    %258 = math.rsqrt %257 : vector<16x1xf32>
    %259 = vector.broadcast %258 : vector<16x1xf32> to vector<16x32xf32>
    %260 = arith.mulf %250, %259 : vector<16x32xf32>
    %261 = vector.broadcast %243 : vector<1x32xf32> to vector<16x32xf32>
    %262 = arith.mulf %260, %261 : vector<16x32xf32>
    %263 = vector.broadcast %244 : vector<1x32xf32> to vector<16x32xf32>
    %264 = arith.addf %262, %263 : vector<16x32xf32>
    %265 = vector.shape_cast %264 : vector<16x32xf32> to vector<2x8x32xf32>
    %c0_103 = arith.constant 0 : index
    %c0_104 = arith.constant 0 : index
    %c0_105 = arith.constant 0 : index
    %266 = vector.load %arg21[%c0_103, %c0_104, %c0_105] : memref<2x8x32xf32, #tpu.memory_space<vmem>>, vector<2x8x32xf32>
    tpu.vector_store %arg21[%c0_103, %c0_104, %c0_105], %265 {strides = array<i32>} : memref<2x8x32xf32, #tpu.memory_space<vmem>>, vector<2x8x32xf32>,
    return
  }
  func.func @transform_0(%arg0: i32) -> (i32, i32, i32) {
    %c0_i32 = arith.constant 0 : i32
    %c0_i32_0 = arith.constant 0 : i32
    %c0_i32_1 = arith.constant 0 : i32
    %c0_i32_2 = arith.constant 0 : i32
    return %c0_i32, %c0_i32_0, %c0_i32_1 : i32, i32, i32
  }
  func.func @transform_1(%arg0: i32) -> (i32, i32, i32) {
    %c0_i32 = arith.constant 0 : i32
    %c0_i32_0 = arith.constant 0 : i32
    %c0_i32_1 = arith.constant 0 : i32
    %c0_i32_2 = arith.constant 0 : i32
    return %c0_i32, %c0_i32_0, %c0_i32_1 : i32, i32, i32
  }
  func.func @transform_2(%arg0: i32) -> (i32, i32) {
    %c0_i32 = arith.constant 0 : i32
    %c0_i32_0 = arith.constant 0 : i32
    %c0_i32_1 = arith.constant 0 : i32
    return %c0_i32, %c0_i32_0 : i32, i32
  }
  func.func @transform_3(%arg0: i32) -> (i32, i32) {
    %c0_i32 = arith.constant 0 : i32
    %c0_i32_0 = arith.constant 0 : i32
    %c0_i32_1 = arith.constant 0 : i32
    return %c0_i32, %c0_i32_0 : i32, i32
  }
  func.func @transform_4(%arg0: i32) -> (i32, i32) {
    %c0_i32 = arith.constant 0 : i32
    %c0_i32_0 = arith.constant 0 : i32
    %c0_i32_1 = arith.constant 0 : i32
    return %c0_i32, %c0_i32_0 : i32, i32
  }
  func.func @transform_5(%arg0: i32) -> (i32, i32) {
    %c0_i32 = arith.constant 0 : i32
    %c0_i32_0 = arith.constant 0 : i32
    %c0_i32_1 = arith.constant 0 : i32
    return %c0_i32, %c0_i32_0 : i32, i32
  }
  func.func @transform_6(%arg0: i32) -> (i32, i32) {
    %c0_i32 = arith.constant 0 : i32
    %c0_i32_0 = arith.constant 0 : i32
    %c0_i32_1 = arith.constant 0 : i32
    return %c0_i32, %c0_i32_0 : i32, i32
  }
  func.func @transform_7(%arg0: i32) -> (i32, i32) {
    %c0_i32 = arith.constant 0 : i32
    %c0_i32_0 = arith.constant 0 : i32
    %c0_i32_1 = arith.constant 0 : i32
    return %c0_i32, %c0_i32_0 : i32, i32
  }
  func.func @transform_8(%arg0: i32) -> (i32, i32) {
    %c0_i32 = arith.constant 0 : i32
    %c0_i32_0 = arith.constant 0 : i32
    %c0_i32_1 = arith.constant 0 : i32
    return %c0_i32, %c0_i32_0 : i32, i32
  }
  func.func @transform_9(%arg0: i32) -> (i32, i32) {
    %c0_i32 = arith.constant 0 : i32
    %c0_i32_0 = arith.constant 0 : i32
    %c0_i32_1 = arith.constant 0 : i32
    return %c0_i32, %c0_i32_0 : i32, i32
  }
  func.func @transform_10(%arg0: i32) -> (i32, i32) {
    %c0_i32 = arith.constant 0 : i32
    %c0_i32_0 = arith.constant 0 : i32
    %c0_i32_1 = arith.constant 0 : i32
    return %c0_i32, %c0_i32_0 : i32, i32
  }
  func.func @transform_11(%arg0: i32) -> (i32, i32) {
    %c0_i32 = arith.constant 0 : i32
    %c0_i32_0 = arith.constant 0 : i32
    %c0_i32_1 = arith.constant 0 : i32
    return %c0_i32, %c0_i32_0 : i32, i32
  }
  func.func @transform_12(%arg0: i32) -> (i32, i32) {
    %c0_i32 = arith.constant 0 : i32
    %c0_i32_0 = arith.constant 0 : i32
    %c0_i32_1 = arith.constant 0 : i32
    return %c0_i32, %c0_i32_0 : i32, i32
  }
  func.func @transform_13(%arg0: i32) -> (i32, i32) {
    %c0_i32 = arith.constant 0 : i32
    %c0_i32_0 = arith.constant 0 : i32
    %c0_i32_1 = arith.constant 0 : i32
    return %c0_i32, %c0_i32_0 : i32, i32
  }
  func.func @transform_14(%arg0: i32) -> (i32, i32) {
    %c0_i32 = arith.constant 0 : i32
    %c0_i32_0 = arith.constant 0 : i32
    %c0_i32_1 = arith.constant 0 : i32
    return %c0_i32, %c0_i32_0 : i32, i32
  }
  func.func @transform_15(%arg0: i32) -> (i32, i32) {
    %c0_i32 = arith.constant 0 : i32
    %c0_i32_0 = arith.constant 0 : i32
    %c0_i32_1 = arith.constant 0 : i32
    return %c0_i32, %c0_i32_0 : i32, i32
  }
  func.func @transform_16(%arg0: i32) -> (i32, i32) {
    %c0_i32 = arith.constant 0 : i32
    %c0_i32_0 = arith.constant 0 : i32
    %c0_i32_1 = arith.constant 0 : i32
    return %c0_i32, %c0_i32_0 : i32, i32
  }
  func.func @transform_17(%arg0: i32) -> (i32, i32) {
    %c0_i32 = arith.constant 0 : i32
    %c0_i32_0 = arith.constant 0 : i32
    %c0_i32_1 = arith.constant 0 : i32
    return %c0_i32, %c0_i32_0 : i32, i32
  }
  func.func @transform_18(%arg0: i32) -> (i32, i32) {
    %c0_i32 = arith.constant 0 : i32
    %c0_i32_0 = arith.constant 0 : i32
    %c0_i32_1 = arith.constant 0 : i32
    return %c0_i32, %c0_i32_0 : i32, i32
  }
  func.func @transform_19(%arg0: i32) -> (i32, i32) {
    %c0_i32 = arith.constant 0 : i32
    %c0_i32_0 = arith.constant 0 : i32
    %c0_i32_1 = arith.constant 0 : i32
    return %c0_i32, %c0_i32_0 : i32, i32
  }
  func.func @transform_20(%arg0: i32) -> (i32, i32, i32) {
    %c0_i32 = arith.constant 0 : i32
    %c0_i32_0 = arith.constant 0 : i32
    %c0_i32_1 = arith.constant 0 : i32
    %c0_i32_2 = arith.constant 0 : i32
    return %c0_i32, %c0_i32_0, %c0_i32_1 : i32, i32, i32
  }
}

module attributes {stable_mosaic.version = 11 : i64} {
  func.func @_head_kernel(%arg0: i32, %arg1: memref<16x32xf32, #tpu.memory_space<vmem>>, %arg2: memref<1x32xf32, #tpu.memory_space<vmem>>, %arg3: memref<1x32xf32, #tpu.memory_space<vmem>>, %arg4: memref<32x128xf32, #tpu.memory_space<vmem>>, %arg5: memref<1x128xf32, #tpu.memory_space<vmem>>, %arg6: memref<16x128xf32, #tpu.memory_space<vmem>>) attributes {dimension_semantics = [#tpu.dimension_semantics<arbitrary>], iteration_bounds = array<i64: 1>, scalar_prefetch = 0 : i64, scratch_operands = 0 : i64, tpu.core_type = #tpu.core_type<tc>, window_params = [{pipeline_mode = #tpu.pipeline_mode<synchronous>, transform_indices = @transform_0, window_bounds = array<i64: 16, 32>}, {pipeline_mode = #tpu.pipeline_mode<synchronous>, transform_indices = @transform_1, window_bounds = array<i64: 1, 32>}, {pipeline_mode = #tpu.pipeline_mode<synchronous>, transform_indices = @transform_2, window_bounds = array<i64: 1, 32>}, {pipeline_mode = #tpu.pipeline_mode<synchronous>, transform_indices = @transform_3, window_bounds = array<i64: 32, 128>}, {pipeline_mode = #tpu.pipeline_mode<synchronous>, transform_indices = @transform_4, window_bounds = array<i64: 1, 128>}, {pipeline_mode = #tpu.pipeline_mode<synchronous>, transform_indices = @transform_5, window_bounds = array<i64: 16, 128>}]} {
    %c0 = arith.constant 0 : index
    %c0_0 = arith.constant 0 : index
    %0 = vector.load %arg1[%c0, %c0_0] : memref<16x32xf32, #tpu.memory_space<vmem>>, vector<16x32xf32>
    %c0_1 = arith.constant 0 : index
    %c0_2 = arith.constant 0 : index
    %1 = vector.load %arg2[%c0_1, %c0_2] : memref<1x32xf32, #tpu.memory_space<vmem>>, vector<1x32xf32>
    %c0_3 = arith.constant 0 : index
    %c0_4 = arith.constant 0 : index
    %2 = vector.load %arg3[%c0_3, %c0_4] : memref<1x32xf32, #tpu.memory_space<vmem>>, vector<1x32xf32>
    %cst = arith.constant dense<0.000000e+00> : vector<16xf32>
    %3 = vector.multi_reduction <add>, %0, %cst [1] : vector<16x32xf32> to vector<16xf32>
    %4 = vector.shape_cast %3 : vector<16xf32> to vector<16x1xf32>
    %cst_5 = arith.constant 3.200000e+01 : f32
    %5 = vector.broadcast %cst_5 : f32 to vector<16x1xf32>
    %6 = arith.divf %4, %5 : vector<16x1xf32>
    %7 = vector.broadcast %6 : vector<16x1xf32> to vector<16x32xf32>
    %8 = arith.subf %0, %7 : vector<16x32xf32>
    %9 = arith.mulf %8, %8 : vector<16x32xf32>
    %cst_6 = arith.constant dense<0.000000e+00> : vector<16xf32>
    %10 = vector.multi_reduction <add>, %9, %cst_6 [1] : vector<16x32xf32> to vector<16xf32>
    %11 = vector.shape_cast %10 : vector<16xf32> to vector<16x1xf32>
    %cst_7 = arith.constant 3.200000e+01 : f32
    %12 = vector.broadcast %cst_7 : f32 to vector<16x1xf32>
    %13 = arith.divf %11, %12 : vector<16x1xf32>
    %cst_8 = arith.constant 9.99999974E-6 : f32
    %14 = vector.broadcast %cst_8 : f32 to vector<16x1xf32>
    %15 = arith.addf %13, %14 : vector<16x1xf32>
    %16 = math.rsqrt %15 : vector<16x1xf32>
    %17 = vector.broadcast %16 : vector<16x1xf32> to vector<16x32xf32>
    %18 = arith.mulf %8, %17 : vector<16x32xf32>
    %19 = vector.broadcast %1 : vector<1x32xf32> to vector<16x32xf32>
    %20 = arith.mulf %18, %19 : vector<16x32xf32>
    %21 = vector.broadcast %2 : vector<1x32xf32> to vector<16x32xf32>
    %22 = arith.addf %20, %21 : vector<16x32xf32>
    %c0_9 = arith.constant 0 : index
    %c0_10 = arith.constant 0 : index
    %23 = vector.load %arg4[%c0_9, %c0_10] : memref<32x128xf32, #tpu.memory_space<vmem>>, vector<32x128xf32>
    %cst_11 = arith.constant dense<0.000000e+00> : vector<16x128xf32>
    %24 = tpu.matmul %22, %23, %cst_11 {dimension_numbers = #tpu.dot_dimension_numbers<[1], [0], [0], [1], [0, 0, 1, 1], [], []>} : vector<16x32xf32>, vector<32x128xf32>, vector<16x128xf32> -> vector<16x128xf32>
    %c0_12 = arith.constant 0 : index
    %c0_13 = arith.constant 0 : index
    %25 = vector.load %arg5[%c0_12, %c0_13] : memref<1x128xf32, #tpu.memory_space<vmem>>, vector<1x128xf32>
    %26 = vector.broadcast %25 : vector<1x128xf32> to vector<16x128xf32>
    %27 = arith.addf %24, %26 : vector<16x128xf32>
    %c0_14 = arith.constant 0 : index
    %c0_15 = arith.constant 0 : index
    %28 = vector.load %arg6[%c0_14, %c0_15] : memref<16x128xf32, #tpu.memory_space<vmem>>, vector<16x128xf32>
    tpu.vector_store %arg6[%c0_14, %c0_15], %27 {strides = array<i32>} : memref<16x128xf32, #tpu.memory_space<vmem>>, vector<16x128xf32>,
    return
  }
  func.func @transform_0(%arg0: i32) -> (i32, i32) {
    %c0_i32 = arith.constant 0 : i32
    %c0_i32_0 = arith.constant 0 : i32
    %c0_i32_1 = arith.constant 0 : i32
    return %c0_i32, %c0_i32_0 : i32, i32
  }
  func.func @transform_1(%arg0: i32) -> (i32, i32) {
    %c0_i32 = arith.constant 0 : i32
    %c0_i32_0 = arith.constant 0 : i32
    %c0_i32_1 = arith.constant 0 : i32
    return %c0_i32, %c0_i32_0 : i32, i32
  }
  func.func @transform_2(%arg0: i32) -> (i32, i32) {
    %c0_i32 = arith.constant 0 : i32
    %c0_i32_0 = arith.constant 0 : i32
    %c0_i32_1 = arith.constant 0 : i32
    return %c0_i32, %c0_i32_0 : i32, i32
  }
  func.func @transform_3(%arg0: i32) -> (i32, i32) {
    %c0_i32 = arith.constant 0 : i32
    %c0_i32_0 = arith.constant 0 : i32
    %c0_i32_1 = arith.constant 0 : i32
    return %c0_i32, %c0_i32_0 : i32, i32
  }
  func.func @transform_4(%arg0: i32) -> (i32, i32) {
    %c0_i32 = arith.constant 0 : i32
    %c0_i32_0 = arith.constant 0 : i32
    %c0_i32_1 = arith.constant 0 : i32
    return %c0_i32, %c0_i32_0 : i32, i32
  }
  func.func @transform_5(%arg0: i32) -> (i32, i32) {
    %c0_i32 = arith.constant 0 : i32
    %c0_i32_0 = arith.constant 0 : i32
    %c0_i32_1 = arith.constant 0 : i32
    return %c0_i32, %c0_i32_0 : i32, i32
  }
}

</mosaic_0001>

<bundles_post_ra>
// kernel: simple_transformer_forward.12
= control target key start
LH: loop header
LB: loop body
LE: loop exit
PB: predicated region body
PF: predicated region fallthrough
CT: control target
= control target key end

     0   :  { %vm18_vm0 = vcmask 261120   ;;  %s118_s0 = inlined_call_operand.vmem [shape: f32[16,32], index: 0, kind: input, shape index: {}]   ;;  %s119_s1 = inlined_call_operand.vmem [shape: f32[1,32], index: 1, kind: input, shape index: {}]   ;;  %s120_s2 = inlined_call_operand.vmem [shape: f32[1,32], index: 2, kind: input, shape index: {}]   ;;  %s121_s3 = inlined_call_operand.vmem [shape: f32[16,32], index: 3, kind: output, shape index: {}]  }
   0x1   :  { %v14_v0 = vld [vmem:[%s118_s0] sm:$0xff]  ;;  %v15_v1 = vld [vmem:[%s118_s0 + $0x8] sm:$0xff] }
   0x2   :  { %v19_v2 = vsel %vm18_vm0, %v14_v0, 0.0  ;;  %v22_v3 = vsel %vm18_vm0, %v15_v1, 0.0  ;;  %v68_v21 = vld [vmem:[%s119_s1] ss:$0 sm:$0xff] }
   0x3   :  { %20 = vadd.xlane.f32.xlu0 %v19_v2  ;;  %v69_v23 = vld [vmem:[%s120_s2] ss:$0 sm:$0xff] }
   0x7   :  { %23 = vadd.xlane.f32.xlu0 %v22_v3 }
  0x8c   :  { %v21_v4 = vpop.xlane.xlu0 %20 }
  0x8d   :  { %v26_v5 = vmul.f32 0.03125, %v21_v4 }
  0x8f   :  { %v28_v6 = vsub.f32 %v14_v0, %v26_v5 }
  0x90   :  { %v24_v7 = vpop.xlane.xlu0 %23 }
  0x91   :  { %v27_v8 = vmul.f32 0.03125, %v24_v7  ;;  %v30_v9 = vmul.f32 %v28_v6, %v28_v6 }
  0x93   :  { %v29_v10 = vsub.f32 %v15_v1, %v27_v8  ;;  %v32_v11 = vsel %vm18_vm0, %v30_v9, 0.0 }
  0x94   :  { %33 = vadd.xlane.f32.xlu1 %v32_v11 }
  0x95   :  { %v31_v12 = vmul.f32 %v29_v10, %v29_v10 }
  0x97   :  { %v35_v13 = vsel %vm18_vm0, %v31_v12, 0.0 }
  0x98   :  { %36 = vadd.xlane.f32.xlu1 %v35_v13 }
 0x11d   :  { %v34_v14 = vpop.xlane.xlu1 %33 }
 0x11e   :  { %v38_v15 = vmul.f32 0.03125, %v34_v14 }
 0x120   :  { %v40_v16 = vadd.f32 1e-05, %v38_v15 }
 0x121   :  { %v37_v17 = vpop.xlane.xlu1 %36 }
 0x122   :  { %70 = vrsqrt.f32 %v40_v16  ;;  %v39_v18 = vmul.f32 0.03125, %v37_v17 }
 0x124   :  { %v41_v19 = vadd.f32 1e-05, %v39_v18 }
 0x126   :  { %72 = vrsqrt.f32 %v41_v19 }
 0x12f   :  { %v71_v20 = vpop.eup %70 }
 0x130   :  { %v44_v22 = vmul.f32 %v71_v20, %v28_v6 }
 0x132   :  { %v52_v24 = vmul.f32 %v68_v21, %v44_v22 }
 0x133   :  { %v73_v25 = vpop.eup %72 }
 0x134   :  { %v60_v26 = vadd.f32 %v69_v23, %v52_v24  ;;  %v45_v27 = vmul.f32 %v73_v25, %v29_v10 }
 0x136   :  { %62 = vst.msk [vmem:[%s121_s3] sm:$0xff] %vm18_vm0, %v60_v26  ;;  %v53_v28 = vmul.f32 %v68_v21, %v45_v27 }
 0x138   :  { %v61_v29 = vadd.f32 %v69_v23, %v53_v28 }
 0x13a   :  { %63 = vst.msk [vmem:[%s121_s3 + $0x8] sm:$0xff] %vm18_vm0, %v61_v29 }

// kernel: simple_transformer_forward.19
= control target key start
LH: loop header
LB: loop body
LE: loop exit
PB: predicated region body
PF: predicated region fallthrough
CT: control target
= control target key end

     0   :  { %vm24_vm0 = vcmask 261120   ;;  %s261_s0 = inlined_call_operand.vmem [shape: f32[16,32], index: 0, kind: input, shape index: {}]   ;;  %s262_s3 = inlined_call_operand.vmem [shape: f32[32,128], index: 3, kind: input, shape index: {}]   ;;  %s263_s1 = inlined_call_operand.vmem [shape: f32[1,32], index: 1, kind: input, shape index: {}]   ;;  %s264_s2 = inlined_call_operand.vmem [shape: f32[1,32], index: 2, kind: input, shape index: {}]   ;;  %s265_s4 = inlined_call_operand.vmem [shape: f32[1,128], index: 4, kind: input, shape index: {}]   ;;  %s266_s5 = inlined_call_operand.vmem [shape: f32[16,128], index: 5, kind: output, shape index: {}]  }
   0x1   :  { %v20_v0 = vld [vmem:[%s261_s0] sm:$0xff]  ;;  %v21_v1 = vld [vmem:[%s261_s0 + $0x8] sm:$0xff]  ;;  %v71_v14 = vld [vmem:[%s262_s3 + $0x18] sm:$0xff] }
   0x2   :  { %v25_v2 = vsel %vm24_vm0, %v20_v0, 0.0  ;;  %v28_v3 = vsel %vm24_vm0, %v21_v1, 0.0  ;;  %v70_v15 = vld [vmem:[%s262_s3 + $0x10] sm:$0xff]  ;;  %177 = vmatprep.subr.mxu0 %v71_v14  ;;  %v69_v16 = vld [vmem:[%s262_s3 + $0x8] sm:$0xff]  ;;  %v68_v17 = vld [vmem:[%s262_s3] sm:$0xff] }
   0x3   :  { %26 = vadd.xlane.f32.xlu0 %v25_v2  ;;  %178 = vmatpush3.msra.mxu0 %v71_v14  ;;  %v166_v25 = vld [vmem:[%s263_s1] ss:$0 sm:$0xff] }
   0x4   :  { %179 = vmatprep.subr.mxu0 %v70_v15  ;;  %v167_v27 = vld [vmem:[%s264_s2] ss:$0 sm:$0xff] }
   0x5   :  { %180 = vmatpush3.msra.mxu0 %v70_v15  ;;  %v168_v34 = vld [vmem:[%s265_s4] ss:$0 sm:$0xff] }
   0x6   :  { %181 = vmatprep.subr.mxu0 %v69_v16 }
   0x7   :  { %29 = vadd.xlane.f32.xlu0 %v28_v3  ;;  %182 = vmatpush3.msra.mxu0 %v69_v16 }
   0x8   :  { %183 = vmatprep.subr.mxu0 %v68_v17 }
   0x9   :  { %184 = vmatpush3.msra.mxu0 %v68_v17 }
  0x8c   :  { %v27_v4 = vpop.xlane.xlu0 %26 }
  0x8d   :  { %v32_v5 = vmul.f32 0.03125, %v27_v4 }
  0x8f   :  { %v34_v6 = vsub.f32 %v20_v0, %v32_v5 }
  0x90   :  { %v30_v7 = vpop.xlane.xlu0 %29 }
  0x91   :  { %v33_v8 = vmul.f32 0.03125, %v30_v7  ;;  %v36_v9 = vmul.f32 %v34_v6, %v34_v6 }
  0x93   :  { %v35_v10 = vsub.f32 %v21_v1, %v33_v8  ;;  %v38_v11 = vsel %vm24_vm0, %v36_v9, 0.0 }
  0x94   :  { %39 = vadd.xlane.f32.xlu1 %v38_v11 }
  0x95   :  { %v37_v12 = vmul.f32 %v35_v10, %v35_v10 }
  0x97   :  { %v41_v13 = vsel %vm24_vm0, %v37_v12, 0.0 }
  0x98   :  { %42 = vadd.xlane.f32.xlu1 %v41_v13 }
 0x11d   :  { %v40_v18 = vpop.xlane.xlu1 %39 }
 0x11e   :  { %v44_v19 = vmul.f32 0.03125, %v40_v18 }
 0x120   :  { %v46_v20 = vadd.f32 1e-05, %v44_v19 }
 0x121   :  { %v43_v21 = vpop.xlane.xlu1 %42 }
 0x122   :  { %188 = vrsqrt.f32 %v46_v20  ;;  %v45_v22 = vmul.f32 0.03125, %v43_v21 }
 0x124   :  { %v47_v23 = vadd.f32 1e-05, %v45_v22 }
 0x126   :  { %190 = vrsqrt.f32 %v47_v23 }
 0x12f   :  { %v189_v24 = vpop.eup %188 }
 0x130   :  { %v50_v26 = vmul.f32 %v189_v24, %v34_v6 }
 0x132   :  { %v58_v28 = vmul.f32 %v166_v25, %v50_v26 }
 0x133   :  { %v191_v29 = vpop.eup %190 }
 0x134   :  { %v51_v30 = vmul.f32 %v191_v29, %v35_v10  ;;  %v66_v31 = vadd.f32 %v167_v27, %v58_v28 }
 0x136   :  { %v59_v32 = vmul.f32 %v166_v25, %v51_v30  ;;  %185 = vmatprep.mubr.msk.f32.mxu0 %vm24_vm0, %v66_v31 }
 0x138   :  { %v67_v33 = vadd.f32 %v167_v27, %v59_v32 }
 0x13a   :  { %186 = vmatmul.mubr.msk.f32.vlgmr.msra.gmra.mxu0 %vm24_vm0, %v67_v33 }
 0x1fa   :  { %v187_v35 = vpop.f32.mrf.mxu0 }
 0x1fb   :  { %v157_v36 = vadd.f32 %v187_v35, %v168_v34 }
 0x1fc   :  { %v151_v37 = vpop.f32.mrf.mxu0 }
 0x1fd   :  { %161 = vst [vmem:[%s266_s5 + $0x8] sm:$0xff] %v157_v36  ;;  %v152_v38 = vadd.f32 %v168_v34, %v151_v37 }
 0x1ff   :  { %160 = vst [vmem:[%s266_s5] sm:$0xff] %v152_v38 }

// kernel: simple_transformer_forward.10
= control target key start
LH: loop header
LB: loop body
LE: loop exit
PB: predicated region body
PF: predicated region fallthrough
CT: control target
= control target key end

     0   :  { %vm58_vm0 = vcmask 261120   ;;  %v4431_v6 = vmov 0.0   ;;  %vm4432_vm1 = vmmov 0   ;;  %s4433_s20 = smov 96   ;;  %vm143_vm2 = vcmask 64512   ;;  %s4435_s21 = smov 88   ;;  %s5345_s1 = inlined_call_operand.vmem [shape: f32[32,96], index: 1, kind: input, shape index: {}]   ;;  %s5346_s0 = inlined_call_operand.vmem [shape: f32[2,8,32], index: 0, kind: input, shape index: {}]   ;;  %s5347_s2 = inlined_call_operand.vmem [shape: f32[1,96], index: 2, kind: input, shape index: {}]   ;;  %s5348_s3 = inlined_call_operand.vmem [shape: f32[32,32], index: 3, kind: input, shape index: {}]   ;;  %s5349_s4 = inlined_call_operand.vmem [shape: f32[1,32], index: 4, kind: input, shape index: {}]   ;;  %s5350_s7 = inlined_call_operand.vmem [shape: bf16[32,2048], index: 7, kind: input, shape index: {}]   ;;  %s5351_s9 = inlined_call_operand.vmem [shape: bf16[2048,32], index: 9, kind: input, shape index: {}]   ;;  %s5352_s5 = inlined_call_operand.vmem [shape: f32[1,32], index: 5, kind: input, shape index: {}]   ;;  %s5353_s6 = inlined_call_operand.vmem [shape: f32[1,32], index: 6, kind: input, shape index: {}]   ;;  %s5354_s8 = inlined_call_operand.vmem [shape: f32[1,2048], index: 8, kind: input, shape index: {}]   ;;  %s5355_s10 = inlined_call_operand.vmem [shape: f32[1,32], index: 10, kind: input, shape index: {}]   ;;  %s5356_s11 = inlined_call_operand.vmem [shape: f32[1,32], index: 11, kind: input, shape index: {}]   ;;  %s5357_s12 = inlined_call_operand.vmem [shape: f32[1,32], index: 12, kind: input, shape index: {}]   ;;  %s5358_s13 = inlined_call_operand.vmem [shape: f32[2,8,32], index: 13, kind: output, shape index: {}]  }
   0x1   :  { %v50_v0 = vld [vmem:[%s5345_s1 + $0x18] sm:$0xff]  ;;  %v49_v1 = vld [vmem:[%s5345_s1 + $0x10] sm:$0xff]  ;;  %v4527_v2 = vld [vmem:[%s5346_s0] sm:$0xff]  ;;  %4155 = vmatprep.subr.mxu1 %v4431_v6  ;;  %4157 = vmatprep.mubr.msk.f32.mxu1 %vm4432_vm1, %v4431_v6  ;;  %s4436_s22 = smov 120   ;;  %s4437_s23 = smov 56   ;;  %vm1496_vm3 = vcmask 195584  }
   0x2   :  { %4144 = vmatprep.subr.mxu0 %v50_v0  ;;  %v48_v3 = vld [vmem:[%s5345_s1 + $0x8] sm:$0xff]  ;;  %4152 = vmatprep.mubr.msk.f32.mxu0 %vm58_vm0, %v4527_v2  ;;  %v47_v4 = vld [vmem:[%s5345_s1] sm:$0xff]  ;;  %s4438_s24 = smov 112   ;;  %s4439_s25 = smov 80   ;;  %vm1493_vm4 = vcmask 130048  }
   0x3   :  { %4145 = vmatpush3.msra.mxu0 %v50_v0  ;;  %v4540_v5 = vld [vmem:[%s5346_s0 + $0x8] sm:$0xff]  ;;  %v3721_v8 = vld [vmem:[%s5347_s2] ss:$0 sm:$0xff]  ;;  %s4434_s2 = smov 64   ;;  %s4440_s26 = smov 48  }
   0x4   :  { %4146 = vmatprep.subr.mxu0 %v49_v1  ;;  %s4441_s27 = smov 72   ;;  %s4442_s28 = smov 104  }
   0x5   :  { %4147 = vmatpush3.msra.mxu0 %v49_v1  ;;  %s4443_s29 = smov 40   ;;  %s4444_s30 = smov 8  }
   0x6   :  { %4148 = vmatprep.subr.mxu0 %v48_v3  ;;  %s4445_s14 = smov 16  }
   0x7   :  { %4149 = vmatpush3.msra.mxu0 %v48_v3 }
   0x8   :  { %4150 = vmatprep.subr.mxu0 %v47_v4 }
   0x9   :  { %4151 = vmatpush3.msra.mxu0 %v47_v4 }
   0xa   :  { %4153 = vmatmul.mubr.msk.f32.vlgmr.msra.gmra.mxu0 %vm58_vm0, %v4540_v5  ;;  %4175 = vmatprep.subr.mxu0 %v4431_v6 }
   0xb   :  { %4177 = vmatprep.mubr.msk.f32.mxu0 %vm4432_vm1, %v4431_v6 }
  0xca   :  { %v4154_v7 = vpop.f32.mrf.mxu0 }
  0xcb   :  { %v4556_v11 = vadd.f32 %v4154_v7, %v3721_v8 }
  0xcc   :  { %v131_v9 = vpop.f32.mrf.mxu0 }
  0xcd   :  { %v4553_v10 = vadd.f32 %v3721_v8, %v131_v9 }
  0xcf   :  { %141 = vrot.lane.b32.xlu0 %v4553_v10, %s4433_s20 }
  0xd3   :  { %219 = vrot.lane.b32.xlu0 %v4556_v11, %s4433_s20 }
 0x141   :  { %v142_v12 = vpop.permute.xlu0 %141 }
 0x142   :  { %4156 = vmatpush3.xpose.msk.msra.mxu1 %vm143_vm2, %v142_v12 }
 0x143   :  { %4160 = vmatprep.subr.mxu1 %v4431_v6 }
 0x145   :  { %4158 = vmatmul.mubr.msk.f32.vlgmr.msra.gmra.mxu1 %vm143_vm2, %v4553_v10  ;;  %v220_v13 = vpop.permute.xlu0 %219 }
 0x146   :  { %4161 = vmatpush3.xpose.msk.msra.mxu1 %vm143_vm2, %v220_v13  ;;  %4162 = vmatprep.mubr.msk.f32.mxu1 %vm4432_vm1, %v4431_v6 }
 0x147   :  { %4165 = vmatprep.subr.mxu1 %v4431_v6 }
 0x149   :  { %4163 = vmatmul.mubr.msk.f32.vlgmr.msra.gmra.mxu1 %vm143_vm2, %v4556_v11 }
 0x14a   :  { %4167 = vmatprep.mubr.msk.f32.mxu1 %vm4432_vm1, %v4431_v6 }
 0x205   :  { %v214_v14 = vpop.f32.mrf.mxu1 }
 0x206   :  { %v295_v15 = vmul.f32 0.35355338, %v214_v14 }
 0x207   :  { %v4159_v16 = vpop.f32.mrf.mxu1 }
 0x208   :  { %v297_v17 = vsel %vm143_vm2, %v295_v15, -inf }
 0x209   :  { %298 = vmax.xlane.f32.xlu1 %v297_v17  ;;  %v291_v18 = vpop.f32.mrf.mxu1 }
 0x20a   :  { %v296_v19 = vmul.f32 0.35355338, %v291_v18 }
 0x20b   :  { %v4164_v20 = vpop.f32.mrf.mxu1 }
 0x20c   :  { %v300_v21 = vsel %vm143_vm2, %v296_v19, -inf }
 0x20d   :  { %301 = vmax.xlane.f32.xlu1 %v300_v21 }
 0x21e   :  { %319 = vrot.lane.b32.xlu1 %v4553_v10, %s4434_s2 }
 0x222   :  { %395 = vrot.lane.b32.xlu1 %v4556_v11, %s4434_s2  ;;  %s4446_s2 = smov 24  }
 0x226   :  { %473 = vrot.lane.b32.xlu1 %v4553_v10, %s4435_s21 }
 0x22a   :  { %551 = vrot.lane.b32.xlu1 %v4556_v11, %s4435_s21 }
 0x292   :  { %v299_v22 = vpop.xlane.xlu1 %298 }
 0x293   :  { %v303_v23 = vsub.f32 %v295_v15, %v299_v22 }
 0x295   :  { %v305_v24 = vmul.f32 1.442695, %v303_v23 }
 0x296   :  { %v302_v25 = vpop.xlane.xlu1 %301 }
 0x297   :  { %4391 = vpow2.f32 %v305_v24  ;;  %v304_v26 = vsub.f32 %v296_v19, %v302_v25 }
 0x299   :  { %v307_v27 = vmul.f32 1.442695, %v304_v26 }
 0x29a   :  { %v320_v28 = vpop.permute.xlu1 %319 }
 0x29b   :  { %4393 = vpow2.f32 %v307_v27  ;;  %4166 = vmatpush3.msra.mxu1 %v320_v28 }
 0x29c   :  { %4170 = vmatprep.subr.mxu1 %v4431_v6 }
 0x29e   :  { %v396_v29 = vpop.permute.xlu1 %395 }
 0x2a2   :  { %v474_v30 = vpop.permute.xlu1 %473 }
 0x2a3   :  { %4176 = vmatpush3.xpose.msk.msra.mxu0 %vm143_vm2, %v474_v30 }
 0x2a4   :  { %v4392_v31 = vpop.eup %4391  ;;  %4185 = vmatprep.subr.mxu0 %v4431_v6 }
 0x2a5   :  { %v309_v32 = vsel %vm143_vm2, %v4392_v31, 0.0 }
 0x2a6   :  { %310 = vadd.xlane.f32.xlu0 %v309_v32  ;;  %v552_v35 = vpop.permute.xlu1 %551 }
 0x2a8   :  { %v4394_v33 = vpop.eup %4393 }
 0x2a9   :  { %v312_v34 = vsel %vm143_vm2, %v4394_v33, 0.0 }
 0x2aa   :  { %313 = vadd.xlane.f32.xlu1 %v312_v34 }
 0x2bb   :  { %549 = vrot.lane.b32.xlu1 %v4556_v11, %s4436_s22 }
 0x2bc   :  { %471 = vrot.lane.b32.xlu0 %v4553_v10, %s4436_s22 }
 0x32f   :  { %v311_v36 = vpop.xlane.xlu0 %310 }
 0x330   :  { %4395 = vrcp.f32 %v311_v36 }
 0x333   :  { %v314_v37 = vpop.xlane.xlu1 %313  ;;  %v472_v38 = vpop.permute.xlu0 %471 }
 0x334   :  { %4397 = vrcp.f32 %v314_v37  ;;  %4178 = vmatmul.mubr.msk.f32.vlgmr.msra.gmra.mxu0 %vm143_vm2, %v472_v38 }
 0x335   :  { %4187 = vmatprep.mubr.msk.f32.mxu0 %vm4432_vm1, %v4431_v6 }
 0x337   :  { %v550_v43 = vpop.permute.xlu1 %549 }
 0x33d   :  { %v4396_v39 = vpop.eup %4395 }
 0x33e   :  { %v317_v40 = vmul.f32 %v4396_v39, %v4392_v31 }
 0x340   :  { %4168 = vmatmul.mubr.msk.f32.vlgmr.msra.gmra.mxu1 %vm143_vm2, %v317_v40 }
 0x341   :  { %v4398_v41 = vpop.eup %4397  ;;  %4171 = vmatpush3.msra.mxu1 %v396_v29  ;;  %4172 = vmatprep.mubr.msk.f32.mxu1 %vm4432_vm1, %v4431_v6 }
 0x342   :  { %4180 = vmatprep.subr.mxu1 %v4431_v6  ;;  %v318_v42 = vmul.f32 %v4398_v41, %v4394_v33 }
 0x344   :  { %4173 = vmatmul.mubr.msk.f32.vlgmr.msra.gmra.mxu1 %vm143_vm2, %v318_v42 }
 0x345   :  { %4181 = vmatpush3.xpose.msk.msra.mxu1 %vm143_vm2, %v552_v35  ;;  %4182 = vmatprep.mubr.msk.f32.mxu1 %vm4432_vm1, %v4431_v6 }
 0x346   :  { %4190 = vmatprep.subr.mxu1 %v4431_v6 }
 0x348   :  { %4183 = vmatmul.mubr.msk.f32.vlgmr.msra.gmra.mxu1 %vm143_vm2, %v550_v43 }
 0x349   :  { %4192 = vmatprep.mubr.msk.f32.mxu1 %vm4432_vm1, %v4431_v6 }
 0x3f4   :  { %v545_v44 = vpop.f32.mrf.mxu0 }
 0x3f5   :  { %v627_v45 = vmul.f32 0.35355338, %v545_v44 }
 0x3f6   :  { %v4179_v46 = vpop.f32.mrf.mxu0 }
 0x3f7   :  { %v629_v47 = vsel %vm143_vm2, %v627_v45, -inf }
 0x3f8   :  { %630 = vmax.xlane.f32.xlu1 %v629_v47 }
 0x400   :  { %v4600_v48 = vpop.f32.mrf.mxu1 }
 0x402   :  { %v4169_v49 = vpop.f32.mrf.mxu1 }
 0x404   :  { %v4602_v50 = vpop.f32.mrf.mxu1 }
 0x406   :  { %v4174_v51 = vpop.f32.mrf.mxu1 }
 0x408   :  { %v623_v52 = vpop.f32.mrf.mxu1 }
 0x409   :  { %v628_v53 = vmul.f32 0.35355338, %v623_v52 }
 0x40a   :  { %v4184_v54 = vpop.f32.mrf.mxu1 }
 0x40b   :  { %v632_v55 = vsel %vm143_vm2, %v628_v53, -inf }
 0x40c   :  { %633 = vmax.xlane.f32.xlu0 %v632_v55 }
 0x422   :  { %727 = vrot.lane.b32.xlu0 %v4556_v11, %s4437_s23 }
 0x426   :  { %803 = vrot.lane.b32.xlu0 %v4553_v10, %s4438_s24 }
 0x481   :  { %v631_v56 = vpop.xlane.xlu1 %630 }
 0x482   :  { %v635_v57 = vsub.f32 %v627_v45, %v631_v56 }
 0x484   :  { %v637_v58 = vmul.f32 1.442695, %v635_v57 }
 0x486   :  { %4399 = vpow2.f32 %v637_v58 }
 0x493   :  { %v4400_v59 = vpop.eup %4399 }
 0x494   :  { %v641_v60 = vsel %vm143_vm2, %v4400_v59, 0.0 }
 0x495   :  { %642 = vadd.xlane.f32.xlu1 %v641_v60  ;;  %v634_v61 = vpop.xlane.xlu0 %633 }
 0x496   :  { %v636_v63 = vsub.f32 %v628_v53, %v634_v61 }
 0x498   :  { %v639_v0 = vmul.f32 1.442695, %v636_v63 }
 0x499   :  { %v728_v62 = vpop.permute.xlu0 %727 }
 0x49a   :  { %4191 = vmatpush3.msra.mxu1 %v728_v62  ;;  %4401 = vpow2.f32 %v639_v0 }
 0x49b   :  { %4200 = vmatprep.subr.mxu1 %v4431_v6 }
 0x49d   :  { %v804_v13 = vpop.permute.xlu0 %803 }
 0x4a6   :  { %651 = vrot.lane.b32.xlu1 %v4553_v10, %s4437_s23 }
 0x4a7   :  { %v4402_v1 = vpop.eup %4401 }
 0x4a8   :  { %v644_v3 = vsel %vm143_vm2, %v4402_v1, 0.0 }
 0x4aa   :  { %805 = vrot.lane.b32.xlu1 %v4553_v10, %s4439_s25 }
 0x4ae   :  { %883 = vrot.lane.b32.xlu1 %v4556_v11, %s4439_s25 }
 0x4d2   :  { %645 = vadd.xlane.f32.xlu1 %v644_v3 }
 0x4e3   :  { %881 = vrot.lane.b32.xlu1 %v4556_v11, %s4438_s24 }
 0x51e   :  { %v643_v4 = vpop.xlane.xlu1 %642 }
 0x51f   :  { %4403 = vrcp.f32 %v643_v4 }
 0x522   :  { %v652_v7 = vpop.permute.xlu1 %651 }
 0x523   :  { %4186 = vmatpush3.msra.mxu0 %v652_v7 }
 0x524   :  { %4195 = vmatprep.subr.mxu0 %v4431_v6 }
 0x526   :  { %v806_v12 = vpop.permute.xlu1 %805 }
 0x52a   :  { %v884_v14 = vpop.permute.xlu1 %883 }
 0x52c   :  { %v4404_v8 = vpop.eup %4403 }
 0x52d   :  { %v649_v9 = vmul.f32 %v4404_v8, %v4400_v59 }
 0x52f   :  { %4188 = vmatmul.mubr.msk.f32.vlgmr.msra.gmra.mxu0 %vm143_vm2, %v649_v9 }
 0x530   :  { %4196 = vmatpush3.xpose.msk.msra.mxu0 %vm143_vm2, %v806_v12  ;;  %4197 = vmatprep.mubr.msk.f32.mxu0 %vm4432_vm1, %v4431_v6 }
 0x531   :  { %4205 = vmatprep.subr.mxu0 %v4431_v6 }
 0x533   :  { %4198 = vmatmul.mubr.msk.f32.vlgmr.msra.gmra.mxu0 %vm143_vm2, %v804_v13 }
 0x534   :  { %4207 = vmatprep.mubr.msk.f32.mxu0 %vm4432_vm1, %v4431_v6 }
 0x55b   :  { %v646_v15 = vpop.xlane.xlu1 %645 }
 0x55c   :  { %4405 = vrcp.f32 %v646_v15 }
 0x55f   :  { %v882_v18 = vpop.permute.xlu1 %881 }
 0x569   :  { %v4406_v16 = vpop.eup %4405 }
 0x56a   :  { %v650_v17 = vmul.f32 %v4406_v16, %v4402_v1 }
 0x56c   :  { %4193 = vmatmul.mubr.msk.f32.vlgmr.msra.gmra.mxu1 %vm143_vm2, %v650_v17 }
 0x56d   :  { %4201 = vmatpush3.xpose.msk.msra.mxu1 %vm143_vm2, %v884_v14  ;;  %4202 = vmatprep.mubr.msk.f32.mxu1 %vm4432_vm1, %v4431_v6 }
 0x56e   :  { %4210 = vmatprep.subr.mxu1 %v4431_v6 }
 0x570   :  { %4203 = vmatmul.mubr.msk.f32.vlgmr.msra.gmra.mxu1 %vm143_vm2, %v882_v18 }
 0x571   :  { %4212 = vmatprep.mubr.msk.f32.mxu1 %vm4432_vm1, %v4431_v6 }
 0x5ef   :  { %v4631_v19 = vpop.f32.mrf.mxu0 }
 0x5f1   :  { %v4189_v20 = vpop.f32.mrf.mxu0 }
 0x5f3   :  { %v877_v21 = vpop.f32.mrf.mxu0 }
 0x5f4   :  { %v959_v22 = vmul.f32 0.35355338, %v877_v21 }
 0x5f5   :  { %v4199_v23 = vpop.f32.mrf.mxu0 }
 0x5f6   :  { %v961_v24 = vsel %vm143_vm2, %v959_v22, -inf }
 0x5f7   :  { %962 = vmax.xlane.f32.xlu0 %v961_v24  ;;  %v1502_v24 = vld [vmem:[%s5348_s3 + $0x18] sm:$0xff] }
 0x62c   :  { %v4634_v25 = vpop.f32.mrf.mxu1 }
 0x62e   :  { %v4194_v26 = vpop.f32.mrf.mxu1 }
 0x62f   :  { %v1499_v26 = vld [vmem:[%s5348_s3] sm:$0xff] }
 0x630   :  { %v955_v27 = vpop.f32.mrf.mxu1 }
 0x631   :  { %v960_v28 = vmul.f32 0.35355338, %v955_v27 }
 0x632   :  { %v4204_v29 = vpop.f32.mrf.mxu1 }
 0x633   :  { %v964_v30 = vsel %vm143_vm2, %v960_v28, -inf }
 0x634   :  { %965 = vmax.xlane.f32.xlu1 %v964_v30 }
 0x645   :  { %983 = vrot.lane.b32.xlu1 %v4553_v10, %s4440_s26 }
 0x649   :  { %1137 = vrot.lane.b32.xlu1 %v4553_v10, %s4441_s27 }
 0x64d   :  { %1215 = vrot.lane.b32.xlu1 %v4556_v11, %s4441_s27 }
 0x651   :  { %1213 = vrot.lane.b32.xlu1 %v4556_v11, %s4442_s28 }
 0x680   :  { %v963_v31 = vpop.xlane.xlu0 %962 }
 0x681   :  { %v967_v32 = vsub.f32 %v959_v22, %v963_v31 }
 0x683   :  { %v969_v33 = vmul.f32 1.442695, %v967_v32 }
 0x685   :  { %4407 = vpow2.f32 %v969_v33 }
 0x692   :  { %v4408_v34 = vpop.eup %4407 }
 0x693   :  { %v973_v35 = vsel %vm143_vm2, %v4408_v34, 0.0 }
 0x694   :  { %974 = vadd.xlane.f32.xlu0 %v973_v35 }
 0x6aa   :  { %1059 = vrot.lane.b32.xlu0 %v4556_v11, %s4440_s26 }
 0x6bd   :  { %v966_v36 = vpop.xlane.xlu1 %965 }
 0x6be   :  { %v968_v37 = vsub.f32 %v960_v28, %v966_v36 }
 0x6c0   :  { %v971_v38 = vmul.f32 1.442695, %v968_v37 }
 0x6c1   :  { %v984_v39 = vpop.permute.xlu1 %983 }
 0x6c2   :  { %4409 = vpow2.f32 %v971_v38  ;;  %4206 = vmatpush3.msra.mxu0 %v984_v39 }
 0x6c3   :  { %4215 = vmatprep.subr.mxu0 %v4431_v6 }
 0x6c5   :  { %v1138_v46 = vpop.permute.xlu1 %1137 }
 0x6c9   :  { %v1216_v52 = vpop.permute.xlu1 %1215 }
 0x6cd   :  { %v1214_v54 = vpop.permute.xlu1 %1213 }
 0x6cf   :  { %v4410_v40 = vpop.eup %4409 }
 0x6d0   :  { %v976_v41 = vsel %vm143_vm2, %v4410_v40, 0.0 }
 0x6d1   :  { %977 = vadd.xlane.f32.xlu0 %v976_v41 }
 0x6e7   :  { %1135 = vrot.lane.b32.xlu0 %v4553_v10, %s4442_s28 }
 0x71d   :  { %v975_v42 = vpop.xlane.xlu0 %974 }
 0x71e   :  { %4411 = vrcp.f32 %v975_v42 }
 0x721   :  { %v1060_v43 = vpop.permute.xlu0 %1059 }
 0x722   :  { %4211 = vmatpush3.msra.mxu1 %v1060_v43 }
 0x723   :  { %4220 = vmatprep.subr.mxu1 %v4431_v6 }
 0x72b   :  { %v4412_v44 = vpop.eup %4411 }
 0x72c   :  { %v981_v45 = vmul.f32 %v4412_v44, %v4408_v34 }
 0x72e   :  { %4208 = vmatmul.mubr.msk.f32.vlgmr.msra.gmra.mxu0 %vm143_vm2, %v981_v45 }
 0x72f   :  { %4216 = vmatpush3.xpose.msk.msra.mxu0 %vm143_vm2, %v1138_v46  ;;  %4217 = vmatprep.mubr.msk.f32.mxu0 %vm4432_vm1, %v4431_v6 }
 0x730   :  { %4225 = vmatprep.subr.mxu0 %v4431_v6 }
 0x75a   :  { %v978_v47 = vpop.xlane.xlu0 %977 }
 0x75b   :  { %4413 = vrcp.f32 %v978_v47 }
 0x75e   :  { %v1136_v49 = vpop.permute.xlu0 %1135 }
 0x75f   :  { %4218 = vmatmul.mubr.msk.f32.vlgmr.msra.gmra.mxu0 %vm143_vm2, %v1136_v49 }
 0x760   :  { %4227 = vmatprep.mubr.msk.f32.mxu0 %vm4432_vm1, %v4431_v6 }
 0x768   :  { %v4414_v51 = vpop.eup %4413 }
 0x769   :  { %v982_v53 = vmul.f32 %v4414_v51, %v4410_v40 }
 0x76b   :  { %4213 = vmatmul.mubr.msk.f32.vlgmr.msra.gmra.mxu1 %vm143_vm2, %v982_v53 }
 0x76c   :  { %4221 = vmatpush3.xpose.msk.msra.mxu1 %vm143_vm2, %v1216_v52  ;;  %4222 = vmatprep.mubr.msk.f32.mxu1 %vm4432_vm1, %v4431_v6 }
 0x76d   :  { %4230 = vmatprep.subr.mxu1 %v4431_v6 }
 0x76f   :  { %4223 = vmatmul.mubr.msk.f32.vlgmr.msra.gmra.mxu1 %vm143_vm2, %v1214_v54 }
 0x770   :  { %4232 = vmatprep.mubr.msk.f32.mxu1 %vm4432_vm1, %v4431_v6 }
 0x7ee   :  { %v1055_v55 = vpop.f32.mrf.mxu0 }
 0x7f0   :  { %v4209_v56 = vpop.f32.mrf.mxu0 }
 0x81f   :  { %v1209_v57 = vpop.f32.mrf.mxu0 }
 0x820   :  { %v1291_v58 = vmul.f32 0.35355338, %v1209_v57 }
 0x821   :  { %v4219_v59 = vpop.f32.mrf.mxu0 }
 0x822   :  { %v1293_v60 = vsel %vm143_vm2, %v1291_v58, -inf }
 0x823   :  { %1294 = vmax.xlane.f32.xlu0 %v1293_v60 }
 0x82b   :  { %v1131_v61 = vpop.f32.mrf.mxu1 }
 0x82d   :  { %v4214_v62 = vpop.f32.mrf.mxu1 }
 0x82e   :  { %v1656_v62 = vld [vmem:[%s5350_s7 + $0x88] sm:$0xff] }
 0x82f   :  { %v1287_v63 = vpop.f32.mrf.mxu1 }
 0x830   :  { %v1292_v0 = vmul.f32 0.35355338, %v1287_v63 }
 0x831   :  { %v4224_v1 = vpop.f32.mrf.mxu1 }
 0x832   :  { %v1296_v3 = vsel %vm143_vm2, %v1292_v0, -inf }
 0x833   :  { %1297 = vmax.xlane.f32.xlu1 %v1296_v3 }
 0x844   :  { %1315 = vrot.lane.b32.xlu1 %v4553_v10, %s4443_s29 }
 0x848   :  { %1469 = vrot.lane.b32.xlu1 %v4631_v19, %s4444_s30 }
 0x84c   :  { %1471 = vrot.lane.b32.xlu1 %v4634_v25, %s4444_s30  ;;  %v1500_v25 = vld [vmem:[%s5348_s3 + $0x8] sm:$0xff] }
 0x850   :  { %1479 = vrot.lane.b32.xlu1 %v1131_v61, %s4445_s14  ;;  %v1663_v61 = vld [vmem:[%s5350_s7 + $0xc0] sm:$0xff] }
 0x8ac   :  { %v1295_v6 = vpop.xlane.xlu0 %1294 }
 0x8ad   :  { %v1299_v4 = vsub.f32 %v1291_v58, %v1295_v6 }
 0x8af   :  { %v1301_v7 = vmul.f32 1.442695, %v1299_v4  ;;  %v1639_v4 = vld [vmem:[%s5350_s7] sm:$0xff] }
 0x8b1   :  { %4415 = vpow2.f32 %v1301_v7  ;;  %v1647_v7 = vld [vmem:[%s5350_s7 + $0x40] sm:$0xff] }
 0x8bc   :  { %v1298_v8 = vpop.xlane.xlu1 %1297 }
 0x8bd   :  { %v1300_v9 = vsub.f32 %v1292_v0, %v1298_v8  ;;  %v1664_v0 = vld [vmem:[%s5350_s7 + $0xc8] sm:$0xff] }
 0x8be   :  { %v4416_v12 = vpop.eup %4415  ;;  %v3771_v3 = vcombine.low %v1656_v62, %v1664_v0  ;;  %v3772_v6 = vcombine.high %v1656_v62, %v1664_v0  ;;  %v1640_v8 = vld [vmem:[%s5350_s7 + $0x8] sm:$0xff]  ;;  %v1662_v62 = vld [vmem:[%s5350_s7 + $0xb8] sm:$0xff] }
 0x8bf   :  { %v1303_v13 = vmul.f32 1.442695, %v1300_v9  ;;  %v1305_v14 = vsel %vm143_vm2, %v4416_v12, 0.0  ;;  %v3754_v9 = vcombine.high %v1639_v4, %v1647_v7 }
 0x8c0   :  { %v1316_v15 = vpop.permute.xlu1 %1315  ;;  %1306 = vadd.xlane.f32.xlu0 %v1305_v14 }
 0x8c1   :  { %4417 = vpow2.f32 %v1303_v13  ;;  %4226 = vmatpush3.msra.mxu0 %v1316_v15  ;;  %v3753_v13 = vcombine.low %v1639_v4, %v1647_v7  ;;  %v1645_v4 = vld [vmem:[%s5350_s7 + $0x30] sm:$0xff] }
 0x8c2   :  { %4235 = vmatprep.subr.mxu0 %v1502_v24  ;;  %v1653_v7 = vld [vmem:[%s5350_s7 + $0x70] sm:$0xff] }
 0x8c4   :  { %v1470_v31 = vpop.permute.xlu1 %1469 }
 0x8c5   :  { %v1491_v33 = vsel %vm143_vm2, %v4600_v48, %v1470_v31  ;;  %v3748_v48 = vld [vmem:[%s5349_s4] ss:$0 sm:$0xff] }
 0x8c8   :  { %v1472_v37 = vpop.permute.xlu1 %1471 }
 0x8c9   :  { %v1492_v39 = vsel %vm143_vm2, %v4602_v50, %v1472_v37  ;;  %v1641_v37 = vld [vmem:[%s5350_s7 + $0x10] sm:$0xff] }
 0x8cc   :  { %v1480_v38 = vpop.permute.xlu1 %1479 }
 0x8cd   :  { %v1495_v40 = vsel %vm1493_vm4, %v1492_v39, %v1480_v38  ;;  %v1649_v38 = vld [vmem:[%s5350_s7 + $0x50] sm:$0xff]  ;;  %v1642_v39 = vld [vmem:[%s5350_s7 + $0x18] sm:$0xff] }
 0x8ce   :  { %v4418_v10 = vpop.eup %4417 }
 0x8cf   :  { %v1308_v16 = vsel %vm143_vm2, %v4418_v10, 0.0 }
 0x8d0   :  { %1309 = vadd.xlane.f32.xlu0 %v1308_v16  ;;  %v1665_v16 = vld [vmem:[%s5350_s7 + $0xd0] sm:$0xff] }
 0x8e6   :  { %1391 = vrot.lane.b32.xlu0 %v4556_v11, %s4443_s29  ;;  %v1501_v11 = vld [vmem:[%s5348_s3 + $0x10] sm:$0xff] }
 0x8ea   :  { %1477 = vrot.lane.b32.xlu0 %v1055_v55, %s4445_s14 }
 0x949   :  { %v1307_v17 = vpop.xlane.xlu0 %1306 }
 0x94a   :  { %4419 = vrcp.f32 %v1307_v17  ;;  %v1658_v17 = vld [vmem:[%s5350_s7 + $0x98] sm:$0xff] }
 0x957   :  { %v4420_v18 = vpop.eup %4419 }
 0x958   :  { %v1313_v19 = vmul.f32 %v4420_v18, %v4416_v12  ;;  %v1648_v12 = vld [vmem:[%s5350_s7 + $0x48] sm:$0xff]  ;;  %v4447_v18 = vmov 0  }
 0x959   :  { %v1310_v20 = vpop.xlane.xlu0 %1309  ;;  %v3755_v14 = vcombine.low %v1640_v8, %v1648_v12  ;;  %v3756_v15 = vcombine.high %v1640_v8, %v1648_v12  ;;  %v1646_v8 = vld [vmem:[%s5350_s7 + $0x38] sm:$0xff] }
 0x95a   :  { %4421 = vrcp.f32 %v1310_v20  ;;  %4228 = vmatmul.mubr.msk.f32.vlgmr.msra.gmra.mxu0 %vm143_vm2, %v1313_v19  ;;  %v1666_v20 = vld [vmem:[%s5350_s7 + $0xd8] sm:$0xff] }
 0x95b   :  { %4236 = vmatpush3.msra.mxu0 %v1502_v24 }
 0x95c   :  { %4237 = vmatprep.subr.mxu0 %v1501_v11 }
 0x95d   :  { %v1392_v21 = vpop.permute.xlu0 %1391  ;;  %4238 = vmatpush3.msra.mxu0 %v1501_v11 }
 0x95e   :  { %4231 = vmatpush3.msra.mxu1 %v1392_v21  ;;  %4239 = vmatprep.subr.mxu0 %v1500_v25 }
 0x95f   :  { %4240 = vmatpush3.msra.mxu0 %v1500_v25 }
 0x960   :  { %4241 = vmatprep.subr.mxu0 %v1499_v26 }
 0x961   :  { %4242 = vmatpush3.msra.mxu0 %v1499_v26  ;;  %v1478_v32 = vpop.permute.xlu0 %1477 }
 0x962   :  { %v1494_v34 = vsel %vm1493_vm4, %v1491_v33, %v1478_v32  ;;  %1973 = vmatprep.subr.bf16.mxu0 %v3772_v6 }
 0x967   :  { %v4422_v22 = vpop.eup %4421 }
 0x968   :  { %v1314_v23 = vmul.f32 %v4422_v22, %v4418_v10  ;;  %v1657_v10 = vld [vmem:[%s5350_s7 + $0x90] sm:$0xff]  ;;  %v3775_v22 = vcombine.low %v1658_v17, %v1666_v20 }
 0x969   :  { %v3774_v19 = vcombine.high %v1657_v10, %v1665_v16  ;;  %v3773_v21 = vcombine.low %v1657_v10, %v1665_v16  ;;  %v3765_v10 = vcombine.low %v1645_v4, %v1653_v7 }
 0x96a   :  { %4233 = vmatmul.mubr.msk.f32.vlgmr.msra.gmra.mxu1 %vm143_vm2, %v1314_v23  ;;  %v3776_v23 = vcombine.high %v1658_v17, %v1666_v20  ;;  %v4263_v17 = vld [vmem:[%s5351_s9 + $0x78] sm:$0xff]  }
 0x96b   :  { %1950 = vmatprep.mubr.bf16.mxu1 %v4447_v18  ;;  %v4265_v20 = vld [vmem:[%s5351_s9 + $0x38] sm:$0xff]  }
 0xa1a   :  { %v1387_v27 = vpop.f32.mrf.mxu0 }
 0xa1b   :  { %1485 = vrot.lane.b32.xlu0 %v1387_v27, %s4446_s2 }
 0xa1c   :  { %v4229_v28 = vpop.f32.mrf.mxu0 }
 0xa2a   :  { %v1463_v29 = vpop.f32.mrf.mxu1 }
 0xa2b   :  { %1487 = vrot.lane.b32.xlu1 %v1463_v29, %s4446_s2 }
 0xa2c   :  { %v4234_v30 = vpop.f32.mrf.mxu1 }
 0xa2d   :  { %v3751_v30 = vld [vmem:[%s5352_s5] ss:$0 sm:$0xff] }
 0xa8d   :  { %v1486_v35 = vpop.permute.xlu0 %1485 }
 0xa8e   :  { %v1497_v36 = vsel %vm1496_vm3, %v1494_v34, %v1486_v35  ;;  %v3752_v35 = vld [vmem:[%s5353_s6] ss:$0 sm:$0xff] }
 0xa8f   :  { %4243 = vmatprep.mubr.msk.f32.mxu0 %vm58_vm0, %v1497_v36 }
 0xa9d   :  { %v1488_v41 = vpop.permute.xlu1 %1487 }
 0xa9e   :  { %v1498_v42 = vsel %vm1496_vm3, %v1495_v40, %v1488_v41  ;;  %v1650_v40 = vld [vmem:[%s5350_s7 + $0x58] sm:$0xff] }
 0xa9f   :  { %4244 = vmatmul.mubr.msk.f32.vlgmr.msra.gmra.mxu0 %vm58_vm0, %v1498_v42 }
 0xaa0   :  { %1974 = vmatpush1.bf16.msra.mxu0 %v3771_v3  ;;  %1993 = vmatprep.mubr.bf16.mxu0 %v4447_v18 }
 0xaa1   :  { %1975 = vmatprep.subr.bf16.mxu0 %v3756_v15 }
 0xaa4   :  { %1976 = vmatpush1.bf16.msra.mxu0 %v3755_v14  ;;  %v3766_v14 = vcombine.high %v1645_v4, %v1653_v7 }
 0xaa5   :  { %2059 = vmatprep.subr.bf16.mxu0 %v3776_v23  ;;  %v4269_v23 = vld [vmem:[%s5351_s9 + $0x30] sm:$0xff]  }
 0xb5f   :  { %v4245_v43 = vpop.f32.mrf.mxu0 }
 0xb60   :  { %v1588_v44 = vadd.f32 %v4245_v43, %v3748_v48  ;;  %v3758_v43 = vcombine.high %v1641_v37, %v1649_v38 }
 0xb61   :  { %v1582_v45 = vpop.f32.mrf.mxu0 }
 0xb62   :  { %v1583_v46 = vadd.f32 %v3748_v48, %v1582_v45  ;;  %v1592_v47 = vadd.f32 %v1588_v44, %v4540_v5  ;;  %v3760_v44 = vcombine.high %v1642_v39, %v1650_v40  ;;  %v1659_v45 = vld [vmem:[%s5350_s7 + $0xa0] sm:$0xff] }
 0xb64   :  { %v1598_v49 = vsel %vm58_vm0, %v1592_v47, 0.0  ;;  %v1591_v51 = vadd.f32 %v1583_v46, %v4527_v2  ;;  %v1655_v2 = vld [vmem:[%s5350_s7 + $0x80] sm:$0xff] }
 0xb65   :  { %1599 = vadd.xlane.f32.xlu1 %v1598_v49  ;;  %v3770_v63 = vcombine.high %v1655_v2, %v1663_v61  ;;  %v3769_v1 = vcombine.low %v1655_v2, %v1663_v61  ;;  %v1667_v46 = vld [vmem:[%s5350_s7 + $0xe0] sm:$0xff]  ;;  %v1668_v49 = vld [vmem:[%s5350_s7 + $0xe8] sm:$0xff]  ;;  %v1661_v2 = vld [vmem:[%s5350_s7 + $0xb0] sm:$0xff] }
 0xb66   :  { %v1595_v50 = vsel %vm58_vm0, %v1591_v51, 0.0  ;;  %v1669_v61 = vld [vmem:[%s5350_s7 + $0xf0] sm:$0xff] }
 0xb67   :  { %1596 = vadd.xlane.f32.xlu0 %v1595_v50  ;;  %1930 = vmatprep.subr.bf16.mxu1 %v3770_v63  ;;  %v3759_v50 = vcombine.low %v1642_v39, %v1650_v40  ;;  %v1670_v63 = vld [vmem:[%s5350_s7 + $0xf8] sm:$0xff]  ;;  %v3782_v3 = vcombine.high %v1661_v2, %v1669_v61  ;;  %v3781_v12 = vcombine.low %v1661_v2, %v1669_v61  ;;  %v4286_v39 = vld [vmem:[%s5351_s9 + $0x90] sm:$0xff]   ;;  %v4287_v40 = vld [vmem:[%s5351_s9 + $0x48] sm:$0xff]  }
 0xb68   :  { %1931 = vmatpush1.bf16.msra.mxu1 %v3769_v1  ;;  %v3784_v6 = vcombine.high %v1662_v62, %v1670_v63 }
 0xb69   :  { %1932 = vmatprep.subr.bf16.mxu1 %v3754_v9  ;;  %v1654_v9 = vld [vmem:[%s5350_s7 + $0x78] sm:$0xff] }
 0xb6a   :  { %v3768_v15 = vcombine.high %v1646_v8, %v1654_v9  ;;  %v3767_v16 = vcombine.low %v1646_v8, %v1654_v9 }
 0xb6c   :  { %1933 = vmatpush1.bf16.msra.mxu1 %v3753_v13  ;;  %v3783_v13 = vcombine.low %v1662_v62, %v1670_v63 }
 0xb6d   :  { %2016 = vmatprep.subr.bf16.mxu1 %v3774_v19  ;;  %v4264_v19 = vld [vmem:[%s5351_s9 + $0xf8] sm:$0xff]  }
 0xbee   :  { %v1600_v52 = vpop.xlane.xlu1 %1599 }
 0xbef   :  { %v1603_v53 = vmul.f32 0.03125, %v1600_v52  ;;  %v3778_v52 = vcombine.high %v1659_v45, %v1667_v46 }
 0xbf0   :  { %v1597_v54 = vpop.xlane.xlu0 %1596 }
 0xbf1   :  { %v1602_v55 = vmul.f32 0.03125, %v1597_v54  ;;  %v1605_v56 = vsub.f32 %v1592_v47, %v1603_v53  ;;  %v1660_v47 = vld [vmem:[%s5350_s7 + $0xa8] sm:$0xff]  ;;  %v1643_v54 = vld [vmem:[%s5350_s7 + $0x20] sm:$0xff] }
 0xbf2   :  { %v3780_v53 = vcombine.high %v1660_v47, %v1668_v49 }
 0xbf3   :  { %v1604_v57 = vsub.f32 %v1591_v51, %v1602_v55  ;;  %v1607_v60 = vmul.f32 %v1605_v56, %v1605_v56  ;;  %v3757_v51 = vcombine.low %v1641_v37, %v1649_v38  ;;  %v1651_v55 = vld [vmem:[%s5350_s7 + $0x60] sm:$0xff]  ;;  %v4284_v37 = vld [vmem:[%s5351_s9 + $0xd0] sm:$0xff]  }
 0xbf4   :  { %v3761_v0 = vcombine.low %v1643_v54, %v1651_v55  ;;  %v4285_v38 = vld [vmem:[%s5351_s9 + $0x10] sm:$0xff]  }
 0xbf5   :  { %v1606_v58 = vmul.f32 %v1604_v57, %v1604_v57  ;;  %v1611_v5 = vsel %vm58_vm0, %v1607_v60, 0.0  ;;  %v3762_v60 = vcombine.high %v1643_v54, %v1651_v55 }
 0xbf7   :  { %v1608_v59 = vsel %vm58_vm0, %v1606_v58, 0.0  ;;  %v3777_v58 = vcombine.low %v1659_v45, %v1667_v46  ;;  %v4291_v45 = vld [vmem:[%s5351_s9 + $0x40] sm:$0xff]  }
 0xbf8   :  { %1609 = vadd.xlane.f32.xlu0 %v1608_v59  ;;  %v3779_v59 = vcombine.low %v1660_v47, %v1668_v49  ;;  %v4292_v46 = vld [vmem:[%s5351_s9 + $0xc0] sm:$0xff]  }
 0xbf9   :  { %v4293_v47 = vld [vmem:[%s5351_s9] sm:$0xff]  }
 0xbfa   :  { %v4294_v49 = vld [vmem:[%s5351_s9 + $0x80] sm:$0xff]  }
 0xbfc   :  { %1612 = vadd.xlane.f32.xlu0 %v1611_v5 }
 0xc81   :  { %v1610_v24 = vpop.xlane.xlu0 %1609 }
 0xc82   :  { %v1614_v11 = vmul.f32 0.03125, %v1610_v24  ;;  %v4270_v24 = vld [vmem:[%s5351_s9 + $0xb0] sm:$0xff]  }
 0xc84   :  { %v1616_v25 = vadd.f32 1e-05, %v1614_v11  ;;  %v4271_v11 = vld [vmem:[%s5351_s9 + $0x68] sm:$0xff]  }
 0xc85   :  { %v1613_v26 = vpop.xlane.xlu0 %1612 }
 0xc86   :  { %4423 = vrsqrt.f32 %v1616_v25  ;;  %v1615_v27 = vmul.f32 0.03125, %v1613_v26  ;;  %v4272_v25 = vld [vmem:[%s5351_s9 + $0xe8] sm:$0xff]  }
 0xc87   :  { %v4273_v26 = vld [vmem:[%s5351_s9 + $0x28] sm:$0xff]  }
 0xc88   :  { %v1617_v28 = vadd.f32 1e-05, %v1615_v27  ;;  %v4274_v27 = vld [vmem:[%s5351_s9 + $0xa8] sm:$0xff]  }
 0xc8a   :  { %4425 = vrsqrt.f32 %v1617_v28  ;;  %v4275_v28 = vld [vmem:[%s5351_s9 + $0x60] sm:$0xff]  }
 0xc93   :  { %v4424_v29 = vpop.eup %4423 }
 0xc94   :  { %v1620_v31 = vmul.f32 %v4424_v29, %v1604_v57  ;;  %v1652_v57 = vld [vmem:[%s5350_s7 + $0x68] sm:$0xff]  ;;  %v4276_v29 = vld [vmem:[%s5351_s9 + $0xe0] sm:$0xff]  }
 0xc96   :  { %v1628_v33 = vmul.f32 %v3751_v30, %v1620_v31  ;;  %v4278_v31 = vld [vmem:[%s5351_s9 + $0xa0] sm:$0xff]  }
 0xc97   :  { %v4426_v32 = vpop.eup %4425 }
 0xc98   :  { %v1621_v34 = vmul.f32 %v4426_v32, %v1605_v56  ;;  %v4756_v41 = vadd.f32 %v3752_v35, %v1628_v33  ;;  %v1644_v56 = vld [vmem:[%s5350_s7 + $0x28] sm:$0xff]  ;;  %v4279_v32 = vld [vmem:[%s5351_s9 + $0x58] sm:$0xff]  }
 0xc99   :  { %v3764_v5 = vcombine.high %v1644_v56, %v1652_v57  ;;  %v3763_v1 = vcombine.low %v1644_v56, %v1652_v57  ;;  %v4280_v33 = vld [vmem:[%s5351_s9 + $0xd8] sm:$0xff]  }
 0xc9a   :  { %v1629_v36 = vmul.f32 %v3751_v30, %v1621_v34  ;;  %v4277_v30 = vld [vmem:[%s5351_s9 + $0x20] sm:$0xff]   ;;  %v4281_v34 = vld [vmem:[%s5351_s9 + $0x18] sm:$0xff]  }
 0xc9c   :  { %v4758_v42 = vadd.f32 %v3752_v35, %v1629_v36  ;;  %v4282_v35 = vld [vmem:[%s5351_s9 + $0x98] sm:$0xff]   ;;  %v4283_v36 = vld [vmem:[%s5351_s9 + $0x50] sm:$0xff]  }
 0xc9e   :  { %v4762_v48 = vpack.c.bf16 %v4758_v42, %v4756_v41 }
 0xca0   :  { %3785 = vmatmul.mubr.msk.bf16.vlgmr.msra.gmra.mxu1 %vm58_vm0, %v4762_v48  ;;  %3786 = vmatmul.mubr.msk.bf16.vlgmr.msra.gmra.mxu0 %vm58_vm0, %v4762_v48 }
 0xca1   :  { %2017 = vmatpush1.bf16.msra.mxu1 %v3773_v21  ;;  %2060 = vmatpush1.bf16.msra.mxu0 %v3775_v22  ;;  %v4266_v21 = vld [vmem:[%s5351_s9 + $0xb8] sm:$0xff]   ;;  %v4267_v22 = vld [vmem:[%s5351_s9 + $0x70] sm:$0xff]  }
 0xca2   :  { %2018 = vmatprep.subr.bf16.mxu1 %v3758_v43  ;;  %2061 = vmatprep.subr.bf16.mxu0 %v3760_v44  ;;  %v4289_v43 = vld [vmem:[%s5351_s9 + $0x8] sm:$0xff]  }
 0xca3   :  { %2036 = vmatprep.mubr.bf16.mxu1 %v4447_v18  ;;  %2079 = vmatprep.mubr.bf16.mxu0 %v4447_v18  ;;  %v4290_v44 = vld [vmem:[%s5351_s9 + $0x88] sm:$0xff]  }
 0xca5   :  { %2019 = vmatpush1.bf16.msra.mxu1 %v3757_v51  ;;  %2062 = vmatpush1.bf16.msra.mxu0 %v3759_v50  ;;  %v4295_v51 = vld [vmem:[%s5351_s9 + $0x178] sm:$0xff]  }
 0xca6   :  { %2102 = vmatprep.subr.bf16.mxu1 %v3778_v52  ;;  %2145 = vmatprep.subr.bf16.mxu0 %v3780_v53  ;;  %v4296_v50 = vld [vmem:[%s5351_s9 + $0x1f8] sm:$0xff]   ;;  %v1675_v52 = vlaneseq }
 0xca8   :  { %3787 = vmatmul.mubr.msk.bf16.vlgmr.msra.gmra.mxu1 %vm58_vm0, %v4762_v48  ;;  %3788 = vmatmul.mubr.msk.bf16.vlgmr.msra.gmra.mxu0 %vm58_vm0, %v4762_v48  ;;  %v4936_v53 = vshrl.u32 %v1675_v52, 7 }
 0xca9   :  { %2103 = vmatpush1.bf16.msra.mxu1 %v3777_v58  ;;  %2146 = vmatpush1.bf16.msra.mxu0 %v3779_v59  ;;  %v4945_v58 = vld [vmem:[%s5354_s8] sm:$0xff] }
 0xcaa   :  { %2104 = vmatprep.subr.bf16.mxu1 %v3762_v60  ;;  %2147 = vmatprep.subr.bf16.mxu0 %v3764_v5  ;;  %v1681_v54 = vsub.s32 1, %v4936_v53  ;;  %v1689_v55 = vsub.s32 3, %v4936_v53  ;;  %v1677_v56 = vsub.s32 0, %v4936_v53  ;;  %v1685_v57 = vsub.s32 2, %v4936_v53 }
 0xcab   :  { %2122 = vmatprep.mubr.bf16.mxu1 %v4447_v18  ;;  %2165 = vmatprep.mubr.bf16.mxu0 %v4447_v18  ;;  %v1705_v4 = vsub.s32 7, %v4936_v53 }
 0xcac   :  { %v1682_v5 = vrot.slane %v4945_v58, %v1681_v54  ;;  %v1690_v2 = vrot.slane %v4945_v58, %v1689_v55  ;;  %v1678_v61 = vrot.slane %v4945_v58, %v1677_v56  ;;  %v1686_v62 = vrot.slane %v4945_v58, %v1685_v57 }
 0xcad   :  { %2105 = vmatpush1.bf16.msra.mxu1 %v3761_v0  ;;  %2148 = vmatpush1.bf16.msra.mxu0 %v3763_v1 }
 0xcae   :  { %2188 = vmatprep.subr.bf16.mxu1 %v3782_v3  ;;  %2231 = vmatprep.subr.bf16.mxu0 %v3784_v6  ;;  %v1697_v6 = vsub.s32 5, %v4936_v53 }
 0xcb0   :  { %3789 = vmatmul.mubr.msk.bf16.vlgmr.msra.gmra.mxu1 %vm58_vm0, %v4762_v48  ;;  %3790 = vmatmul.mubr.msk.bf16.vlgmr.msra.gmra.mxu0 %vm58_vm0, %v4762_v48 }
 0xcb1   :  { %2189 = vmatpush1.bf16.msra.mxu1 %v3781_v12  ;;  %2232 = vmatpush1.bf16.msra.mxu0 %v3783_v13 }
 0xcb2   :  { %2190 = vmatprep.subr.bf16.mxu1 %v3766_v14  ;;  %2233 = vmatprep.subr.bf16.mxu0 %v3768_v15 }
 0xcb3   :  { %2208 = vmatprep.mubr.bf16.mxu1 %v4447_v18  ;;  %2251 = vmatprep.mubr.bf16.mxu0 %v4447_v18  ;;  %v4268_v18 = vld [vmem:[%s5351_s9 + $0xf0] sm:$0xff]  }
 0xcb5   :  { %2191 = vmatpush1.bf16.msra.mxu1 %v3765_v10  ;;  %2234 = vmatpush1.bf16.msra.mxu0 %v3767_v16 }
 0xcb6   :  { %3968 = vmatprep.subr.bf16.mxu1 %v4263_v17  ;;  %3990 = vmatprep.subr.bf16.mxu0 %v4264_v19 }
 0xcb8   :  { %3791 = vmatmul.mubr.msk.bf16.vlgmr.msra.gmra.mxu1 %vm58_vm0, %v4762_v48  ;;  %3792 = vmatmul.mubr.msk.bf16.vlgmr.msra.gmra.mxu0 %vm58_vm0, %v4762_v48  ;;  %v4288_v48 = vld [vmem:[%s5351_s9 + $0xc8] sm:$0xff]  }
 0xcb9   :  { %3969 = vmatpush3.bf16.msra.mxu1 %v4265_v20  ;;  %3991 = vmatpush3.bf16.msra.mxu0 %v4266_v21 }
 0xcba   :  { %3970 = vmatprep.subr.bf16.mxu1 %v4267_v22  ;;  %3992 = vmatprep.subr.bf16.mxu0 %v4268_v18  ;;  %v1698_v18 = vrot.slane %v4945_v58, %v1697_v6 }
 0xcbd   :  { %3971 = vmatpush3.bf16.msra.mxu1 %v4269_v23  ;;  %3993 = vmatpush3.bf16.msra.mxu0 %v4270_v24  ;;  %v1706_v23 = vrot.slane %v4945_v58, %v1705_v4 }
 0xcbe   :  { %3972 = vmatprep.subr.bf16.mxu1 %v4271_v11  ;;  %3994 = vmatprep.subr.bf16.mxu0 %v4272_v25 }
 0xcc1   :  { %3973 = vmatpush3.bf16.msra.mxu1 %v4273_v26  ;;  %3995 = vmatpush3.bf16.msra.mxu0 %v4274_v27 }
 0xcc2   :  { %3974 = vmatprep.subr.bf16.mxu1 %v4275_v28  ;;  %3996 = vmatprep.subr.bf16.mxu0 %v4276_v29 }
 0xcc5   :  { %3975 = vmatpush3.bf16.msra.mxu1 %v4277_v30  ;;  %3997 = vmatpush3.bf16.msra.mxu0 %v4278_v31 }
 0xcc6   :  { %3976 = vmatprep.subr.bf16.mxu1 %v4279_v32  ;;  %3998 = vmatprep.subr.bf16.mxu0 %v4280_v33  ;;  %v4297_v33 = vld [vmem:[%s5351_s9 + $0x138] sm:$0xff]  }
 0xcc9   :  { %3977 = vmatpush3.bf16.msra.mxu1 %v4281_v34  ;;  %3999 = vmatpush3.bf16.msra.mxu0 %v4282_v35  ;;  %v4298_v34 = vld [vmem:[%s5351_s9 + $0x1b8] sm:$0xff]  }
 0xcca   :  { %3978 = vmatprep.subr.bf16.mxu1 %v4283_v36  ;;  %4000 = vmatprep.subr.bf16.mxu0 %v4284_v37 }
 0xccd   :  { %3979 = vmatpush3.bf16.msra.mxu1 %v4285_v38  ;;  %4001 = vmatpush3.bf16.msra.mxu0 %v4286_v39  ;;  %v4299_v39 = vld [vmem:[%s5351_s9 + $0x170] sm:$0xff]  }
 0xcce   :  { %3980 = vmatprep.subr.bf16.mxu1 %v4287_v40  ;;  %4002 = vmatprep.subr.bf16.mxu0 %v4288_v48  ;;  %v4300_v40 = vld [vmem:[%s5351_s9 + $0x1f0] sm:$0xff]  }
 0xcd1   :  { %3981 = vmatpush3.bf16.msra.mxu1 %v4289_v43  ;;  %4003 = vmatpush3.bf16.msra.mxu0 %v4290_v44 }
 0xcd2   :  { %3982 = vmatprep.subr.bf16.mxu1 %v4291_v45  ;;  %4004 = vmatprep.subr.bf16.mxu0 %v4292_v46 }
 0xcd5   :  { %3983 = vmatpush3.bf16.msra.mxu1 %v4293_v47  ;;  %4005 = vmatpush3.bf16.msra.mxu0 %v4294_v49  ;;  %v4301_v49 = vld [vmem:[%s5351_s9 + $0x130] sm:$0xff]  }
 0xcd6   :  { %4012 = vmatprep.subr.bf16.mxu1 %v4295_v51  ;;  %4034 = vmatprep.subr.bf16.mxu0 %v4296_v50  ;;  %v4302_v51 = vld [vmem:[%s5351_s9 + $0x1b0] sm:$0xff]   ;;  %v4303_v50 = vld [vmem:[%s5351_s9 + $0x168] sm:$0xff]  }
 0xd60   :  { %v1952_v59 = vpop.f32.mrf.mxu1  ;;  %v1995_v60 = vpop.f32.mrf.mxu0 }
 0xd61   :  { %v1953_v13 = vadd.f32 %v1952_v59, %v1678_v61  ;;  %v1996_v14 = vadd.f32 %v1995_v60, %v1686_v62 }
 0xd62   :  { %v1954_v63 = vpop.f32.mrf.mxu1  ;;  %v1997_v0 = vpop.f32.mrf.mxu0 }
 0xd63   :  { %v1955_v7 = vadd.f32 %v1954_v63, %v1682_v5  ;;  %v1998_v8 = vadd.f32 %v1997_v0, %v1690_v2  ;;  %v2262_v27 = vmax.f32 %v1953_v13, 0.0  ;;  %v2264_v28 = vmax.f32 %v1996_v14, 0.0  ;;  %v4305_v63 = vld [vmem:[%s5351_s9 + $0x128] sm:$0xff]   ;;  %v4311_v13 = vld [vmem:[%s5351_s9 + $0x158] sm:$0xff]  }
 0xd64   :  { %v1956_v1 = vpop.f32.mrf.mxu1  ;;  %v1999_v3 = vpop.f32.mrf.mxu0  ;;  %v4306_v0 = vld [vmem:[%s5351_s9 + $0x1a8] sm:$0xff]   ;;  %v4312_v14 = vld [vmem:[%s5351_s9 + $0x1d8] sm:$0xff]  }
 0xd65   :  { %v1957_v9 = vadd.f32 %v1956_v1, %v1678_v61  ;;  %v2000_v12 = vadd.f32 %v1999_v3, %v1686_v62  ;;  %v2263_v24 = vmax.f32 %v1955_v7, 0.0  ;;  %v2265_v11 = vmax.f32 %v1998_v8, 0.0  ;;  %v4307_v1 = vld [vmem:[%s5351_s9 + $0x160] sm:$0xff]  }
 0xd66   :  { %v1958_v15 = vpop.f32.mrf.mxu1  ;;  %v2001_v10 = vpop.f32.mrf.mxu0  ;;  %v4308_v3 = vld [vmem:[%s5351_s9 + $0x1e0] sm:$0xff]  }
 0xd67   :  { %v1959_v16 = vadd.f32 %v1958_v15, %v1682_v5  ;;  %v2002_v17 = vadd.f32 %v2001_v10, %v1690_v2  ;;  %v2278_v19 = vmax.f32 %v1957_v9, 0.0  ;;  %v2280_v20 = vmax.f32 %v2000_v12, 0.0  ;;  %v4304_v2 = vld [vmem:[%s5351_s9 + $0x1e8] sm:$0xff]   ;;  %v4309_v8 = vld [vmem:[%s5351_s9 + $0x120] sm:$0xff]   ;;  %v4313_v10 = vld [vmem:[%s5351_s9 + $0x118] sm:$0xff]  }
 0xd68   :  { %v4961_v21 = vpop.f32.mrf.mxu1  ;;  %v4963_v22 = vpop.f32.mrf.mxu0  ;;  %v4310_v12 = vld [vmem:[%s5351_s9 + $0x1a0] sm:$0xff]  }
 0xd69   :  { %v2279_v25 = vmax.f32 %v1959_v16, 0.0  ;;  %v2281_v26 = vmax.f32 %v2002_v17, 0.0  ;;  %v2294_v35 = vpack.c.bf16 %v2278_v19, %v2262_v27  ;;  %v2296_v36 = vpack.c.bf16 %v2280_v20, %v2264_v28  ;;  %v4314_v17 = vld [vmem:[%s5351_s9 + $0x198] sm:$0xff]   ;;  %v4315_v19 = vld [vmem:[%s5351_s9 + $0x150] sm:$0xff]   ;;  %v4319_v27 = vld [vmem:[%s5351_s9 + $0x148] sm:$0xff]  }
 0xd6a   :  { %v2040_v29 = vpop.f32.mrf.mxu1  ;;  %v2083_v30 = vpop.f32.mrf.mxu0  ;;  %v4316_v20 = vld [vmem:[%s5351_s9 + $0x1d0] sm:$0xff]   ;;  %v4320_v28 = vld [vmem:[%s5351_s9 + $0x1c8] sm:$0xff]  }
 0xd6b   :  { %v2295_v31 = vpack.c.bf16 %v2279_v25, %v2263_v24  ;;  %v2297_v32 = vpack.c.bf16 %v2281_v26, %v2265_v11  ;;  %v2041_v48 = vadd.f32 %v2040_v29, %v1698_v18  ;;  %v2084_v43 = vadd.f32 %v2083_v30, %v1706_v23  ;;  %v4317_v11 = vld [vmem:[%s5351_s9 + $0x110] sm:$0xff]  }
 0xd6c   :  { %v4977_v37 = vpop.f32.mrf.mxu1  ;;  %v4979_v38 = vpop.f32.mrf.mxu0  ;;  %v4318_v26 = vld [vmem:[%s5351_s9 + $0x190] sm:$0xff]  }
 0xd6d   :  { %3373 = vmatprep.mubr.bf16.mxu1 %v2295_v31  ;;  %3414 = vmatprep.mubr.bf16.mxu0 %v2297_v32  ;;  %v2267_v52 = vmax.f32 %v2041_v48, 0.0  ;;  %v2269_v59 = vmax.f32 %v2084_v43, 0.0  ;;  %v5066_v31 = vld [vmem:[%s5354_s8 + $0x8] sm:$0xff] }
 0xd6e   :  { %v2044_v44 = vpop.f32.mrf.mxu1  ;;  %v2087_v45 = vpop.f32.mrf.mxu0  ;;  %3374 = vmatmul.mubr.bf16.vlgmr.msra.gmra.mxu1 %v2294_v35  ;;  %3415 = vmatmul.mubr.bf16.vlgmr.msra.gmra.mxu0 %v2296_v36  ;;  %v1714_v35 = vrot.slane %v5066_v31, %v1681_v54  ;;  %v4324_v54 = vld [vmem:[%s5351_s9 + $0x1c0] sm:$0xff]  }
 0xd6f   :  { %v2045_v46 = vadd.f32 %v2044_v44, %v1698_v18  ;;  %v2088_v47 = vadd.f32 %v2087_v45, %v1706_v23  ;;  %4013 = vmatpush3.bf16.msra.mxu1 %v4297_v33  ;;  %4035 = vmatpush3.bf16.msra.mxu0 %v4298_v34  ;;  %v1693_v18 = vsub.s32 4, %v4936_v53  ;;  %v1701_v23 = vsub.s32 6, %v4936_v53  ;;  %v4321_v33 = vld [vmem:[%s5351_s9 + $0x108] sm:$0xff]  }
 0xd70   :  { %4014 = vmatprep.subr.bf16.mxu1 %v4299_v39  ;;  %4036 = vmatprep.subr.bf16.mxu0 %v4300_v40  ;;  %v5011_v7 = vpop.f32.mrf.mxu1  ;;  %v5016_v9 = vpop.f32.mrf.mxu0  ;;  %v4323_v39 = vld [vmem:[%s5351_s9 + $0x140] sm:$0xff]  }
 0xd71   :  { %v2283_v60 = vmax.f32 %v2045_v46, 0.0  ;;  %v2285_v5 = vmax.f32 %v2088_v47, 0.0  ;;  %v1694_v29 = vrot.slane %v4945_v58, %v1693_v18  ;;  %v1702_v30 = vrot.slane %v4945_v58, %v1701_v23  ;;  %v4322_v58 = vld [vmem:[%s5351_s9 + $0x188] sm:$0xff]  }
 0xd72   :  { %v2126_v15 = vpop.f32.mrf.mxu1  ;;  %v2169_v16 = vpop.f32.mrf.mxu0 }
 0xd73   :  { %v2299_v61 = vpack.c.bf16 %v2283_v60, %v2267_v52  ;;  %v2301_v62 = vpack.c.bf16 %v2285_v5, %v2269_v59  ;;  %4015 = vmatpush3.bf16.msra.mxu1 %v4301_v49  ;;  %4037 = vmatpush3.bf16.msra.mxu0 %v4302_v51  ;;  %v2043_v34 = vadd.f32 %v4977_v37, %v1694_v29  ;;  %v4328_v51 = vld [vmem:[%s5351_s9 + $0x2f8] sm:$0xff]  }
 0xd74   :  { %4016 = vmatprep.subr.bf16.mxu1 %v4303_v50  ;;  %4038 = vmatprep.subr.bf16.mxu0 %v4304_v2  ;;  %v5041_v24 = vpop.f32.mrf.mxu1  ;;  %v5046_v25 = vpop.f32.mrf.mxu0  ;;  %v2086_v40 = vadd.f32 %v4979_v38, %v1702_v30  ;;  %v1722_v37 = vrot.slane %v5066_v31, %v1689_v55  ;;  %v2039_v48 = vadd.f32 %v4961_v21, %v1694_v29  ;;  %v4325_v38 = vld [vmem:[%s5351_s9 + $0x100] sm:$0xff]   ;;  %v4327_v21 = vld [vmem:[%s5351_s9 + $0x278] sm:$0xff]  }
 0xd75   :  { %3455 = vmatprep.mubr.bf16.mxu1 %v2299_v61  ;;  %3496 = vmatprep.mubr.bf16.mxu0 %v2301_v62  ;;  %v2082_v44 = vadd.f32 %v4963_v22, %v1702_v30  ;;  %v2282_v46 = vmax.f32 %v2043_v34, 0.0  ;;  %v2127_v47 = vadd.f32 %v2126_v15, %v1714_v35  ;;  %v4326_v55 = vld [vmem:[%s5351_s9 + $0x180] sm:$0xff]   ;;  %v4329_v5 = vld [vmem:[%s5351_s9 + $0x238] sm:$0xff]   ;;  %v4335_v15 = vld [vmem:[%s5351_s9 + $0x268] sm:$0xff]  }
 0xd76   :  { %v2130_v32 = vpop.f32.mrf.mxu1  ;;  %v2173_v36 = vpop.f32.mrf.mxu0  ;;  %v2284_v49 = vmax.f32 %v2086_v40, 0.0  ;;  %v2170_v22 = vadd.f32 %v2169_v16, %v1722_v37  ;;  %v2266_v50 = vmax.f32 %v2039_v48, 0.0  ;;  %v4330_v62 = vld [vmem:[%s5351_s9 + $0x2b8] sm:$0xff]   ;;  %v4337_v16 = vld [vmem:[%s5351_s9 + $0x228] sm:$0xff]   ;;  %v4349_v40 = vld [vmem:[%s5351_s9 + $0x210] sm:$0xff]  }
 0xd77   :  { %4017 = vmatpush3.bf16.msra.mxu1 %v4305_v63  ;;  %4039 = vmatpush3.bf16.msra.mxu0 %v4306_v0  ;;  %v2131_v43 = vadd.f32 %v2130_v32, %v1714_v35  ;;  %v2174_v45 = vadd.f32 %v2173_v36, %v1722_v37  ;;  %v2268_v59 = vmax.f32 %v2082_v44, 0.0  ;;  %v2271_v61 = vmax.f32 %v2127_v47, 0.0  ;;  %v4343_v29 = vld [vmem:[%s5351_s9 + $0x258] sm:$0xff]   ;;  %v4347_v36 = vld [vmem:[%s5351_s9 + $0x250] sm:$0xff]   ;;  %v4351_v48 = vld [vmem:[%s5351_s9 + $0x248] sm:$0xff]  }
 0xd78   :  { %4018 = vmatprep.subr.bf16.mxu1 %v4307_v1  ;;  %4040 = vmatprep.subr.bf16.mxu0 %v4308_v3  ;;  %v2298_v2 = vpack.c.bf16 %v2282_v46, %v2266_v50  ;;  %v2273_v0 = vmax.f32 %v2170_v22, 0.0  ;;  %v4331_v1 = vld [vmem:[%s5351_s9 + $0x270] sm:$0xff]   ;;  %v4344_v30 = vld [vmem:[%s5351_s9 + $0x2d8] sm:$0xff]   ;;  %v1710_v44 = vrot.slane %v5066_v31, %v1677_v56  ;;  %v4353_v46 = vld [vmem:[%s5351_s9 + $0x208] sm:$0xff]  }
 0xd79   :  { %v2287_v52 = vmax.f32 %v2131_v43, 0.0  ;;  %v2289_v60 = vmax.f32 %v2174_v45, 0.0  ;;  %v2300_v63 = vpack.c.bf16 %v2284_v49, %v2268_v59  ;;  %v4346_v35 = vld [vmem:[%s5351_s9 + $0x298] sm:$0xff]   ;;  %v4352_v43 = vld [vmem:[%s5351_s9 + $0x2c8] sm:$0xff]   ;;  %v1718_v45 = vrot.slane %v5066_v31, %v1685_v57  ;;  %v4355_v57 = vld [vmem:[%s5351_s9 + $0x240] sm:$0xff]  }
 0xd7a   :  { %v2129_v47 = vadd.f32 %v5041_v24, %v1710_v44  ;;  %v4354_v56 = vld [vmem:[%s5351_s9 + $0x288] sm:$0xff]   ;;  %v1738_v24 = vrot.slane %v5066_v31, %v1705_v4  ;;  %v2125_v22 = vadd.f32 %v5011_v7, %v1710_v44  ;;  %v4358_v4 = vld [vmem:[%s5351_s9 + $0x280] sm:$0xff]   ;;  %v4359_v7 = vld [vmem:[%s5351_s9 + $0x378] sm:$0xff]  }
 0xd7b   :  { %4019 = vmatpush3.bf16.msra.mxu1 %v4309_v8  ;;  %4041 = vmatpush3.bf16.msra.mxu0 %v4310_v12  ;;  %v2303_v3 = vpack.c.bf16 %v2287_v52, %v2271_v61  ;;  %v4332_v8 = vld [vmem:[%s5351_s9 + $0x2f0] sm:$0xff]   ;;  %v2305_v12 = vpack.c.bf16 %v2289_v60, %v2273_v0  ;;  %v2172_v49 = vadd.f32 %v5046_v25, %v1718_v45  ;;  %v4357_v25 = vld [vmem:[%s5351_s9 + $0x200] sm:$0xff]  }
 0xd7c   :  { %4020 = vmatprep.subr.bf16.mxu1 %v4311_v13  ;;  %4042 = vmatprep.subr.bf16.mxu0 %v4312_v14  ;;  %v4333_v13 = vld [vmem:[%s5351_s9 + $0x230] sm:$0xff]   ;;  %v2168_v50 = vadd.f32 %v5016_v9, %v1718_v45  ;;  %v2286_v59 = vmax.f32 %v2129_v47, 0.0  ;;  %v2270_v61 = vmax.f32 %v2125_v22, 0.0  ;;  %v1726_v47 = vrot.slane %v5066_v31, %v1693_v18  ;;  %v4387_v18 = vld [vmem:[%s5351_s9 + $0x340] sm:$0xff]  }
 0xd7d   :  { %v4334_v14 = vld [vmem:[%s5351_s9 + $0x2b0] sm:$0xff]  }
 0xd7e   :  { %v4381_v44 = vld [vmem:[%s5351_s9 + $0x310] sm:$0xff]  }
 0xd7f   :  { %4021 = vmatpush3.bf16.msra.mxu1 %v4313_v10  ;;  %4043 = vmatpush3.bf16.msra.mxu0 %v4314_v17  ;;  %v4336_v10 = vld [vmem:[%s5351_s9 + $0x2e8] sm:$0xff]   ;;  %v4382_v45 = vld [vmem:[%s5351_s9 + $0x390] sm:$0xff]  }
 0xd80   :  { %4022 = vmatprep.subr.bf16.mxu1 %v4315_v19  ;;  %4044 = vmatprep.subr.bf16.mxu0 %v4316_v20  ;;  %v4338_v17 = vld [vmem:[%s5351_s9 + $0x2a8] sm:$0xff]   ;;  %v4339_v19 = vld [vmem:[%s5351_s9 + $0x260] sm:$0xff]  }
 0xd81   :  { %v4340_v20 = vld [vmem:[%s5351_s9 + $0x2e0] sm:$0xff]  }
 0xd83   :  { %4023 = vmatpush3.bf16.msra.mxu1 %v4317_v11  ;;  %4045 = vmatpush3.bf16.msra.mxu0 %v4318_v26  ;;  %v5138_v11 = vpop.f32.mrf.mxu1  ;;  %v4341_v26 = vld [vmem:[%s5351_s9 + $0x220] sm:$0xff]  }
 0xd84   :  { %4024 = vmatprep.subr.bf16.mxu1 %v4319_v27  ;;  %4046 = vmatprep.subr.bf16.mxu0 %v4320_v28  ;;  %v5143_v27 = vpop.f32.mrf.mxu0  ;;  %v4342_v28 = vld [vmem:[%s5351_s9 + $0x2a0] sm:$0xff]  }
 0xd85   :  { %v2212_v32 = vpop.f32.mrf.mxu1 }
 0xd86   :  { %v2255_v34 = vpop.f32.mrf.mxu0 }
 0xd87   :  { %4025 = vmatpush3.bf16.msra.mxu1 %v4321_v33  ;;  %4047 = vmatpush3.bf16.msra.mxu0 %v4322_v58  ;;  %v4345_v33 = vld [vmem:[%s5351_s9 + $0x218] sm:$0xff]   ;;  %v4348_v58 = vld [vmem:[%s5351_s9 + $0x2d0] sm:$0xff]   ;;  %v2256_v9 = vadd.f32 %v2255_v34, %v1738_v24  ;;  %v4373_v34 = vld [vmem:[%s5351_s9 + $0x320] sm:$0xff]  }
 0xd88   :  { %4026 = vmatprep.subr.bf16.mxu1 %v4323_v39  ;;  %4048 = vmatprep.subr.bf16.mxu0 %v4324_v54  ;;  %v5166_v39 = vpop.f32.mrf.mxu1  ;;  %v5171_v37 = vpop.f32.mrf.mxu0  ;;  %v4350_v54 = vld [vmem:[%s5351_s9 + $0x290] sm:$0xff]  }
 0xd8b   :  { %4027 = vmatpush3.bf16.msra.mxu1 %v4325_v38  ;;  %4049 = vmatpush3.bf16.msra.mxu0 %v4326_v55  ;;  %v2216_v38 = vpop.f32.mrf.mxu1  ;;  %v1730_v55 = vrot.slane %v5066_v31, %v1697_v6  ;;  %v4356_v6 = vld [vmem:[%s5351_s9 + $0x2c0] sm:$0xff]  }
 0xd8c   :  { %4056 = vmatprep.subr.bf16.mxu1 %v4327_v21  ;;  %4078 = vmatprep.subr.bf16.mxu0 %v4328_v51  ;;  %v2259_v21 = vpop.f32.mrf.mxu0 }
 0xd8d   :  { %v2217_v51 = vadd.f32 %v2216_v38, %v1730_v55  ;;  %v2260_v52 = vadd.f32 %v2259_v21, %v1738_v24  ;;  %v2213_v60 = vadd.f32 %v2212_v32, %v1730_v55  ;;  %v4371_v32 = vld [vmem:[%s5351_s9 + $0x360] sm:$0xff]   ;;  %v4383_v38 = vld [vmem:[%s5351_s9 + $0x348] sm:$0xff]   ;;  %v1734_v55 = vrot.slane %v5066_v31, %v1701_v23 }
 0xd8e   :  { %3456 = vmatmul.mubr.bf16.vlgmr.msra.gmra.mxu1 %v2298_v2  ;;  %3497 = vmatmul.mubr.bf16.vlgmr.msra.gmra.mxu0 %v2300_v63  ;;  %v4360_v2 = vld [vmem:[%s5351_s9 + $0x3f8] sm:$0xff]   ;;  %v2272_v63 = vmax.f32 %v2168_v50, 0.0  ;;  %v4385_v21 = vld [vmem:[%s5351_s9 + $0x308] sm:$0xff]   ;;  %v4388_v23 = vld [vmem:[%s5351_s9 + $0x3c0] sm:$0xff]   ;;  %v2211_v31 = vadd.f32 %v5138_v11, %v1726_v47 }
 0xd8f   :  { %4057 = vmatpush3.bf16.msra.mxu1 %v4329_v5  ;;  %3537 = vmatprep.mubr.bf16.mxu1 %v2303_v3  ;;  %v2288_v5 = vmax.f32 %v2172_v49, 0.0  ;;  %v2293_v0 = vmax.f32 %v2260_v52, 0.0  ;;  %v2302_v3 = vpack.c.bf16 %v2286_v59, %v2270_v61  ;;  %v2258_v53 = vadd.f32 %v5171_v37, %v1734_v55  ;;  %v4389_v49 = vld [vmem:[%s5351_s9 + $0x300] sm:$0xff]  }
 0xd90   :  { %4079 = vmatpush3.bf16.msra.mxu0 %v4330_v62  ;;  %3578 = vmatprep.mubr.bf16.mxu0 %v2305_v12  ;;  %v2291_v62 = vmax.f32 %v2217_v51, 0.0  ;;  %v4362_v12 = vld [vmem:[%s5351_s9 + $0x3b8] sm:$0xff]   ;;  %v4390_v37 = vld [vmem:[%s5351_s9 + $0x380] sm:$0xff]   ;;  %v2274_v22 = vmax.f32 %v2211_v31, 0.0 }
 0xd91   :  { %4058 = vmatprep.subr.bf16.mxu1 %v4331_v1  ;;  %4080 = vmatprep.subr.bf16.mxu0 %v4332_v8  ;;  %v4361_v1 = vld [vmem:[%s5351_s9 + $0x338] sm:$0xff]   ;;  %v2275_v8 = vmax.f32 %v2213_v60, 0.0 }
 0xd93   :  { %4059 = vmatpush3.bf16.msra.mxu1 %v4333_v13  ;;  %v2304_v13 = vpack.c.bf16 %v2288_v5, %v2272_v63 }
 0xd94   :  { %4081 = vmatpush3.bf16.msra.mxu0 %v4334_v14  ;;  %4060 = vmatprep.subr.bf16.mxu1 %v4335_v15  ;;  %v2277_v14 = vmax.f32 %v2256_v9, 0.0  ;;  %v4363_v15 = vld [vmem:[%s5351_s9 + $0x370] sm:$0xff]  }
 0xd95   :  { %4082 = vmatprep.subr.bf16.mxu0 %v4336_v10  ;;  %v2307_v10 = vpack.c.bf16 %v2291_v62, %v2275_v8  ;;  %v3793_v8 = vld [vmem:[%s5355_s10] ss:$0 sm:$0xff] }
 0xd97   :  { %4061 = vmatpush3.bf16.msra.mxu1 %v4337_v16  ;;  %v4364_v16 = vld [vmem:[%s5351_s9 + $0x3f0] sm:$0xff]  }
 0xd98   :  { %4083 = vmatpush3.bf16.msra.mxu0 %v4338_v17  ;;  %4062 = vmatprep.subr.bf16.mxu1 %v4339_v19  ;;  %v2309_v17 = vpack.c.bf16 %v2293_v0, %v2277_v14  ;;  %v4365_v19 = vld [vmem:[%s5351_s9 + $0x330] sm:$0xff]  }
 0xd99   :  { %4084 = vmatprep.subr.bf16.mxu0 %v4340_v20  ;;  %v4366_v20 = vld [vmem:[%s5351_s9 + $0x3b0] sm:$0xff]  }
 0xd9b   :  { %4063 = vmatpush3.bf16.msra.mxu1 %v4341_v26  ;;  %v4367_v26 = vld [vmem:[%s5351_s9 + $0x368] sm:$0xff]  }
 0xd9c   :  { %4085 = vmatpush3.bf16.msra.mxu0 %v4342_v28  ;;  %4064 = vmatprep.subr.bf16.mxu1 %v4343_v29  ;;  %v4368_v28 = vld [vmem:[%s5351_s9 + $0x3e8] sm:$0xff]  }
 0xd9d   :  { %4086 = vmatprep.subr.bf16.mxu0 %v4344_v30  ;;  %v4369_v29 = vld [vmem:[%s5351_s9 + $0x328] sm:$0xff]  }
 0xd9e   :  { %v4370_v30 = vld [vmem:[%s5351_s9 + $0x3a8] sm:$0xff]  }
 0xd9f   :  { %4065 = vmatpush3.bf16.msra.mxu1 %v4345_v33  ;;  %v4372_v33 = vld [vmem:[%s5351_s9 + $0x3e0] sm:$0xff]  }
 0xda0   :  { %4087 = vmatpush3.bf16.msra.mxu0 %v4346_v35  ;;  %4066 = vmatprep.subr.bf16.mxu1 %v4347_v36  ;;  %v4374_v35 = vld [vmem:[%s5351_s9 + $0x3a0] sm:$0xff]   ;;  %v4375_v36 = vld [vmem:[%s5351_s9 + $0x358] sm:$0xff]  }
 0xda1   :  { %4088 = vmatprep.subr.bf16.mxu0 %v4348_v58  ;;  %v4376_v58 = vld [vmem:[%s5351_s9 + $0x3d8] sm:$0xff]  }
 0xda3   :  { %4067 = vmatpush3.bf16.msra.mxu1 %v4349_v40  ;;  %v4377_v40 = vld [vmem:[%s5351_s9 + $0x318] sm:$0xff]  }
 0xda4   :  { %4089 = vmatpush3.bf16.msra.mxu0 %v4350_v54  ;;  %4068 = vmatprep.subr.bf16.mxu1 %v4351_v48  ;;  %v4378_v54 = vld [vmem:[%s5351_s9 + $0x398] sm:$0xff]   ;;  %v4379_v48 = vld [vmem:[%s5351_s9 + $0x350] sm:$0xff]  }
 0xda5   :  { %4090 = vmatprep.subr.bf16.mxu0 %v4352_v43  ;;  %v4380_v43 = vld [vmem:[%s5351_s9 + $0x3d0] sm:$0xff]  }
 0xda7   :  { %4069 = vmatpush3.bf16.msra.mxu1 %v4353_v46  ;;  %v4384_v46 = vld [vmem:[%s5351_s9 + $0x3c8] sm:$0xff]  }
 0xda8   :  { %4091 = vmatpush3.bf16.msra.mxu0 %v4354_v56  ;;  %4070 = vmatprep.subr.bf16.mxu1 %v4355_v57  ;;  %v2215_v56 = vadd.f32 %v5166_v39, %v1726_v47  ;;  %v4386_v57 = vld [vmem:[%s5351_s9 + $0x388] sm:$0xff]   ;;  %v2254_v39 = vadd.f32 %v5143_v27, %v1734_v55 }
 0xda9   :  { %4092 = vmatprep.subr.bf16.mxu0 %v4356_v6  ;;  %v2292_v6 = vmax.f32 %v2258_v53, 0.0 }
 0xdaa   :  { %v2290_v24 = vmax.f32 %v2215_v56, 0.0  ;;  %v2276_v51 = vmax.f32 %v2254_v39, 0.0 }
 0xdab   :  { %4071 = vmatpush3.bf16.msra.mxu1 %v4357_v25 }
 0xdac   :  { %4093 = vmatpush3.bf16.msra.mxu0 %v4358_v4  ;;  %4100 = vmatprep.subr.bf16.mxu1 %v4359_v7  ;;  %v2306_v11 = vpack.c.bf16 %v2290_v24, %v2274_v22  ;;  %v2308_v27 = vpack.c.bf16 %v2292_v6, %v2276_v51 }
 0xdad   :  { %4122 = vmatprep.subr.bf16.mxu0 %v4360_v2 }
 0xdae   :  { %3538 = vmatmul.mubr.bf16.vlgmr.msra.gmra.mxu1 %v2302_v3 }
 0xdaf   :  { %3579 = vmatmul.mubr.bf16.vlgmr.msra.gmra.mxu0 %v2304_v13  ;;  %4101 = vmatpush3.bf16.msra.mxu1 %v4361_v1 }
 0xdb0   :  { %3619 = vmatprep.mubr.bf16.mxu1 %v2307_v10  ;;  %4123 = vmatpush3.bf16.msra.mxu0 %v4362_v12 }
 0xdb1   :  { %3660 = vmatprep.mubr.bf16.mxu0 %v2309_v17  ;;  %4102 = vmatprep.subr.bf16.mxu1 %v4363_v15 }
 0xdb2   :  { %4124 = vmatprep.subr.bf16.mxu0 %v4364_v16 }
 0xdb3   :  { %4103 = vmatpush3.bf16.msra.mxu1 %v4365_v19 }
 0xdb4   :  { %4125 = vmatpush3.bf16.msra.mxu0 %v4366_v20  ;;  %4104 = vmatprep.subr.bf16.mxu1 %v4367_v26 }
 0xdb5   :  { %4126 = vmatprep.subr.bf16.mxu0 %v4368_v28 }
 0xdb7   :  { %4105 = vmatpush3.bf16.msra.mxu1 %v4369_v29 }
 0xdb8   :  { %4127 = vmatpush3.bf16.msra.mxu0 %v4370_v30  ;;  %4106 = vmatprep.subr.bf16.mxu1 %v4371_v32 }
 0xdb9   :  { %4128 = vmatprep.subr.bf16.mxu0 %v4372_v33 }
 0xdbb   :  { %4107 = vmatpush3.bf16.msra.mxu1 %v4373_v34 }
 0xdbc   :  { %4129 = vmatpush3.bf16.msra.mxu0 %v4374_v35  ;;  %4108 = vmatprep.subr.bf16.mxu1 %v4375_v36 }
 0xdbd   :  { %4130 = vmatprep.subr.bf16.mxu0 %v4376_v58 }
 0xdbf   :  { %4109 = vmatpush3.bf16.msra.mxu1 %v4377_v40 }
 0xdc0   :  { %4131 = vmatpush3.bf16.msra.mxu0 %v4378_v54  ;;  %4110 = vmatprep.subr.bf16.mxu1 %v4379_v48 }
 0xdc1   :  { %4132 = vmatprep.subr.bf16.mxu0 %v4380_v43 }
 0xdc3   :  { %4111 = vmatpush3.bf16.msra.mxu1 %v4381_v44 }
 0xdc4   :  { %4133 = vmatpush3.bf16.msra.mxu0 %v4382_v45  ;;  %4112 = vmatprep.subr.bf16.mxu1 %v4383_v38 }
 0xdc5   :  { %4134 = vmatprep.subr.bf16.mxu0 %v4384_v46 }
 0xdc7   :  { %4113 = vmatpush3.bf16.msra.mxu1 %v4385_v21 }
 0xdc8   :  { %4135 = vmatpush3.bf16.msra.mxu0 %v4386_v57  ;;  %4114 = vmatprep.subr.bf16.mxu1 %v4387_v18 }
 0xdc9   :  { %4136 = vmatprep.subr.bf16.mxu0 %v4388_v23 }
 0xdcb   :  { %4115 = vmatpush3.bf16.msra.mxu1 %v4389_v49 }
 0xdcc   :  { %4137 = vmatpush3.bf16.msra.mxu0 %v4390_v37 }
 0xdce   :  { %3620 = vmatmul.mubr.bf16.vlgmr.msra.gmra.mxu1 %v2306_v11 }
 0xdcf   :  { %3661 = vmatmul.mubr.bf16.vlgmr.msra.gmra.mxu0 %v2308_v27 }
 0xe2e   :  { %v3984_v50 = vpop.f32.mrf.mxu1  ;;  %v4006_v52 = vpop.f32.mrf.mxu0 }
 0xe30   :  { %v3985_v25 = vpop.f32.mrf.mxu1  ;;  %v4007_v59 = vpop.f32.mrf.mxu0 }
 0xe31   :  { %v3986_v3 = vadd.f32 %v3985_v25, %v3984_v50  ;;  %v4008_v17 = vadd.f32 %v4007_v59, %v4006_v52 }
 0xe32   :  { %v3987_v60 = vpop.f32.mrf.mxu1  ;;  %v4009_v4 = vpop.f32.mrf.mxu0 }
 0xe33   :  { %v3376_v14 = vadd.f32 %v3986_v3, %v3793_v8 }
 0xe34   :  { %v3988_v7 = vpop.f32.mrf.mxu1  ;;  %v4010_v9 = vpop.f32.mrf.mxu0 }
 0xe35   :  { %v3989_v15 = vadd.f32 %v3988_v7, %v3987_v60  ;;  %v3417_v20 = vadd.f32 %v4008_v17, %v3376_v14  ;;  %v4011_v30 = vadd.f32 %v4010_v9, %v4009_v4 }
 0xe37   :  { %v3379_v26 = vadd.f32 %v3989_v15, %v3793_v8 }
 0xe39   :  { %v3420_v34 = vadd.f32 %v4011_v30, %v3379_v26 }
 0xe4e   :  { %v4028_v5 = vpop.f32.mrf.mxu1  ;;  %v4050_v2 = vpop.f32.mrf.mxu0 }
 0xe50   :  { %v4029_v61 = vpop.f32.mrf.mxu1  ;;  %v4051_v62 = vpop.f32.mrf.mxu0 }
 0xe51   :  { %v4030_v19 = vadd.f32 %v4029_v61, %v4028_v5  ;;  %v4052_v35 = vadd.f32 %v4051_v62, %v4050_v2 }
 0xe52   :  { %v4031_v63 = vpop.f32.mrf.mxu1  ;;  %v4053_v0 = vpop.f32.mrf.mxu0 }
 0xe53   :  { %v3458_v32 = vadd.f32 %v4030_v19, %v3417_v20  ;;  %v3923_v19 = vld [vmem:[%s5357_s12] ss:$0 sm:$0xff] }
 0xe54   :  { %v4032_v1 = vpop.f32.mrf.mxu1  ;;  %v4054_v13 = vpop.f32.mrf.mxu0 }
 0xe55   :  { %v4033_v33 = vadd.f32 %v4032_v1, %v4031_v63  ;;  %v3499_v54 = vadd.f32 %v4052_v35, %v3458_v32  ;;  %v4055_v43 = vadd.f32 %v4054_v13, %v4053_v0 }
 0xe57   :  { %v3461_v48 = vadd.f32 %v4033_v33, %v3420_v34 }
 0xe59   :  { %v3502_v47 = vadd.f32 %v4055_v43, %v3461_v48 }
 0xe6e   :  { %v4072_v12 = vpop.f32.mrf.mxu1 }
 0xe6f   :  { %v4094_v10 = vpop.f32.mrf.mxu0 }
 0xe70   :  { %v4073_v16 = vpop.f32.mrf.mxu1 }
 0xe71   :  { %v4095_v28 = vpop.f32.mrf.mxu0  ;;  %v4074_v36 = vadd.f32 %v4073_v16, %v4072_v12  ;;  %v3922_v16 = vld [vmem:[%s5356_s11] ss:$0 sm:$0xff] }
 0xe72   :  { %v4075_v29 = vpop.f32.mrf.mxu1  ;;  %v4096_v55 = vadd.f32 %v4095_v28, %v4094_v10 }
 0xe73   :  { %v4097_v58 = vpop.f32.mrf.mxu0  ;;  %v3540_v44 = vadd.f32 %v4074_v36, %v3499_v54 }
 0xe74   :  { %v4076_v40 = vpop.f32.mrf.mxu1 }
 0xe75   :  { %v4077_v45 = vadd.f32 %v4076_v40, %v4075_v29  ;;  %v4098_v38 = vpop.f32.mrf.mxu0  ;;  %v3581_v57 = vadd.f32 %v4096_v55, %v3540_v44 }
 0xe76   :  { %v4099_v39 = vadd.f32 %v4098_v38, %v4097_v58 }
 0xe77   :  { %v3543_v18 = vadd.f32 %v4077_v45, %v3502_v47 }
 0xe79   :  { %v3584_v22 = vadd.f32 %v4099_v39, %v3543_v18 }
 0xe8e   :  { %v4116_v46 = vpop.f32.mrf.mxu1 }
 0xe8f   :  { %v4138_v21 = vpop.f32.mrf.mxu0 }
 0xe90   :  { %v4117_v56 = vpop.f32.mrf.mxu1 }
 0xe91   :  { %v4118_v53 = vadd.f32 %v4117_v56, %v4116_v46  ;;  %v4139_v23 = vpop.f32.mrf.mxu0 }
 0xe92   :  { %v4119_v31 = vpop.f32.mrf.mxu1  ;;  %v4140_v24 = vadd.f32 %v4139_v23, %v4138_v21 }
 0xe93   :  { %v3622_v49 = vadd.f32 %v4118_v53, %v3581_v57  ;;  %v4141_v37 = vpop.f32.mrf.mxu0 }
 0xe94   :  { %v4120_v6 = vpop.f32.mrf.mxu1 }
 0xe95   :  { %v3663_v51 = vadd.f32 %v4140_v24, %v3622_v49  ;;  %v4121_v11 = vadd.f32 %v4120_v6, %v4119_v31  ;;  %v4142_v27 = vpop.f32.mrf.mxu0 }
 0xe96   :  { %v4143_v52 = vadd.f32 %v4142_v27, %v4141_v37 }
 0xe97   :  { %v3625_v50 = vadd.f32 %v4121_v11, %v3584_v22  ;;  %v3669_v25 = vadd.f32 %v3663_v51, %v4756_v41 }
 0xe99   :  { %v3666_v59 = vadd.f32 %v4143_v52, %v3625_v50  ;;  %v3673_v60 = vsel %vm58_vm0, %v3669_v25, 0.0 }
 0xe9a   :  { %3674 = vadd.xlane.f32.xlu1 %v3673_v60 }
 0xe9b   :  { %v3670_v4 = vadd.f32 %v3666_v59, %v4758_v42 }
 0xe9d   :  { %v3676_v7 = vsel %vm58_vm0, %v3670_v4, 0.0 }
 0xe9e   :  { %3677 = vadd.xlane.f32.xlu0 %v3676_v7 }
 0xf23   :  { %v3675_v5 = vpop.xlane.xlu1 %3674 }
 0xf24   :  { %v3679_v9 = vmul.f32 0.03125, %v3675_v5 }
 0xf26   :  { %v3681_v2 = vsub.f32 %v3669_v25, %v3679_v9 }
 0xf27   :  { %v3678_v61 = vpop.xlane.xlu0 %3677 }
 0xf28   :  { %v3680_v62 = vmul.f32 0.03125, %v3678_v61  ;;  %v3683_v63 = vmul.f32 %v3681_v2, %v3681_v2 }
 0xf2a   :  { %v3682_v0 = vsub.f32 %v3670_v4, %v3680_v62  ;;  %v3685_v1 = vsel %vm58_vm0, %v3683_v63, 0.0 }
 0xf2b   :  { %3686 = vadd.xlane.f32.xlu1 %v3685_v1 }
 0xf2c   :  { %v3684_v41 = vmul.f32 %v3682_v0, %v3682_v0 }
 0xf2e   :  { %v3688_v3 = vsel %vm58_vm0, %v3684_v41, 0.0 }
 0xf2f   :  { %3689 = vadd.xlane.f32.xlu0 %v3688_v3 }
 0xfb4   :  { %v3687_v8 = vpop.xlane.xlu1 %3686 }
 0xfb5   :  { %v3691_v12 = vmul.f32 0.03125, %v3687_v8 }
 0xfb7   :  { %v3693_v42 = vadd.f32 1e-05, %v3691_v12 }
 0xfb8   :  { %v3690_v13 = vpop.xlane.xlu0 %3689 }
 0xfb9   :  { %4427 = vrsqrt.f32 %v3693_v42  ;;  %v3692_v14 = vmul.f32 0.03125, %v3690_v13 }
 0xfbb   :  { %v3694_v15 = vadd.f32 1e-05, %v3692_v14 }
 0xfbd   :  { %4429 = vrsqrt.f32 %v3694_v15 }
 0xfc6   :  { %v4428_v10 = vpop.eup %4427 }
 0xfc7   :  { %v3697_v17 = vmul.f32 %v4428_v10, %v3681_v2 }
 0xfc9   :  { %v3705_v20 = vmul.f32 %v3922_v16, %v3697_v17 }
 0xfca   :  { %v4430_v26 = vpop.eup %4429 }
 0xfcb   :  { %v3713_v28 = vadd.f32 %v3923_v19, %v3705_v20  ;;  %v3698_v29 = vmul.f32 %v4430_v26, %v3682_v0 }
 0xfcd   :  { %3715 = vst.msk [vmem:[%s5358_s13] sm:$0xff] %vm58_vm0, %v3713_v28  ;;  %v3706_v30 = vmul.f32 %v3922_v16, %v3698_v29 }
 0xfcf   :  { %v3714_v32 = vadd.f32 %v3923_v19, %v3706_v30 }
 0xfd1   :  { %3716 = vst.msk [vmem:[%s5358_s13 + $0x8] sm:$0xff] %vm58_vm0, %v3714_v32 }

// kernel: simple_transformer_forward.13
= control target key start
LH: loop header
LB: loop body
LE: loop exit
PB: predicated region body
PF: predicated region fallthrough
CT: control target
= control target key end

     0   :  { %vm81_vm0 = vcmask 261120   ;;  %v6371_v6 = vmov 0.0   ;;  %vm6372_vm1 = vmmov 0   ;;  %vm166_vm2 = vcmask 64512   ;;  %s6374_s24 = smov 64   ;;  %s6376_s25 = smov 120   ;;  %s7573_s2 = inlined_call_operand.vmem [shape: f32[32,96], index: 2, kind: input, shape index: {}]   ;;  %s7574_s0 = inlined_call_operand.vmem [shape: f32[2,8,32], index: 0, kind: input, shape index: {}]   ;;  %s7575_s3 = inlined_call_operand.vmem [shape: f32[1,96], index: 3, kind: input, shape index: {}]   ;;  %s7576_s4 = inlined_call_operand.vmem [shape: f32[32,32], index: 4, kind: input, shape index: {}]   ;;  %s7577_s5 = inlined_call_operand.vmem [shape: f32[1,32], index: 5, kind: input, shape index: {}]   ;;  %s7578_s8 = inlined_call_operand.vmem [shape: f32[32,96], index: 8, kind: input, shape index: {}]   ;;  %s7579_s1 = inlined_call_operand.vmem [shape: f32[2,8,32], index: 1, kind: input, shape index: {}]   ;;  %s7580_s9 = inlined_call_operand.vmem [shape: f32[1,96], index: 9, kind: input, shape index: {}]   ;;  %s7581_s6 = inlined_call_operand.vmem [shape: f32[1,32], index: 6, kind: input, shape index: {}]   ;;  %s7582_s7 = inlined_call_operand.vmem [shape: f32[1,32], index: 7, kind: input, shape index: {}]   ;;  %s7583_s10 = inlined_call_operand.vmem [shape: f32[32,32], index: 10, kind: input, shape index: {}]   ;;  %s7584_s11 = inlined_call_operand.vmem [shape: f32[1,32], index: 11, kind: input, shape index: {}]   ;;  %s7585_s14 = inlined_call_operand.vmem [shape: bf16[32,2048], index: 14, kind: input, shape index: {}]   ;;  %s7586_s16 = inlined_call_operand.vmem [shape: bf16[2048,32], index: 16, kind: input, shape index: {}]   ;;  %s7587_s12 = inlined_call_operand.vmem [shape: f32[1,32], index: 12, kind: input, shape index: {}]   ;;  %s7588_s13 = inlined_call_operand.vmem [shape: f32[1,32], index: 13, kind: input, shape index: {}]   ;;  %s7589_s15 = inlined_call_operand.vmem [shape: f32[1,2048], index: 15, kind: input, shape index: {}]   ;;  %s7590_s17 = inlined_call_operand.vmem [shape: f32[1,32], index: 17, kind: input, shape index: {}]   ;;  %s7591_s18 = inlined_call_operand.vmem [shape: f32[1,32], index: 18, kind: input, shape index: {}]   ;;  %s7592_s19 = inlined_call_operand.vmem [shape: f32[1,32], index: 19, kind: input, shape index: {}]   ;;  %s7593_s20 = inlined_call_operand.vmem [shape: f32[2,8,32], index: 20, kind: output, shape index: {}]  }
   0x1   :  { %7603 = sst [smem:[#allocation2_spill]] %s7573_s2  ;;  %5946 = vmatprep.subr.mxu1 %v6371_v6  ;;  %5948 = vmatprep.mubr.msk.f32.mxu1 %vm6372_vm1, %v6371_v6  ;;  %s6379_s27 = smov 80   ;;  %vm1519_vm3 = vcmask 195584   ;;  %vm1516_vm4 = vcmask 130048  }
   0x2   :  { %7604 = sst [smem:[#allocation3_spill]] %s7574_s0  ;;  %s6380_s28 = smov 48  }
   0x3   :  { %7605 = sst [smem:[#allocation4_spill]] %s7575_s3  ;;  %s6375_s3 = smov 88  }
   0x4   :  { %7606 = sst [smem:[#allocation5_spill]] %s7576_s4  ;;  %s6377_s4 = smov 56  }
   0x5   :  { %7607 = sst [smem:[#allocation6_spill]] %s7577_s5  ;;  %s7601_s5 = smov 72  }
   0x6   :  { %s7608_s23 = sld [smem:[#allocation2_spill]]  ;;  %s6382_s29 = smov 104  }
   0x7   :  { %s7609_s26 = sld [smem:[#allocation3_spill]]  ;;  %s6383_s30 = smov 40  }
   0x8   :  { %s7610_s22 = sld [smem:[#allocation4_spill]]  ;;  %s7599_s2 = smov 8  }
   0x9   :  { %s7597_s21 = smov 16   ;;  %s6386_s0 = smov 24  }
   0xc   :  { %v73_v0 = vld [vmem:[%s7608_s23 + $0x18] sm:$0xff]  ;;  %v72_v1 = vld [vmem:[%s7608_s23 + $0x10] sm:$0xff]  ;;  %v71_v3 = vld [vmem:[%s7608_s23 + $0x8] sm:$0xff] }
   0xd   :  { %5935 = vmatprep.subr.mxu0 %v73_v0  ;;  %v6502_v2 = vld [vmem:[%s7609_s26] sm:$0xff]  ;;  %v6515_v5 = vld [vmem:[%s7609_s26 + $0x8] sm:$0xff]  ;;  %s6378_s26 = smov 112  }
   0xe   :  { %5936 = vmatpush3.msra.mxu0 %v73_v0  ;;  %5943 = vmatprep.mubr.msk.f32.mxu0 %vm81_vm0, %v6502_v2  ;;  %v70_v4 = vld [vmem:[%s7608_s23] sm:$0xff]  ;;  %s6373_s23 = smov 96  }
   0xf   :  { %5937 = vmatprep.subr.mxu0 %v72_v1  ;;  %v5428_v8 = vld [vmem:[%s7610_s22] ss:$0 sm:$0xff] }
  0x10   :  { %5938 = vmatpush3.msra.mxu0 %v72_v1 }
  0x11   :  { %5939 = vmatprep.subr.mxu0 %v71_v3 }
  0x12   :  { %5940 = vmatpush3.msra.mxu0 %v71_v3 }
  0x13   :  { %5941 = vmatprep.subr.mxu0 %v70_v4 }
  0x14   :  { %5942 = vmatpush3.msra.mxu0 %v70_v4 }
  0x15   :  { %5944 = vmatmul.mubr.msk.f32.vlgmr.msra.gmra.mxu0 %vm81_vm0, %v6515_v5  ;;  %5966 = vmatprep.subr.mxu0 %v6371_v6 }
  0x16   :  { %5968 = vmatprep.mubr.msk.f32.mxu0 %vm6372_vm1, %v6371_v6 }
  0xd5   :  { %v5945_v7 = vpop.f32.mrf.mxu0 }
  0xd6   :  { %v6532_v11 = vadd.f32 %v5945_v7, %v5428_v8 }
  0xd7   :  { %v154_v9 = vpop.f32.mrf.mxu0 }
  0xd8   :  { %v6528_v10 = vadd.f32 %v5428_v8, %v154_v9 }
  0xda   :  { %164 = vrot.lane.b32.xlu0 %v6528_v10, %s6373_s23 }
  0xde   :  { %242 = vrot.lane.b32.xlu0 %v6532_v11, %s6373_s23 }
 0x14c   :  { %v165_v12 = vpop.permute.xlu0 %164 }
 0x14d   :  { %5947 = vmatpush3.xpose.msk.msra.mxu1 %vm166_vm2, %v165_v12 }
 0x14e   :  { %5951 = vmatprep.subr.mxu1 %v6371_v6 }
 0x150   :  { %5949 = vmatmul.mubr.msk.f32.vlgmr.msra.gmra.mxu1 %vm166_vm2, %v6528_v10  ;;  %v243_v13 = vpop.permute.xlu0 %242 }
 0x151   :  { %5952 = vmatpush3.xpose.msk.msra.mxu1 %vm166_vm2, %v243_v13  ;;  %5953 = vmatprep.mubr.msk.f32.mxu1 %vm6372_vm1, %v6371_v6 }
 0x152   :  { %5956 = vmatprep.subr.mxu1 %v6371_v6 }
 0x154   :  { %5954 = vmatmul.mubr.msk.f32.vlgmr.msra.gmra.mxu1 %vm166_vm2, %v6532_v11 }
 0x155   :  { %5958 = vmatprep.mubr.msk.f32.mxu1 %vm6372_vm1, %v6371_v6 }
 0x210   :  { %v237_v14 = vpop.f32.mrf.mxu1 }
 0x211   :  { %v318_v15 = vmul.f32 0.35355338, %v237_v14 }
 0x212   :  { %v5950_v16 = vpop.f32.mrf.mxu1 }
 0x213   :  { %v320_v17 = vsel %vm166_vm2, %v318_v15, -inf }
 0x214   :  { %321 = vmax.xlane.f32.xlu1 %v320_v17  ;;  %v314_v18 = vpop.f32.mrf.mxu1 }
 0x215   :  { %v319_v19 = vmul.f32 0.35355338, %v314_v18 }
 0x216   :  { %v5955_v20 = vpop.f32.mrf.mxu1 }
 0x217   :  { %v323_v21 = vsel %vm166_vm2, %v319_v19, -inf }
 0x218   :  { %324 = vmax.xlane.f32.xlu1 %v323_v21 }
 0x229   :  { %342 = vrot.lane.b32.xlu1 %v6528_v10, %s6374_s24 }
 0x22d   :  { %418 = vrot.lane.b32.xlu1 %v6532_v11, %s6374_s24  ;;  %s7611_s24 = sld [smem:[#allocation5_spill]] }
 0x231   :  { %496 = vrot.lane.b32.xlu1 %v6528_v10, %s6375_s3 }
 0x235   :  { %574 = vrot.lane.b32.xlu1 %v6532_v11, %s6375_s3 }
 0x29d   :  { %v322_v22 = vpop.xlane.xlu1 %321 }
 0x29e   :  { %v326_v23 = vsub.f32 %v318_v15, %v322_v22 }
 0x2a0   :  { %v328_v24 = vmul.f32 1.442695, %v326_v23 }
 0x2a1   :  { %v325_v25 = vpop.xlane.xlu1 %324 }
 0x2a2   :  { %6295 = vpow2.f32 %v328_v24  ;;  %v327_v26 = vsub.f32 %v319_v19, %v325_v25 }
 0x2a4   :  { %v330_v27 = vmul.f32 1.442695, %v327_v26 }
 0x2a5   :  { %v343_v28 = vpop.permute.xlu1 %342 }
 0x2a6   :  { %6297 = vpow2.f32 %v330_v27  ;;  %5957 = vmatpush3.msra.mxu1 %v343_v28 }
 0x2a7   :  { %5961 = vmatprep.subr.mxu1 %v6371_v6 }
 0x2a9   :  { %v419_v29 = vpop.permute.xlu1 %418 }
 0x2ad   :  { %v497_v30 = vpop.permute.xlu1 %496 }
 0x2ae   :  { %5967 = vmatpush3.xpose.msk.msra.mxu0 %vm166_vm2, %v497_v30 }
 0x2af   :  { %v6296_v31 = vpop.eup %6295  ;;  %5976 = vmatprep.subr.mxu0 %v6371_v6 }
 0x2b0   :  { %v332_v32 = vsel %vm166_vm2, %v6296_v31, 0.0 }
 0x2b1   :  { %333 = vadd.xlane.f32.xlu0 %v332_v32  ;;  %v575_v35 = vpop.permute.xlu1 %574 }
 0x2b3   :  { %v6298_v33 = vpop.eup %6297 }
 0x2b4   :  { %v335_v34 = vsel %vm166_vm2, %v6298_v33, 0.0 }
 0x2b5   :  { %336 = vadd.xlane.f32.xlu1 %v335_v34 }
 0x2c6   :  { %572 = vrot.lane.b32.xlu1 %v6532_v11, %s6376_s25 }
 0x2c7   :  { %494 = vrot.lane.b32.xlu0 %v6528_v10, %s6376_s25 }
 0x33a   :  { %v334_v36 = vpop.xlane.xlu0 %333 }
 0x33b   :  { %6299 = vrcp.f32 %v334_v36 }
 0x33e   :  { %v337_v37 = vpop.xlane.xlu1 %336  ;;  %v495_v38 = vpop.permute.xlu0 %494 }
 0x33f   :  { %6301 = vrcp.f32 %v337_v37  ;;  %5969 = vmatmul.mubr.msk.f32.vlgmr.msra.gmra.mxu0 %vm166_vm2, %v495_v38 }
 0x340   :  { %5978 = vmatprep.mubr.msk.f32.mxu0 %vm6372_vm1, %v6371_v6 }
 0x342   :  { %v573_v43 = vpop.permute.xlu1 %572 }
 0x348   :  { %v6300_v39 = vpop.eup %6299 }
 0x349   :  { %v340_v40 = vmul.f32 %v6300_v39, %v6296_v31 }
 0x34b   :  { %5959 = vmatmul.mubr.msk.f32.vlgmr.msra.gmra.mxu1 %vm166_vm2, %v340_v40 }
 0x34c   :  { %v6302_v41 = vpop.eup %6301  ;;  %5962 = vmatpush3.msra.mxu1 %v419_v29  ;;  %5963 = vmatprep.mubr.msk.f32.mxu1 %vm6372_vm1, %v6371_v6 }
 0x34d   :  { %5971 = vmatprep.subr.mxu1 %v6371_v6  ;;  %v341_v42 = vmul.f32 %v6302_v41, %v6298_v33 }
 0x34f   :  { %5964 = vmatmul.mubr.msk.f32.vlgmr.msra.gmra.mxu1 %vm166_vm2, %v341_v42 }
 0x350   :  { %5972 = vmatpush3.xpose.msk.msra.mxu1 %vm166_vm2, %v575_v35  ;;  %5973 = vmatprep.mubr.msk.f32.mxu1 %vm6372_vm1, %v6371_v6 }
 0x351   :  { %5981 = vmatprep.subr.mxu1 %v6371_v6 }
 0x353   :  { %5974 = vmatmul.mubr.msk.f32.vlgmr.msra.gmra.mxu1 %vm166_vm2, %v573_v43 }
 0x354   :  { %5983 = vmatprep.mubr.msk.f32.mxu1 %vm6372_vm1, %v6371_v6 }
 0x3ff   :  { %v568_v44 = vpop.f32.mrf.mxu0 }
 0x400   :  { %v650_v45 = vmul.f32 0.35355338, %v568_v44 }
 0x401   :  { %v5970_v46 = vpop.f32.mrf.mxu0 }
 0x402   :  { %v652_v47 = vsel %vm166_vm2, %v650_v45, -inf }
 0x403   :  { %653 = vmax.xlane.f32.xlu1 %v652_v47 }
 0x40b   :  { %v6581_v48 = vpop.f32.mrf.mxu1 }
 0x40d   :  { %v5960_v49 = vpop.f32.mrf.mxu1 }
 0x40f   :  { %v6583_v50 = vpop.f32.mrf.mxu1 }
 0x411   :  { %v5965_v51 = vpop.f32.mrf.mxu1 }
 0x413   :  { %v646_v52 = vpop.f32.mrf.mxu1 }
 0x414   :  { %v651_v53 = vmul.f32 0.35355338, %v646_v52 }
 0x415   :  { %v5975_v54 = vpop.f32.mrf.mxu1 }
 0x416   :  { %v655_v55 = vsel %vm166_vm2, %v651_v53, -inf }
 0x417   :  { %656 = vmax.xlane.f32.xlu0 %v655_v55 }
 0x42d   :  { %750 = vrot.lane.b32.xlu0 %v6532_v11, %s6377_s4 }
 0x431   :  { %826 = vrot.lane.b32.xlu0 %v6528_v10, %s6378_s26 }
 0x48c   :  { %v654_v56 = vpop.xlane.xlu1 %653 }
 0x48d   :  { %v658_v57 = vsub.f32 %v650_v45, %v654_v56 }
 0x48f   :  { %v660_v58 = vmul.f32 1.442695, %v658_v57 }
 0x491   :  { %6303 = vpow2.f32 %v660_v58 }
 0x49e   :  { %v6304_v59 = vpop.eup %6303 }
 0x49f   :  { %v664_v60 = vsel %vm166_vm2, %v6304_v59, 0.0 }
 0x4a0   :  { %665 = vadd.xlane.f32.xlu1 %v664_v60  ;;  %v657_v61 = vpop.xlane.xlu0 %656 }
 0x4a1   :  { %v659_v63 = vsub.f32 %v651_v53, %v657_v61 }
 0x4a3   :  { %v662_v0 = vmul.f32 1.442695, %v659_v63 }
 0x4a4   :  { %v751_v62 = vpop.permute.xlu0 %750 }
 0x4a5   :  { %5982 = vmatpush3.msra.mxu1 %v751_v62  ;;  %6305 = vpow2.f32 %v662_v0 }
 0x4a6   :  { %5991 = vmatprep.subr.mxu1 %v6371_v6 }
 0x4a8   :  { %v827_v13 = vpop.permute.xlu0 %826 }
 0x4b1   :  { %674 = vrot.lane.b32.xlu1 %v6528_v10, %s6377_s4 }
 0x4b2   :  { %v6306_v1 = vpop.eup %6305 }
 0x4b3   :  { %v667_v3 = vsel %vm166_vm2, %v6306_v1, 0.0 }
 0x4b5   :  { %828 = vrot.lane.b32.xlu1 %v6528_v10, %s6379_s27 }
 0x4b9   :  { %906 = vrot.lane.b32.xlu1 %v6532_v11, %s6379_s27 }
 0x4dd   :  { %668 = vadd.xlane.f32.xlu1 %v667_v3 }
 0x4ee   :  { %904 = vrot.lane.b32.xlu1 %v6532_v11, %s6378_s26 }
 0x529   :  { %v666_v4 = vpop.xlane.xlu1 %665 }
 0x52a   :  { %6307 = vrcp.f32 %v666_v4 }
 0x52d   :  { %v675_v7 = vpop.permute.xlu1 %674 }
 0x52e   :  { %5977 = vmatpush3.msra.mxu0 %v675_v7 }
 0x52f   :  { %5986 = vmatprep.subr.mxu0 %v6371_v6 }
 0x531   :  { %v829_v12 = vpop.permute.xlu1 %828 }
 0x535   :  { %v907_v14 = vpop.permute.xlu1 %906 }
 0x537   :  { %v6308_v8 = vpop.eup %6307 }
 0x538   :  { %v672_v9 = vmul.f32 %v6308_v8, %v6304_v59 }
 0x53a   :  { %5979 = vmatmul.mubr.msk.f32.vlgmr.msra.gmra.mxu0 %vm166_vm2, %v672_v9 }
 0x53b   :  { %5987 = vmatpush3.xpose.msk.msra.mxu0 %vm166_vm2, %v829_v12  ;;  %5988 = vmatprep.mubr.msk.f32.mxu0 %vm6372_vm1, %v6371_v6 }
 0x53c   :  { %5996 = vmatprep.subr.mxu0 %v6371_v6 }
 0x53e   :  { %5989 = vmatmul.mubr.msk.f32.vlgmr.msra.gmra.mxu0 %vm166_vm2, %v827_v13 }
 0x53f   :  { %5998 = vmatprep.mubr.msk.f32.mxu0 %vm6372_vm1, %v6371_v6 }
 0x566   :  { %v669_v15 = vpop.xlane.xlu1 %668 }
 0x567   :  { %6309 = vrcp.f32 %v669_v15 }
 0x56a   :  { %v905_v18 = vpop.permute.xlu1 %904 }
 0x574   :  { %v6310_v16 = vpop.eup %6309 }
 0x575   :  { %v673_v17 = vmul.f32 %v6310_v16, %v6306_v1 }
 0x577   :  { %5984 = vmatmul.mubr.msk.f32.vlgmr.msra.gmra.mxu1 %vm166_vm2, %v673_v17 }
 0x578   :  { %5992 = vmatpush3.xpose.msk.msra.mxu1 %vm166_vm2, %v907_v14  ;;  %5993 = vmatprep.mubr.msk.f32.mxu1 %vm6372_vm1, %v6371_v6 }
 0x579   :  { %6001 = vmatprep.subr.mxu1 %v6371_v6 }
 0x57b   :  { %5994 = vmatmul.mubr.msk.f32.vlgmr.msra.gmra.mxu1 %vm166_vm2, %v905_v18 }
 0x57c   :  { %6003 = vmatprep.mubr.msk.f32.mxu1 %vm6372_vm1, %v6371_v6 }
 0x5fa   :  { %v6616_v19 = vpop.f32.mrf.mxu0 }
 0x5fc   :  { %v5980_v20 = vpop.f32.mrf.mxu0 }
 0x5fe   :  { %v900_v21 = vpop.f32.mrf.mxu0 }
 0x5ff   :  { %v982_v22 = vmul.f32 0.35355338, %v900_v21 }
 0x600   :  { %v5990_v23 = vpop.f32.mrf.mxu0 }
 0x601   :  { %v984_v24 = vsel %vm166_vm2, %v982_v22, -inf }
 0x602   :  { %985 = vmax.xlane.f32.xlu0 %v984_v24 }
 0x637   :  { %v6619_v25 = vpop.f32.mrf.mxu1 }
 0x639   :  { %v5985_v26 = vpop.f32.mrf.mxu1 }
 0x63a   :  { %v1523_v26 = vld [vmem:[%s7611_s24 + $0x8] sm:$0xff] }
 0x63b   :  { %v978_v27 = vpop.f32.mrf.mxu1 }
 0x63c   :  { %v983_v28 = vmul.f32 0.35355338, %v978_v27  ;;  %v1522_v27 = vld [vmem:[%s7611_s24] sm:$0xff] }
 0x63d   :  { %v5995_v29 = vpop.f32.mrf.mxu1 }
 0x63e   :  { %v987_v30 = vsel %vm166_vm2, %v983_v28, -inf }
 0x63f   :  { %988 = vmax.xlane.f32.xlu1 %v987_v30 }
 0x650   :  { %1006 = vrot.lane.b32.xlu1 %v6528_v10, %s6380_s28 }
 0x654   :  { %1160 = vrot.lane.b32.xlu1 %v6528_v10, %s7601_s5 }
 0x658   :  { %1238 = vrot.lane.b32.xlu1 %v6532_v11, %s7601_s5 }
 0x65c   :  { %1236 = vrot.lane.b32.xlu1 %v6532_v11, %s6382_s29 }
 0x68b   :  { %v986_v31 = vpop.xlane.xlu0 %985 }
 0x68c   :  { %v990_v32 = vsub.f32 %v982_v22, %v986_v31 }
 0x68e   :  { %v992_v33 = vmul.f32 1.442695, %v990_v32 }
 0x690   :  { %6311 = vpow2.f32 %v992_v33 }
 0x69d   :  { %v6312_v34 = vpop.eup %6311 }
 0x69e   :  { %v996_v35 = vsel %vm166_vm2, %v6312_v34, 0.0 }
 0x69f   :  { %997 = vadd.xlane.f32.xlu0 %v996_v35 }
 0x6b5   :  { %1082 = vrot.lane.b32.xlu0 %v6532_v11, %s6380_s28 }
 0x6c8   :  { %v989_v36 = vpop.xlane.xlu1 %988 }
 0x6c9   :  { %v991_v37 = vsub.f32 %v983_v28, %v989_v36 }
 0x6cb   :  { %v994_v38 = vmul.f32 1.442695, %v991_v37 }
 0x6cc   :  { %v1007_v39 = vpop.permute.xlu1 %1006 }
 0x6cd   :  { %6313 = vpow2.f32 %v994_v38  ;;  %5997 = vmatpush3.msra.mxu0 %v1007_v39 }
 0x6ce   :  { %6006 = vmatprep.subr.mxu0 %v6371_v6 }
 0x6d0   :  { %v1161_v46 = vpop.permute.xlu1 %1160 }
 0x6d4   :  { %v1239_v52 = vpop.permute.xlu1 %1238 }
 0x6d8   :  { %v1237_v54 = vpop.permute.xlu1 %1236 }
 0x6da   :  { %v6314_v40 = vpop.eup %6313 }
 0x6db   :  { %v999_v41 = vsel %vm166_vm2, %v6314_v40, 0.0 }
 0x6dc   :  { %1000 = vadd.xlane.f32.xlu0 %v999_v41 }
 0x6f2   :  { %1158 = vrot.lane.b32.xlu0 %v6528_v10, %s6382_s29 }
 0x728   :  { %v998_v42 = vpop.xlane.xlu0 %997 }
 0x729   :  { %6315 = vrcp.f32 %v998_v42 }
 0x72c   :  { %v1083_v43 = vpop.permute.xlu0 %1082 }
 0x72d   :  { %6002 = vmatpush3.msra.mxu1 %v1083_v43 }
 0x72e   :  { %6011 = vmatprep.subr.mxu1 %v6371_v6 }
 0x736   :  { %v6316_v44 = vpop.eup %6315 }
 0x737   :  { %v1004_v45 = vmul.f32 %v6316_v44, %v6312_v34 }
 0x739   :  { %5999 = vmatmul.mubr.msk.f32.vlgmr.msra.gmra.mxu0 %vm166_vm2, %v1004_v45 }
 0x73a   :  { %6007 = vmatpush3.xpose.msk.msra.mxu0 %vm166_vm2, %v1161_v46  ;;  %6008 = vmatprep.mubr.msk.f32.mxu0 %vm6372_vm1, %v6371_v6 }
 0x73b   :  { %6016 = vmatprep.subr.mxu0 %v6371_v6 }
 0x765   :  { %v1001_v47 = vpop.xlane.xlu0 %1000 }
 0x766   :  { %6317 = vrcp.f32 %v1001_v47 }
 0x769   :  { %v1159_v49 = vpop.permute.xlu0 %1158 }
 0x76a   :  { %6009 = vmatmul.mubr.msk.f32.vlgmr.msra.gmra.mxu0 %vm166_vm2, %v1159_v49 }
 0x76b   :  { %6018 = vmatprep.mubr.msk.f32.mxu0 %vm6372_vm1, %v6371_v6 }
 0x773   :  { %v6318_v51 = vpop.eup %6317 }
 0x774   :  { %v1005_v53 = vmul.f32 %v6318_v51, %v6314_v40 }
 0x776   :  { %6004 = vmatmul.mubr.msk.f32.vlgmr.msra.gmra.mxu1 %vm166_vm2, %v1005_v53  ;;  %v1664_v53 = vld [vmem:[%s7578_s8 + $0x18] sm:$0xff] }
 0x777   :  { %6012 = vmatpush3.xpose.msk.msra.mxu1 %vm166_vm2, %v1239_v52  ;;  %6013 = vmatprep.mubr.msk.f32.mxu1 %vm6372_vm1, %v6371_v6 }
 0x778   :  { %6021 = vmatprep.subr.mxu1 %v6371_v6 }
 0x77a   :  { %6014 = vmatmul.mubr.msk.f32.vlgmr.msra.gmra.mxu1 %vm166_vm2, %v1237_v54  ;;  %v1663_v54 = vld [vmem:[%s7578_s8 + $0x10] sm:$0xff] }
 0x77b   :  { %6023 = vmatprep.mubr.msk.f32.mxu1 %vm6372_vm1, %v6371_v6 }
 0x7f9   :  { %v1078_v55 = vpop.f32.mrf.mxu0 }
 0x7fb   :  { %v6000_v56 = vpop.f32.mrf.mxu0 }
 0x82a   :  { %v1232_v57 = vpop.f32.mrf.mxu0 }
 0x82b   :  { %v1314_v58 = vmul.f32 0.35355338, %v1232_v57 }
 0x82c   :  { %v6010_v59 = vpop.f32.mrf.mxu0 }
 0x82d   :  { %v1316_v60 = vsel %vm166_vm2, %v1314_v58, -inf }
 0x82e   :  { %1317 = vmax.xlane.f32.xlu0 %v1316_v60 }
 0x836   :  { %v1154_v61 = vpop.f32.mrf.mxu1 }
 0x838   :  { %v6005_v62 = vpop.f32.mrf.mxu1 }
 0x83a   :  { %v1310_v63 = vpop.f32.mrf.mxu1 }
 0x83b   :  { %v1315_v0 = vmul.f32 0.35355338, %v1310_v63 }
 0x83c   :  { %v6015_v1 = vpop.f32.mrf.mxu1 }
 0x83d   :  { %v1319_v3 = vsel %vm166_vm2, %v1315_v0, -inf }
 0x83e   :  { %1320 = vmax.xlane.f32.xlu1 %v1319_v3  ;;  %v68_v3 = vld [vmem:[%s7579_s1] sm:$0xff] }
 0x84f   :  { %1338 = vrot.lane.b32.xlu1 %v6528_v10, %s6383_s30 }
 0x853   :  { %1492 = vrot.lane.b32.xlu1 %v6616_v19, %s7599_s2 }
 0x857   :  { %1494 = vrot.lane.b32.xlu1 %v6619_v25, %s7599_s2  ;;  %v1524_v25 = vld [vmem:[%s7611_s24 + $0x10] sm:$0xff] }
 0x85b   :  { %1502 = vrot.lane.b32.xlu1 %v1154_v61, %s7597_s21 }
 0x8b7   :  { %v1318_v4 = vpop.xlane.xlu0 %1317 }
 0x8b8   :  { %v1322_v7 = vsub.f32 %v1314_v58, %v1318_v4  ;;  %v5460_v4 = vld [vmem:[%s7580_s9] ss:$0 sm:$0xff] }
 0x8ba   :  { %v1324_v8 = vmul.f32 1.442695, %v1322_v7 }
 0x8bc   :  { %6319 = vpow2.f32 %v1324_v8 }
 0x8c7   :  { %v1321_v9 = vpop.xlane.xlu1 %1320 }
 0x8c8   :  { %v1323_v12 = vsub.f32 %v1315_v0, %v1321_v9 }
 0x8c9   :  { %v6320_v13 = vpop.eup %6319 }
 0x8ca   :  { %v1326_v14 = vmul.f32 1.442695, %v1323_v12  ;;  %v1328_v10 = vsel %vm166_vm2, %v6320_v13, 0.0 }
 0x8cb   :  { %v1339_v15 = vpop.permute.xlu1 %1338  ;;  %1329 = vadd.xlane.f32.xlu0 %v1328_v10 }
 0x8cc   :  { %6321 = vpow2.f32 %v1326_v14  ;;  %6017 = vmatpush3.msra.mxu0 %v1339_v15 }
 0x8cf   :  { %v1493_v32 = vpop.permute.xlu1 %1492 }
 0x8d0   :  { %v1514_v34 = vsel %vm166_vm2, %v6581_v48, %v1493_v32 }
 0x8d3   :  { %v1495_v38 = vpop.permute.xlu1 %1494 }
 0x8d4   :  { %v1515_v40 = vsel %vm166_vm2, %v6583_v50, %v1495_v38 }
 0x8d7   :  { %v1503_v39 = vpop.permute.xlu1 %1502 }
 0x8d8   :  { %v1518_v41 = vsel %vm1516_vm4, %v1515_v40, %v1503_v39 }
 0x8d9   :  { %v6322_v16 = vpop.eup %6321 }
 0x8da   :  { %v1331_v17 = vsel %vm166_vm2, %v6322_v16, 0.0 }
 0x8db   :  { %1332 = vadd.xlane.f32.xlu0 %v1331_v17  ;;  %v69_v17 = vld [vmem:[%s7579_s1 + $0x8] sm:$0xff] }
 0x8f1   :  { %1414 = vrot.lane.b32.xlu0 %v6532_v11, %s6383_s30  ;;  %v1525_v11 = vld [vmem:[%s7611_s24 + $0x18] sm:$0xff] }
 0x8f2   :  { %6026 = vmatprep.subr.mxu0 %v1525_v11 }
 0x8f5   :  { %1500 = vrot.lane.b32.xlu0 %v1078_v55, %s7597_s21  ;;  %s7612_s21 = sld [smem:[#allocation6_spill]] }
 0x8fb   :  { %v5455_v48 = vld [vmem:[%s7612_s21] ss:$0 sm:$0xff] }
 0x954   :  { %v1330_v18 = vpop.xlane.xlu0 %1329 }
 0x955   :  { %6323 = vrcp.f32 %v1330_v18 }
 0x962   :  { %v6324_v19 = vpop.eup %6323 }
 0x963   :  { %v1336_v20 = vmul.f32 %v6324_v19, %v6320_v13 }
 0x964   :  { %v1333_v21 = vpop.xlane.xlu0 %1332 }
 0x965   :  { %6325 = vrcp.f32 %v1333_v21  ;;  %6019 = vmatmul.mubr.msk.f32.vlgmr.msra.gmra.mxu0 %vm166_vm2, %v1336_v20  ;;  %v5458_v20 = vld [vmem:[%s7581_s6] ss:$0 sm:$0xff]  ;;  %s7613_s6 = smov 72  }
 0x966   :  { %6027 = vmatpush3.msra.mxu0 %v1525_v11 }
 0x967   :  { %6028 = vmatprep.subr.mxu0 %v1524_v25 }
 0x968   :  { %v1415_v22 = vpop.permute.xlu0 %1414  ;;  %6029 = vmatpush3.msra.mxu0 %v1524_v25 }
 0x969   :  { %6022 = vmatpush3.msra.mxu1 %v1415_v22  ;;  %6030 = vmatprep.subr.mxu0 %v1523_v26 }
 0x96a   :  { %6031 = vmatpush3.msra.mxu0 %v1523_v26  ;;  %6037 = vmatprep.subr.mxu1 %v1664_v53 }
 0x96b   :  { %6032 = vmatprep.subr.mxu0 %v1522_v27 }
 0x96c   :  { %6033 = vmatpush3.msra.mxu0 %v1522_v27  ;;  %v1501_v33 = vpop.permute.xlu0 %1500 }
 0x96d   :  { %v1517_v35 = vsel %vm1516_vm4, %v1514_v34, %v1501_v33 }
 0x972   :  { %v6326_v23 = vpop.eup %6325 }
 0x973   :  { %v1337_v24 = vmul.f32 %v6326_v23, %v6322_v16 }
 0x975   :  { %6024 = vmatmul.mubr.msk.f32.vlgmr.msra.gmra.mxu1 %vm166_vm2, %v1337_v24  ;;  %v5459_v24 = vld [vmem:[%s7582_s7] ss:$0 sm:$0xff]  ;;  %s7614_s7 = smov 8  }
 0x976   :  { %6038 = vmatpush3.msra.mxu1 %v1664_v53 }
 0x977   :  { %6039 = vmatprep.subr.mxu1 %v1663_v54 }
 0x978   :  { %6040 = vmatpush3.msra.mxu1 %v1663_v54 }
 0xa25   :  { %v1410_v28 = vpop.f32.mrf.mxu0 }
 0xa26   :  { %1508 = vrot.lane.b32.xlu0 %v1410_v28, %s6386_s0 }
 0xa27   :  { %v6020_v29 = vpop.f32.mrf.mxu0 }
 0xa35   :  { %v1486_v30 = vpop.f32.mrf.mxu1 }
 0xa36   :  { %1510 = vrot.lane.b32.xlu1 %v1486_v30, %s6386_s0 }
 0xa37   :  { %v6025_v31 = vpop.f32.mrf.mxu1 }
 0xa98   :  { %v1509_v36 = vpop.permute.xlu0 %1508 }
 0xa99   :  { %v1520_v37 = vsel %vm1519_vm3, %v1517_v35, %v1509_v36 }
 0xa9a   :  { %6034 = vmatprep.mubr.msk.f32.mxu0 %vm81_vm0, %v1520_v37 }
 0xaa8   :  { %v1511_v42 = vpop.permute.xlu1 %1510 }
 0xaa9   :  { %v1521_v43 = vsel %vm1519_vm3, %v1518_v41, %v1511_v42 }
 0xaaa   :  { %6035 = vmatmul.mubr.msk.f32.vlgmr.msra.gmra.mxu0 %vm81_vm0, %v1521_v43 }
 0xaab   :  { %6056 = vmatprep.mubr.msk.f32.mxu0 %vm81_vm0, %v68_v3 }
 0xb6a   :  { %v6036_v44 = vpop.f32.mrf.mxu0 }
 0xb6b   :  { %v1611_v45 = vadd.f32 %v6036_v44, %v5455_v48 }
 0xb6c   :  { %v1605_v46 = vpop.f32.mrf.mxu0 }
 0xb6d   :  { %v1606_v47 = vadd.f32 %v5455_v48, %v1605_v46  ;;  %v1615_v49 = vadd.f32 %v1611_v45, %v6515_v5  ;;  %v1661_v5 = vld [vmem:[%s7578_s8] sm:$0xff] }
 0xb6f   :  { %v1621_v51 = vsel %vm81_vm0, %v1615_v49, 0.0  ;;  %v1614_v50 = vadd.f32 %v1606_v47, %v6502_v2  ;;  %v1662_v2 = vld [vmem:[%s7578_s8 + $0x8] sm:$0xff] }
 0xb70   :  { %1622 = vadd.xlane.f32.xlu1 %v1621_v51  ;;  %6041 = vmatprep.subr.mxu1 %v1662_v2 }
 0xb71   :  { %v1618_v52 = vsel %vm81_vm0, %v1614_v50, 0.0  ;;  %6042 = vmatpush3.msra.mxu1 %v1662_v2 }
 0xb72   :  { %1619 = vadd.xlane.f32.xlu0 %v1618_v52  ;;  %6043 = vmatprep.subr.mxu1 %v1661_v5 }
 0xb73   :  { %6044 = vmatpush3.msra.mxu1 %v1661_v5 }
 0xb74   :  { %6059 = vmatprep.subr.mxu1 %v6371_v6 }
 0xb81   :  { %1763 = vrot.lane.b32.xlu1 %v1664_v53, %s6373_s23 }
 0xb85   :  { %1759 = vrot.lane.b32.xlu1 %v1662_v2, %s6373_s23 }
 0xb89   :  { %1757 = vrot.lane.b32.xlu1 %v1661_v5, %s6373_s23 }
 0xbf9   :  { %v1623_v55 = vpop.xlane.xlu1 %1622 }
 0xbfa   :  { %v1626_v56 = vmul.f32 0.03125, %v1623_v55 }
 0xbfb   :  { %v1620_v57 = vpop.xlane.xlu0 %1619 }
 0xbfc   :  { %v1628_v58 = vsub.f32 %v1615_v49, %v1626_v56  ;;  %v1625_v59 = vmul.f32 0.03125, %v1620_v57 }
 0xbfd   :  { %v1764_v1 = vpop.permute.xlu1 %1763 }
 0xbfe   :  { %v1627_v60 = vsub.f32 %v1614_v50, %v1625_v59  ;;  %v1630_v61 = vmul.f32 %v1628_v58, %v1628_v58  ;;  %6048 = vmatprep.subr.mxu0 %v1764_v1 }
 0xbff   :  { %6049 = vmatpush3.msra.mxu0 %v1764_v1 }
 0xc00   :  { %v1634_v62 = vsel %vm81_vm0, %v1630_v61, 0.0  ;;  %v1629_v63 = vmul.f32 %v1627_v60, %v1627_v60 }
 0xc01   :  { %1635 = vadd.xlane.f32.xlu0 %v1634_v62  ;;  %v1760_v13 = vpop.permute.xlu1 %1759 }
 0xc02   :  { %v1631_v0 = vsel %vm81_vm0, %v1629_v63, 0.0 }
 0xc05   :  { %1632 = vadd.xlane.f32.xlu0 %v1631_v0  ;;  %v1758_v16 = vpop.permute.xlu1 %1757 }
 0xc1b   :  { %1761 = vrot.lane.b32.xlu0 %v1663_v54, %s6373_s23 }
 0xc1f   :  { %1769 = vrot.lane.b32.xlu0 %v5460_v4, %s6373_s23 }
 0xc8a   :  { %v1636_v7 = vpop.xlane.xlu0 %1635 }
 0xc8b   :  { %v1638_v8 = vmul.f32 0.03125, %v1636_v7 }
 0xc8d   :  { %v1640_v9 = vadd.f32 1e-05, %v1638_v8 }
 0xc8e   :  { %v1633_v12 = vpop.xlane.xlu0 %1632 }
 0xc8f   :  { %6327 = vrsqrt.f32 %v1640_v9  ;;  %v1637_v14 = vmul.f32 0.03125, %v1633_v12 }
 0xc91   :  { %v1639_v10 = vadd.f32 1e-05, %v1637_v14 }
 0xc92   :  { %v1762_v15 = vpop.permute.xlu0 %1761 }
 0xc93   :  { %6329 = vrsqrt.f32 %v1639_v10  ;;  %6050 = vmatprep.subr.mxu0 %v1762_v15 }
 0xc94   :  { %6051 = vmatpush3.msra.mxu0 %v1762_v15 }
 0xc95   :  { %6052 = vmatprep.subr.mxu0 %v1760_v13 }
 0xc96   :  { %6053 = vmatpush3.msra.mxu0 %v1760_v13  ;;  %v1770_v28 = vpop.permute.xlu0 %1769 }
 0xc97   :  { %6054 = vmatprep.subr.mxu0 %v1758_v16 }
 0xc98   :  { %6055 = vmatpush3.msra.mxu0 %v1758_v16 }
 0xc99   :  { %6057 = vmatmul.mubr.msk.f32.vlgmr.msra.gmra.mxu0 %vm81_vm0, %v69_v17  ;;  %6069 = vmatprep.subr.mxu0 %v6371_v6 }
 0xc9a   :  { %6071 = vmatprep.mubr.msk.f32.mxu0 %vm6372_vm1, %v6371_v6 }
 0xc9c   :  { %v6328_v18 = vpop.eup %6327 }
 0xc9d   :  { %v1644_v19 = vmul.f32 %v6328_v18, %v1628_v58 }
 0xc9f   :  { %v1652_v23 = vmul.f32 %v5458_v20, %v1644_v19 }
 0xca0   :  { %v6330_v21 = vpop.eup %6329 }
 0xca1   :  { %v1643_v22 = vmul.f32 %v6330_v21, %v1627_v60  ;;  %v6739_v26 = vadd.f32 %v5459_v24, %v1652_v23 }
 0xca3   :  { %v1651_v11 = vmul.f32 %v5458_v20, %v1643_v22 }
 0xca5   :  { %v6737_v25 = vadd.f32 %v5459_v24, %v1651_v11 }
 0xca7   :  { %6045 = vmatprep.mubr.msk.f32.mxu1 %vm81_vm0, %v6737_v25 }
 0xca8   :  { %6046 = vmatmul.mubr.msk.f32.vlgmr.msra.gmra.mxu1 %vm81_vm0, %v6739_v26 }
 0xca9   :  { %6061 = vmatprep.mubr.msk.f32.mxu1 %vm6372_vm1, %v6371_v6 }
 0xd59   :  { %v6058_v27 = vpop.f32.mrf.mxu0 }
 0xd5a   :  { %v6754_v34 = vadd.f32 %v6058_v27, %v1770_v28 }
 0xd5b   :  { %v1844_v29 = vpop.f32.mrf.mxu0 }
 0xd5c   :  { %v6747_v30 = vadd.f32 %v1844_v29, %v1770_v28 }
 0xd5e   :  { %6060 = vmatpush3.xpose.msk.msra.mxu1 %vm166_vm2, %v6747_v30 }
 0xd5f   :  { %6064 = vmatprep.subr.mxu1 %v6371_v6 }
 0xd68   :  { %v6047_v31 = vpop.f32.mrf.mxu1 }
 0xd69   :  { %v6762_v35 = vadd.f32 %v6047_v31, %v5460_v4 }
 0xd6a   :  { %v1744_v32 = vpop.f32.mrf.mxu1 }
 0xd6b   :  { %v6752_v33 = vadd.f32 %v5460_v4, %v1744_v32 }
 0xd6d   :  { %6062 = vmatmul.mubr.msk.f32.vlgmr.msra.gmra.mxu1 %vm166_vm2, %v6752_v33 }
 0xd6e   :  { %6065 = vmatpush3.xpose.msk.msra.mxu1 %vm166_vm2, %v6754_v34  ;;  %6066 = vmatprep.mubr.msk.f32.mxu1 %vm6372_vm1, %v6371_v6 }
 0xd6f   :  { %6074 = vmatprep.subr.mxu1 %v6371_v6 }
 0xd71   :  { %6067 = vmatmul.mubr.msk.f32.vlgmr.msra.gmra.mxu1 %vm166_vm2, %v6762_v35 }
 0xd72   :  { %6076 = vmatprep.mubr.msk.f32.mxu1 %vm6372_vm1, %v6371_v6 }
 0xe2d   :  { %v1925_v36 = vpop.f32.mrf.mxu1 }
 0xe2e   :  { %v2005_v37 = vmul.f32 0.35355338, %v1925_v36 }
 0xe2f   :  { %v6063_v38 = vpop.f32.mrf.mxu1 }
 0xe30   :  { %v2007_v39 = vsel %vm166_vm2, %v2005_v37, -inf }
 0xe31   :  { %2008 = vmax.xlane.f32.xlu1 %v2007_v39  ;;  %v2001_v40 = vpop.f32.mrf.mxu1 }
 0xe32   :  { %v2006_v41 = vmul.f32 0.35355338, %v2001_v40 }
 0xe33   :  { %v6068_v42 = vpop.f32.mrf.mxu1 }
 0xe34   :  { %v2010_v43 = vsel %vm166_vm2, %v2006_v41, -inf }
 0xe35   :  { %2011 = vmax.xlane.f32.xlu0 %v2010_v43 }
 0xe42   :  { %2105 = vrot.lane.b32.xlu1 %v6754_v34, %s6373_s23 }
 0xe46   :  { %2183 = vrot.lane.b32.xlu1 %v6747_v30, %s6376_s25 }
 0xe4b   :  { %2029 = vrot.lane.b32.xlu0 %v6747_v30, %s6373_s23  ;;  %s7615_s23 = smov 16  }
 0xeba   :  { %v2009_v48 = vpop.xlane.xlu1 %2008 }
 0xebb   :  { %v2013_v44 = vsub.f32 %v2005_v37, %v2009_v48 }
 0xebd   :  { %v2015_v45 = vmul.f32 1.442695, %v2013_v44 }
 0xebe   :  { %v2106_v46 = vpop.permute.xlu1 %2105  ;;  %v2012_v47 = vpop.xlane.xlu0 %2011 }
 0xebf   :  { %6331 = vpow2.f32 %v2015_v45  ;;  %v2014_v49 = vsub.f32 %v2006_v41, %v2012_v47  ;;  %6075 = vmatpush3.msra.mxu1 %v2106_v46 }
 0xec0   :  { %6084 = vmatprep.subr.mxu1 %v6371_v6 }
 0xec1   :  { %v2017_v51 = vmul.f32 1.442695, %v2014_v49 }
 0xec2   :  { %v2030_v50 = vpop.permute.xlu0 %2029  ;;  %v2184_v5 = vpop.permute.xlu1 %2183 }
 0xec3   :  { %6333 = vpow2.f32 %v2017_v51  ;;  %6070 = vmatpush3.msra.mxu0 %v2030_v50 }
 0xec4   :  { %6079 = vmatprep.subr.mxu0 %v6371_v6 }
 0xecc   :  { %v6332_v52 = vpop.eup %6331 }
 0xecd   :  { %v2019_v53 = vsel %vm166_vm2, %v6332_v52, 0.0 }
 0xece   :  { %2020 = vadd.xlane.f32.xlu0 %v2019_v53 }
 0xed0   :  { %v6334_v54 = vpop.eup %6333 }
 0xed1   :  { %v2022_v2 = vsel %vm166_vm2, %v6334_v54, 0.0 }
 0xed2   :  { %2023 = vadd.xlane.f32.xlu1 %v2022_v2 }
 0xee3   :  { %2181 = vrot.lane.b32.xlu1 %v6752_v33, %s6376_s25 }
 0xee4   :  { %2261 = vrot.lane.b32.xlu0 %v6754_v34, %s6376_s25 }
 0xee8   :  { %2259 = vrot.lane.b32.xlu0 %v6762_v35, %s6376_s25 }
 0xf57   :  { %v2021_v55 = vpop.xlane.xlu0 %2020 }
 0xf58   :  { %6335 = vrcp.f32 %v2021_v55 }
 0xf5b   :  { %v2024_v56 = vpop.xlane.xlu1 %2023  ;;  %v2262_v60 = vpop.permute.xlu0 %2261 }
 0xf5c   :  { %6337 = vrcp.f32 %v2024_v56 }
 0xf5f   :  { %v2182_v62 = vpop.permute.xlu1 %2181  ;;  %v2260_v63 = vpop.permute.xlu0 %2259 }
 0xf65   :  { %v6336_v57 = vpop.eup %6335 }
 0xf66   :  { %v2027_v58 = vmul.f32 %v6336_v57, %v6332_v52 }
 0xf68   :  { %6072 = vmatmul.mubr.msk.f32.vlgmr.msra.gmra.mxu0 %vm166_vm2, %v2027_v58 }
 0xf69   :  { %v6338_v59 = vpop.eup %6337  ;;  %6080 = vmatpush3.xpose.msk.msra.mxu0 %vm166_vm2, %v2184_v5  ;;  %6081 = vmatprep.mubr.msk.f32.mxu0 %vm6372_vm1, %v6371_v6 }
 0xf6a   :  { %v2028_v61 = vmul.f32 %v6338_v59, %v6334_v54  ;;  %6089 = vmatprep.subr.mxu0 %v6371_v6 }
 0xf6c   :  { %6077 = vmatmul.mubr.msk.f32.vlgmr.msra.gmra.mxu1 %vm166_vm2, %v2028_v61  ;;  %6082 = vmatmul.mubr.msk.f32.vlgmr.msra.gmra.mxu0 %vm166_vm2, %v2182_v62 }
 0xf6d   :  { %6085 = vmatpush3.xpose.msk.msra.mxu1 %vm166_vm2, %v2262_v60  ;;  %6086 = vmatprep.mubr.msk.f32.mxu1 %vm6372_vm1, %v6371_v6 }
 0xf6e   :  { %6094 = vmatprep.subr.mxu1 %v6371_v6  ;;  %6091 = vmatprep.mubr.msk.f32.mxu0 %vm6372_vm1, %v6371_v6 }
 0xf70   :  { %6087 = vmatmul.mubr.msk.f32.vlgmr.msra.gmra.mxu1 %vm166_vm2, %v2260_v63 }
 0xf71   :  { %6096 = vmatprep.mubr.msk.f32.mxu1 %vm6372_vm1, %v6371_v6 }
0x1028   :  { %v6803_v0 = vpop.f32.mrf.mxu0 }
0x102a   :  { %v6073_v1 = vpop.f32.mrf.mxu0 }
0x102c   :  { %v6805_v3 = vpop.f32.mrf.mxu1  ;;  %v2255_v4 = vpop.f32.mrf.mxu0 }
0x102d   :  { %v2337_v7 = vmul.f32 0.35355338, %v2255_v4 }
0x102e   :  { %v6078_v8 = vpop.f32.mrf.mxu1  ;;  %v6083_v9 = vpop.f32.mrf.mxu0 }
0x102f   :  { %v2339_v12 = vsel %vm166_vm2, %v2337_v7, -inf }
0x1030   :  { %2340 = vmax.xlane.f32.xlu1 %v2339_v12  ;;  %v2333_v13 = vpop.f32.mrf.mxu1 }
0x1031   :  { %v2338_v14 = vmul.f32 0.35355338, %v2333_v13 }
0x1032   :  { %v6088_v10 = vpop.f32.mrf.mxu1 }
0x1033   :  { %v2342_v15 = vsel %vm166_vm2, %v2338_v14, -inf }
0x1034   :  { %2343 = vmax.xlane.f32.xlu0 %v2342_v15 }
0x1041   :  { %2437 = vrot.lane.b32.xlu1 %v6754_v34, %s6375_s3 }
0x1045   :  { %2515 = vrot.lane.b32.xlu1 %v6747_v30, %s6378_s26 }
0x104a   :  { %2361 = vrot.lane.b32.xlu0 %v6747_v30, %s6375_s3 }
0x10b9   :  { %v2341_v16 = vpop.xlane.xlu1 %2340 }
0x10ba   :  { %v2345_v17 = vsub.f32 %v2337_v7, %v2341_v16 }
0x10bc   :  { %v2347_v18 = vmul.f32 1.442695, %v2345_v17 }
0x10bd   :  { %v2438_v19 = vpop.permute.xlu1 %2437  ;;  %v2344_v20 = vpop.xlane.xlu0 %2343 }
0x10be   :  { %6339 = vpow2.f32 %v2347_v18  ;;  %v2346_v21 = vsub.f32 %v2338_v14, %v2344_v20  ;;  %6095 = vmatpush3.msra.mxu1 %v2438_v19 }
0x10bf   :  { %6104 = vmatprep.subr.mxu1 %v6371_v6 }
0x10c0   :  { %v2349_v22 = vmul.f32 1.442695, %v2346_v21 }
0x10c1   :  { %v2362_v23 = vpop.permute.xlu0 %2361  ;;  %v2516_v29 = vpop.permute.xlu1 %2515 }
0x10c2   :  { %6341 = vpow2.f32 %v2349_v22  ;;  %6090 = vmatpush3.msra.mxu0 %v2362_v23 }
0x10c3   :  { %6099 = vmatprep.subr.mxu0 %v6371_v6 }
0x10cb   :  { %v6340_v24 = vpop.eup %6339 }
0x10cc   :  { %v2351_v11 = vsel %vm166_vm2, %v6340_v24, 0.0 }
0x10cd   :  { %2352 = vadd.xlane.f32.xlu0 %v2351_v11 }
0x10cf   :  { %v6342_v27 = vpop.eup %6341 }
0x10d0   :  { %v2354_v28 = vsel %vm166_vm2, %v6342_v27, 0.0 }
0x10d1   :  { %2355 = vadd.xlane.f32.xlu1 %v2354_v28 }
0x10e2   :  { %2513 = vrot.lane.b32.xlu1 %v6752_v33, %s6378_s26 }
0x10e3   :  { %2593 = vrot.lane.b32.xlu0 %v6754_v34, %s6378_s26 }
0x10e7   :  { %2591 = vrot.lane.b32.xlu0 %v6762_v35, %s6378_s26 }
0x1156   :  { %v2353_v31 = vpop.xlane.xlu0 %2352 }
0x1157   :  { %6343 = vrcp.f32 %v2353_v31 }
0x115a   :  { %v2356_v32 = vpop.xlane.xlu1 %2355  ;;  %v2594_v39 = vpop.permute.xlu0 %2593 }
0x115b   :  { %6345 = vrcp.f32 %v2356_v32 }
0x115e   :  { %v2514_v41 = vpop.permute.xlu1 %2513  ;;  %v2592_v42 = vpop.permute.xlu0 %2591 }
0x1164   :  { %v6344_v36 = vpop.eup %6343 }
0x1165   :  { %v2359_v37 = vmul.f32 %v6344_v36, %v6340_v24 }
0x1167   :  { %6092 = vmatmul.mubr.msk.f32.vlgmr.msra.gmra.mxu0 %vm166_vm2, %v2359_v37 }
0x1168   :  { %v6346_v38 = vpop.eup %6345  ;;  %6100 = vmatpush3.xpose.msk.msra.mxu0 %vm166_vm2, %v2516_v29  ;;  %6101 = vmatprep.mubr.msk.f32.mxu0 %vm6372_vm1, %v6371_v6 }
0x1169   :  { %v2360_v40 = vmul.f32 %v6346_v38, %v6342_v27  ;;  %6109 = vmatprep.subr.mxu0 %v6371_v6 }
0x116b   :  { %6097 = vmatmul.mubr.msk.f32.vlgmr.msra.gmra.mxu1 %vm166_vm2, %v2360_v40  ;;  %6102 = vmatmul.mubr.msk.f32.vlgmr.msra.gmra.mxu0 %vm166_vm2, %v2514_v41 }
0x116c   :  { %6105 = vmatpush3.xpose.msk.msra.mxu1 %vm166_vm2, %v2594_v39  ;;  %6106 = vmatprep.mubr.msk.f32.mxu1 %vm6372_vm1, %v6371_v6 }
0x116d   :  { %6114 = vmatprep.subr.mxu1 %v6371_v6  ;;  %6111 = vmatprep.mubr.msk.f32.mxu0 %vm6372_vm1, %v6371_v6 }
0x116f   :  { %6107 = vmatmul.mubr.msk.f32.vlgmr.msra.gmra.mxu1 %vm166_vm2, %v2592_v42 }
0x1170   :  { %6116 = vmatprep.mubr.msk.f32.mxu1 %vm6372_vm1, %v6371_v6 }
0x1227   :  { %v6841_v43 = vpop.f32.mrf.mxu0 }
0x1229   :  { %v6093_v48 = vpop.f32.mrf.mxu0 }
0x122b   :  { %v6843_v44 = vpop.f32.mrf.mxu1  ;;  %v2587_v45 = vpop.f32.mrf.mxu0 }
0x122c   :  { %v2669_v46 = vmul.f32 0.35355338, %v2587_v45 }
0x122d   :  { %v6098_v47 = vpop.f32.mrf.mxu1  ;;  %v6103_v49 = vpop.f32.mrf.mxu0 }
0x122e   :  { %v2671_v51 = vsel %vm166_vm2, %v2669_v46, -inf  ;;  %v3209_v47 = vld [vmem:[%s7583_s10 + $0x10] sm:$0xff]  ;;  %v3208_v49 = vld [vmem:[%s7583_s10 + $0x8] sm:$0xff] }
0x122f   :  { %2672 = vmax.xlane.f32.xlu1 %v2671_v51  ;;  %v2665_v50 = vpop.f32.mrf.mxu1  ;;  %v3207_v51 = vld [vmem:[%s7583_s10] sm:$0xff] }
0x1230   :  { %v2670_v52 = vmul.f32 0.35355338, %v2665_v50 }
0x1231   :  { %v6108_v53 = vpop.f32.mrf.mxu1 }
0x1232   :  { %v2674_v54 = vsel %vm166_vm2, %v2670_v52, -inf }
0x1233   :  { %2675 = vmax.xlane.f32.xlu0 %v2674_v54 }
0x1240   :  { %2769 = vrot.lane.b32.xlu1 %v6754_v34, %s6379_s27 }
0x1244   :  { %2847 = vrot.lane.b32.xlu1 %v6747_v30, %s6382_s29 }
0x1249   :  { %2693 = vrot.lane.b32.xlu0 %v6747_v30, %s6379_s27 }
0x12b8   :  { %v2673_v2 = vpop.xlane.xlu1 %2672 }
0x12b9   :  { %v2677_v5 = vsub.f32 %v2669_v46, %v2673_v2 }
0x12bb   :  { %v2679_v55 = vmul.f32 1.442695, %v2677_v5 }
0x12bc   :  { %v2770_v56 = vpop.permute.xlu1 %2769  ;;  %v2676_v57 = vpop.xlane.xlu0 %2675 }
0x12bd   :  { %6347 = vpow2.f32 %v2679_v55  ;;  %v2678_v58 = vsub.f32 %v2670_v52, %v2676_v57  ;;  %6115 = vmatpush3.msra.mxu1 %v2770_v56 }
0x12be   :  { %6124 = vmatprep.subr.mxu1 %v6371_v6 }
0x12bf   :  { %v2681_v59 = vmul.f32 1.442695, %v2678_v58 }
0x12c0   :  { %v2694_v60 = vpop.permute.xlu0 %2693  ;;  %v2848_v4 = vpop.permute.xlu1 %2847 }
0x12c1   :  { %6349 = vpow2.f32 %v2681_v59  ;;  %6110 = vmatpush3.msra.mxu0 %v2694_v60 }
0x12c2   :  { %6119 = vmatprep.subr.mxu0 %v6371_v6 }
0x12ca   :  { %v6348_v61 = vpop.eup %6347 }
0x12cb   :  { %v2683_v62 = vsel %vm166_vm2, %v6348_v61, 0.0 }
0x12cc   :  { %2684 = vadd.xlane.f32.xlu0 %v2683_v62 }
0x12ce   :  { %v6350_v63 = vpop.eup %6349 }
0x12cf   :  { %v2686_v1 = vsel %vm166_vm2, %v6350_v63, 0.0 }
0x12d0   :  { %2687 = vadd.xlane.f32.xlu1 %v2686_v1 }
0x12e1   :  { %2845 = vrot.lane.b32.xlu1 %v6752_v33, %s6382_s29 }
0x12e2   :  { %2925 = vrot.lane.b32.xlu0 %v6754_v34, %s6382_s29 }
0x12e6   :  { %2923 = vrot.lane.b32.xlu0 %v6762_v35, %s6382_s29 }
0x1355   :  { %v2685_v7 = vpop.xlane.xlu0 %2684 }
0x1356   :  { %6351 = vrcp.f32 %v2685_v7 }
0x1359   :  { %v2688_v8 = vpop.xlane.xlu1 %2687  ;;  %v2926_v14 = vpop.permute.xlu0 %2925 }
0x135a   :  { %6353 = vrcp.f32 %v2688_v8 }
0x135d   :  { %v2846_v35 = vpop.permute.xlu1 %2845  ;;  %v2924_v10 = vpop.permute.xlu0 %2923 }
0x1363   :  { %v6352_v9 = vpop.eup %6351 }
0x1364   :  { %v2691_v12 = vmul.f32 %v6352_v9, %v6348_v61 }
0x1366   :  { %6112 = vmatmul.mubr.msk.f32.vlgmr.msra.gmra.mxu0 %vm166_vm2, %v2691_v12 }
0x1367   :  { %v6354_v13 = vpop.eup %6353  ;;  %6120 = vmatpush3.xpose.msk.msra.mxu0 %vm166_vm2, %v2848_v4  ;;  %6121 = vmatprep.mubr.msk.f32.mxu0 %vm6372_vm1, %v6371_v6 }
0x1368   :  { %v2692_v33 = vmul.f32 %v6354_v13, %v6350_v63  ;;  %6129 = vmatprep.subr.mxu0 %v6371_v6 }
0x136a   :  { %6117 = vmatmul.mubr.msk.f32.vlgmr.msra.gmra.mxu1 %vm166_vm2, %v2692_v33  ;;  %6122 = vmatmul.mubr.msk.f32.vlgmr.msra.gmra.mxu0 %vm166_vm2, %v2846_v35 }
0x136b   :  { %6125 = vmatpush3.xpose.msk.msra.mxu1 %vm166_vm2, %v2926_v14  ;;  %6126 = vmatprep.mubr.msk.f32.mxu1 %vm6372_vm1, %v6371_v6 }
0x136c   :  { %6134 = vmatprep.subr.mxu1 %v6371_v6  ;;  %6131 = vmatprep.mubr.msk.f32.mxu0 %vm6372_vm1, %v6371_v6 }
0x136e   :  { %6127 = vmatmul.mubr.msk.f32.vlgmr.msra.gmra.mxu1 %vm166_vm2, %v2924_v10 }
0x136f   :  { %6136 = vmatprep.mubr.msk.f32.mxu1 %vm6372_vm1, %v6371_v6 }
0x1426   :  { %v2765_v15 = vpop.f32.mrf.mxu0 }
0x1428   :  { %v6113_v16 = vpop.f32.mrf.mxu0 }
0x142a   :  { %v2841_v17 = vpop.f32.mrf.mxu1  ;;  %v2919_v18 = vpop.f32.mrf.mxu0 }
0x142b   :  { %v3001_v19 = vmul.f32 0.35355338, %v2919_v18 }
0x142c   :  { %v6118_v20 = vpop.f32.mrf.mxu1  ;;  %v6123_v21 = vpop.f32.mrf.mxu0 }
0x142d   :  { %v3003_v22 = vsel %vm166_vm2, %v3001_v19, -inf  ;;  %v3370_v21 = vld [vmem:[%s7585_s14 + $0xc0] sm:$0xff] }
0x142e   :  { %3004 = vmax.xlane.f32.xlu1 %v3003_v22  ;;  %v2997_v23 = vpop.f32.mrf.mxu1  ;;  %v3363_v22 = vld [vmem:[%s7585_s14 + $0x88] sm:$0xff] }
0x142f   :  { %v3002_v24 = vmul.f32 0.35355338, %v2997_v23 }
0x1430   :  { %v6128_v11 = vpop.f32.mrf.mxu1 }
0x1431   :  { %v3006_v27 = vsel %vm166_vm2, %v3002_v24, -inf }
0x1432   :  { %3007 = vmax.xlane.f32.xlu0 %v3006_v27 }
0x14b7   :  { %v3005_v28 = vpop.xlane.xlu1 %3004 }
0x14b8   :  { %v3009_v29 = vsub.f32 %v3001_v19, %v3005_v28 }
0x14ba   :  { %v3011_v31 = vmul.f32 1.442695, %v3009_v29  ;;  %v3346_v29 = vld [vmem:[%s7585_s14] sm:$0xff] }
0x14bb   :  { %v3008_v6 = vpop.xlane.xlu0 %3007 }
0x14bc   :  { %6355 = vpow2.f32 %v3011_v31  ;;  %v3010_v32 = vsub.f32 %v3002_v24, %v3008_v6  ;;  %v3371_v24 = vld [vmem:[%s7585_s14 + $0xc8] sm:$0xff]  ;;  %v3354_v31 = vld [vmem:[%s7585_s14 + $0x40] sm:$0xff] }
0x14bd   :  { %v5512_v27 = vcombine.low %v3363_v22, %v3371_v24  ;;  %v5513_v28 = vcombine.high %v3363_v22, %v3371_v24  ;;  %v3347_v6 = vld [vmem:[%s7585_s14 + $0x8] sm:$0xff]  ;;  %v3369_v22 = vld [vmem:[%s7585_s14 + $0xb8] sm:$0xff] }
0x14be   :  { %v3013_v36 = vmul.f32 1.442695, %v3010_v32  ;;  %v5495_v32 = vcombine.high %v3346_v29, %v3354_v31 }
0x14c0   :  { %6357 = vpow2.f32 %v3013_v36  ;;  %v3355_v36 = vld [vmem:[%s7585_s14 + $0x48] sm:$0xff] }
0x14c9   :  { %v6356_v37 = vpop.eup %6355 }
0x14ca   :  { %v3015_v38 = vsel %vm166_vm2, %v6356_v37, 0.0 }
0x14cb   :  { %3016 = vadd.xlane.f32.xlu0 %v3015_v38  ;;  %v5496_v38 = vcombine.low %v3347_v6, %v3355_v36 }
0x14cd   :  { %v6358_v39 = vpop.eup %6357 }
0x14ce   :  { %v3018_v40 = vsel %vm166_vm2, %v6358_v39, 0.0 }
0x14cf   :  { %3019 = vadd.xlane.f32.xlu1 %v3018_v40  ;;  %v3364_v40 = vld [vmem:[%s7585_s14 + $0x90] sm:$0xff] }
0x14e0   :  { %3101 = vrot.lane.b32.xlu1 %v6754_v34, %s7613_s6 }
0x14e1   :  { %3025 = vrot.lane.b32.xlu0 %v6747_v30, %s7613_s6 }
0x14e4   :  { %3179 = vrot.lane.b32.xlu1 %v6841_v43, %s7614_s7 }
0x14e5   :  { %3181 = vrot.lane.b32.xlu0 %v6843_v44, %s7614_s7  ;;  %v3210_v44 = vld [vmem:[%s7583_s10 + $0x18] sm:$0xff] }
0x14e8   :  { %3187 = vrot.lane.b32.xlu1 %v2765_v15, %s7615_s23 }
0x14e9   :  { %3189 = vrot.lane.b32.xlu0 %v2841_v17, %s7615_s23 }
0x1554   :  { %v3017_v41 = vpop.xlane.xlu0 %3016 }
0x1555   :  { %6359 = vrcp.f32 %v3017_v41  ;;  %v3372_v41 = vld [vmem:[%s7585_s14 + $0xd0] sm:$0xff] }
0x1558   :  { %v3020_v42 = vpop.xlane.xlu1 %3019  ;;  %v3026_v48 = vpop.permute.xlu0 %3025 }
0x1559   :  { %6361 = vrcp.f32 %v3020_v42  ;;  %6130 = vmatpush3.msra.mxu0 %v3026_v48  ;;  %v3365_v42 = vld [vmem:[%s7585_s14 + $0x98] sm:$0xff]  ;;  %v6387_v48 = vmov 0  }
0x155a   :  { %6139 = vmatprep.subr.mxu0 %v3210_v44 }
0x155c   :  { %v3102_v34 = vpop.permute.xlu1 %3101  ;;  %v3182_v5 = vpop.permute.xlu0 %3181 }
0x155d   :  { %6135 = vmatpush3.msra.mxu1 %v3102_v34  ;;  %v3202_v61 = vsel %vm166_vm2, %v6805_v3, %v3182_v5  ;;  %v5515_v34 = vcombine.high %v3364_v40, %v3372_v41 }
0x1560   :  { %v3180_v2 = vpop.permute.xlu1 %3179  ;;  %v3190_v57 = vpop.permute.xlu0 %3189 }
0x1561   :  { %v3201_v56 = vsel %vm166_vm2, %v6803_v0, %v3180_v2  ;;  %v3204_v62 = vsel %vm1516_vm4, %v3202_v61, %v3190_v57  ;;  %v5489_v0 = vld [vmem:[%s7584_s11] ss:$0 sm:$0xff]  ;;  %v3349_v61 = vld [vmem:[%s7585_s14 + $0x18] sm:$0xff] }
0x1562   :  { %v6360_v45 = vpop.eup %6359  ;;  %v5493_v57 = vld [vmem:[%s7588_s13] ss:$0 sm:$0xff] }
0x1563   :  { %v3023_v30 = vmul.f32 %v6360_v45, %v6356_v37  ;;  %v5494_v37 = vcombine.low %v3346_v29, %v3354_v31  ;;  %v3373_v45 = vld [vmem:[%s7585_s14 + $0xd8] sm:$0xff]  ;;  %v3352_v29 = vld [vmem:[%s7585_s14 + $0x30] sm:$0xff] }
0x1564   :  { %v3188_v55 = vpop.permute.xlu1 %3187  ;;  %v3360_v31 = vld [vmem:[%s7585_s14 + $0x70] sm:$0xff] }
0x1565   :  { %6132 = vmatmul.mubr.msk.f32.vlgmr.msra.gmra.mxu0 %vm166_vm2, %v3023_v30  ;;  %v3203_v58 = vsel %vm1516_vm4, %v3201_v56, %v3188_v55  ;;  %v5514_v30 = vcombine.low %v3364_v40, %v3372_v41  ;;  %v5506_v40 = vcombine.low %v3352_v29, %v3360_v31 }
0x1566   :  { %v6362_v43 = vpop.eup %6361  ;;  %6140 = vmatpush3.msra.mxu0 %v3210_v44 }
0x1567   :  { %v3024_v46 = vmul.f32 %v6362_v43, %v6358_v39  ;;  %6141 = vmatprep.subr.mxu0 %v3209_v47  ;;  %v5497_v39 = vcombine.high %v3347_v6, %v3355_v36  ;;  %v5516_v43 = vcombine.low %v3365_v42, %v3373_v45  ;;  %v3353_v6 = vld [vmem:[%s7585_s14 + $0x38] sm:$0xff] }
0x1568   :  { %6142 = vmatpush3.msra.mxu0 %v3209_v47 }
0x1569   :  { %6137 = vmatmul.mubr.msk.f32.vlgmr.msra.gmra.mxu1 %vm166_vm2, %v3024_v46  ;;  %6143 = vmatprep.subr.mxu0 %v3208_v49  ;;  %v5517_v46 = vcombine.high %v3365_v42, %v3373_v45  ;;  %v6167_v42 = vld [vmem:[%s7586_s16 + $0x78] sm:$0xff]  }
0x156a   :  { %6144 = vmatpush3.msra.mxu0 %v3208_v49  ;;  %3657 = vmatprep.mubr.bf16.mxu1 %v6387_v48  ;;  %v6169_v45 = vld [vmem:[%s7586_s16 + $0x38] sm:$0xff]  }
0x156b   :  { %6145 = vmatprep.subr.mxu0 %v3207_v51 }
0x156c   :  { %6146 = vmatpush3.msra.mxu0 %v3207_v51 }
0x156d   :  { %3680 = vmatprep.subr.bf16.mxu0 %v5513_v28 }
0x1625   :  { %v3097_v50 = vpop.f32.mrf.mxu0 }
0x1626   :  { %3195 = vrot.lane.b32.xlu1 %v3097_v50, %s6386_s0 }
0x1627   :  { %v6133_v52 = vpop.f32.mrf.mxu0 }
0x1629   :  { %v3173_v53 = vpop.f32.mrf.mxu1 }
0x162a   :  { %3197 = vrot.lane.b32.xlu0 %v3173_v53, %s6386_s0  ;;  %v5492_v53 = vld [vmem:[%s7587_s12] ss:$0 sm:$0xff] }
0x162b   :  { %v6138_v54 = vpop.f32.mrf.mxu1 }
0x1698   :  { %v3196_v59 = vpop.permute.xlu1 %3195 }
0x1699   :  { %v3205_v60 = vsel %vm1519_vm3, %v3203_v58, %v3196_v59  ;;  %v3348_v59 = vld [vmem:[%s7585_s14 + $0x10] sm:$0xff] }
0x169a   :  { %6147 = vmatprep.mubr.msk.f32.mxu0 %vm81_vm0, %v3205_v60  ;;  %v3356_v60 = vld [vmem:[%s7585_s14 + $0x50] sm:$0xff] }
0x169c   :  { %v3198_v63 = vpop.permute.xlu0 %3197 }
0x169d   :  { %v3206_v1 = vsel %vm1519_vm3, %v3204_v62, %v3198_v63  ;;  %v3357_v62 = vld [vmem:[%s7585_s14 + $0x58] sm:$0xff] }
0x169e   :  { %6148 = vmatmul.mubr.msk.f32.vlgmr.msra.gmra.mxu0 %vm81_vm0, %v3206_v1 }
0x169f   :  { %3681 = vmatpush1.bf16.msra.mxu0 %v5512_v27  ;;  %3700 = vmatprep.mubr.bf16.mxu0 %v6387_v48 }
0x16a0   :  { %3682 = vmatprep.subr.bf16.mxu0 %v5497_v39 }
0x16a3   :  { %3683 = vmatpush1.bf16.msra.mxu0 %v5496_v38  ;;  %v5507_v38 = vcombine.high %v3352_v29, %v3360_v31 }
0x16a4   :  { %3766 = vmatprep.subr.bf16.mxu0 %v5517_v46  ;;  %v6173_v46 = vld [vmem:[%s7586_s16 + $0x30] sm:$0xff]  }
0x175e   :  { %v6149_v4 = vpop.f32.mrf.mxu0 }
0x175f   :  { %v3296_v7 = vadd.f32 %v6149_v4, %v5489_v0  ;;  %v5499_v4 = vcombine.high %v3348_v59, %v3356_v60 }
0x1760   :  { %v3290_v8 = vpop.f32.mrf.mxu0 }
0x1761   :  { %v3291_v9 = vadd.f32 %v5489_v0, %v3290_v8  ;;  %v3300_v12 = vadd.f32 %v3296_v7, %v6739_v26  ;;  %v5501_v7 = vcombine.high %v3349_v61, %v3357_v62  ;;  %v3366_v8 = vld [vmem:[%s7585_s14 + $0xa0] sm:$0xff] }
0x1763   :  { %v3299_v13 = vadd.f32 %v3291_v9, %v6737_v25  ;;  %v3306_v3 = vsel %vm81_vm0, %v3300_v12, 0.0  ;;  %v3362_v25 = vld [vmem:[%s7585_s14 + $0x80] sm:$0xff] }
0x1764   :  { %3307 = vadd.xlane.f32.xlu0 %v3306_v3  ;;  %v5511_v23 = vcombine.high %v3362_v25, %v3370_v21  ;;  %v5510_v11 = vcombine.low %v3362_v25, %v3370_v21  ;;  %v3374_v9 = vld [vmem:[%s7585_s14 + $0xe0] sm:$0xff]  ;;  %v5498_v3 = vcombine.low %v3348_v59, %v3356_v60  ;;  %v3368_v25 = vld [vmem:[%s7585_s14 + $0xb0] sm:$0xff] }
0x1765   :  { %v3303_v14 = vsel %vm81_vm0, %v3299_v13, 0.0  ;;  %v3376_v21 = vld [vmem:[%s7585_s14 + $0xf0] sm:$0xff] }
0x1766   :  { %3304 = vadd.xlane.f32.xlu1 %v3303_v14  ;;  %3637 = vmatprep.subr.bf16.mxu1 %v5511_v23  ;;  %v5500_v14 = vcombine.low %v3349_v61, %v3357_v62  ;;  %v3377_v23 = vld [vmem:[%s7585_s14 + $0xf8] sm:$0xff]  ;;  %v5523_v27 = vcombine.high %v3368_v25, %v3376_v21  ;;  %v5522_v36 = vcombine.low %v3368_v25, %v3376_v21  ;;  %v6188_v59 = vld [vmem:[%s7586_s16 + $0xd0] sm:$0xff]   ;;  %v6191_v62 = vld [vmem:[%s7586_s16 + $0x48] sm:$0xff]  }
0x1767   :  { %3638 = vmatpush1.bf16.msra.mxu1 %v5510_v11  ;;  %v5525_v28 = vcombine.high %v3369_v22, %v3377_v23  ;;  %v6189_v60 = vld [vmem:[%s7586_s16 + $0x10] sm:$0xff]  }
0x1768   :  { %3639 = vmatprep.subr.bf16.mxu1 %v5495_v32  ;;  %v3361_v32 = vld [vmem:[%s7585_s14 + $0x78] sm:$0xff]  ;;  %v6190_v61 = vld [vmem:[%s7586_s16 + $0x90] sm:$0xff]  }
0x1769   :  { %v5509_v39 = vcombine.high %v3353_v6, %v3361_v32  ;;  %v5508_v41 = vcombine.low %v3353_v6, %v3361_v32 }
0x176b   :  { %3640 = vmatpush1.bf16.msra.mxu1 %v5494_v37  ;;  %v5524_v37 = vcombine.low %v3369_v22, %v3377_v23 }
0x176c   :  { %3723 = vmatprep.subr.bf16.mxu1 %v5515_v34  ;;  %v6168_v34 = vld [vmem:[%s7586_s16 + $0xf8] sm:$0xff]  }
0x17ed   :  { %v3308_v33 = vpop.xlane.xlu0 %3307 }
0x17ee   :  { %v3310_v35 = vmul.f32 0.03125, %v3308_v33  ;;  %v5519_v33 = vcombine.high %v3366_v8, %v3374_v9 }
0x17ef   :  { %v3305_v10 = vpop.xlane.xlu1 %3304 }
0x17f0   :  { %v3312_v15 = vsub.f32 %v3300_v12, %v3310_v35  ;;  %v3309_v16 = vmul.f32 0.03125, %v3305_v10  ;;  %v3367_v12 = vld [vmem:[%s7585_s14 + $0xa8] sm:$0xff]  ;;  %v3350_v10 = vld [vmem:[%s7585_s14 + $0x20] sm:$0xff] }
0x17f2   :  { %v3311_v17 = vsub.f32 %v3299_v13, %v3309_v16  ;;  %v3314_v18 = vmul.f32 %v3312_v15, %v3312_v15  ;;  %v3375_v13 = vld [vmem:[%s7585_s14 + $0xe8] sm:$0xff] }
0x17f3   :  { %v5521_v35 = vcombine.high %v3367_v12, %v3375_v13  ;;  %v3351_v16 = vld [vmem:[%s7585_s14 + $0x28] sm:$0xff] }
0x17f4   :  { %v3318_v19 = vsel %vm81_vm0, %v3314_v18, 0.0  ;;  %v3313_v20 = vmul.f32 %v3311_v17, %v3311_v17  ;;  %v5518_v18 = vcombine.low %v3366_v8, %v3374_v9  ;;  %v6195_v8 = vld [vmem:[%s7586_s16 + $0x40] sm:$0xff]  }
0x17f5   :  { %3319 = vadd.xlane.f32.xlu1 %v3318_v19  ;;  %v5520_v19 = vcombine.low %v3367_v12, %v3375_v13  ;;  %v6196_v9 = vld [vmem:[%s7586_s16 + $0xc0] sm:$0xff]  }
0x17f6   :  { %v3315_v26 = vsel %vm81_vm0, %v3313_v20, 0.0  ;;  %v6197_v12 = vld [vmem:[%s7586_s16] sm:$0xff]  }
0x17f7   :  { %3316 = vadd.xlane.f32.xlu0 %v3315_v26  ;;  %v6198_v13 = vld [vmem:[%s7586_s16 + $0x80] sm:$0xff]  }
0x187e   :  { %v3320_v44 = vpop.xlane.xlu1 %3319 }
0x187f   :  { %v3322_v47 = vmul.f32 0.03125, %v3320_v44  ;;  %v6174_v44 = vld [vmem:[%s7586_s16 + $0xb0] sm:$0xff]  }
0x1880   :  { %v3317_v49 = vpop.xlane.xlu0 %3316 }
0x1881   :  { %v3324_v51 = vadd.f32 1e-05, %v3322_v47  ;;  %v3321_v50 = vmul.f32 0.03125, %v3317_v49  ;;  %v6175_v47 = vld [vmem:[%s7586_s16 + $0x68] sm:$0xff]  }
0x1882   :  { %v6176_v49 = vld [vmem:[%s7586_s16 + $0xe8] sm:$0xff]  }
0x1883   :  { %6363 = vrsqrt.f32 %v3324_v51  ;;  %v3323_v52 = vadd.f32 1e-05, %v3321_v50  ;;  %v6177_v51 = vld [vmem:[%s7586_s16 + $0x28] sm:$0xff]  }
0x1884   :  { %v6178_v50 = vld [vmem:[%s7586_s16 + $0xa8] sm:$0xff]  }
0x1885   :  { %6365 = vrsqrt.f32 %v3323_v52  ;;  %v6179_v52 = vld [vmem:[%s7586_s16 + $0x60] sm:$0xff]  }
0x1890   :  { %v6364_v54 = vpop.eup %6363 }
0x1891   :  { %v3328_v2 = vmul.f32 %v6364_v54, %v3312_v15  ;;  %v3358_v15 = vld [vmem:[%s7585_s14 + $0x60] sm:$0xff] }
0x1892   :  { %v6366_v5 = vpop.eup %6365  ;;  %v5503_v20 = vcombine.high %v3350_v10, %v3358_v15  ;;  %v5502_v24 = vcombine.low %v3350_v10, %v3358_v15  ;;  %v6181_v54 = vld [vmem:[%s7586_s16 + $0x20] sm:$0xff]  }
0x1893   :  { %v3336_v55 = vmul.f32 %v5492_v53, %v3328_v2  ;;  %v3327_v56 = vmul.f32 %v6366_v5, %v3311_v17  ;;  %v3359_v17 = vld [vmem:[%s7585_s14 + $0x68] sm:$0xff]  ;;  %v6182_v2 = vld [vmem:[%s7586_s16 + $0xa0] sm:$0xff]   ;;  %v6183_v5 = vld [vmem:[%s7586_s16 + $0x58] sm:$0xff]  }
0x1894   :  { %v5505_v26 = vcombine.high %v3351_v16, %v3359_v17  ;;  %v5504_v11 = vcombine.low %v3351_v16, %v3359_v17 }
0x1895   :  { %v3335_v58 = vmul.f32 %v5492_v53, %v3327_v56  ;;  %v6984_v63 = vadd.f32 %v5493_v57, %v3336_v55  ;;  %v6180_v53 = vld [vmem:[%s7586_s16 + $0xe0] sm:$0xff]   ;;  %v6184_v55 = vld [vmem:[%s7586_s16 + $0xd8] sm:$0xff]  }
0x1896   :  { %v6185_v56 = vld [vmem:[%s7586_s16 + $0x18] sm:$0xff]  }
0x1897   :  { %v6986_v1 = vadd.f32 %v5493_v57, %v3335_v58  ;;  %v6186_v57 = vld [vmem:[%s7586_s16 + $0x98] sm:$0xff]   ;;  %v6187_v58 = vld [vmem:[%s7586_s16 + $0x50] sm:$0xff]  }
0x1899   :  { %v6990_v0 = vpack.c.bf16 %v6984_v63, %v6986_v1 }
0x189b   :  { %5526 = vmatmul.mubr.msk.bf16.vlgmr.msra.gmra.mxu1 %vm81_vm0, %v6990_v0  ;;  %5527 = vmatmul.mubr.msk.bf16.vlgmr.msra.gmra.mxu0 %vm81_vm0, %v6990_v0 }
0x189c   :  { %3724 = vmatpush1.bf16.msra.mxu1 %v5514_v30  ;;  %3767 = vmatpush1.bf16.msra.mxu0 %v5516_v43  ;;  %v6170_v30 = vld [vmem:[%s7586_s16 + $0xb8] sm:$0xff]   ;;  %v6171_v43 = vld [vmem:[%s7586_s16 + $0x70] sm:$0xff]  }
0x189d   :  { %3725 = vmatprep.subr.bf16.mxu1 %v5499_v4  ;;  %3768 = vmatprep.subr.bf16.mxu0 %v5501_v7  ;;  %v6193_v4 = vld [vmem:[%s7586_s16 + $0x8] sm:$0xff]  }
0x189e   :  { %3743 = vmatprep.mubr.bf16.mxu1 %v6387_v48  ;;  %3786 = vmatprep.mubr.bf16.mxu0 %v6387_v48  ;;  %v6194_v7 = vld [vmem:[%s7586_s16 + $0x88] sm:$0xff]  }
0x18a0   :  { %3726 = vmatpush1.bf16.msra.mxu1 %v5498_v3  ;;  %3769 = vmatpush1.bf16.msra.mxu0 %v5500_v14  ;;  %v6199_v3 = vld [vmem:[%s7586_s16 + $0x178] sm:$0xff]  }
0x18a1   :  { %3809 = vmatprep.subr.bf16.mxu1 %v5519_v33  ;;  %3852 = vmatprep.subr.bf16.mxu0 %v5521_v35  ;;  %v6200_v14 = vld [vmem:[%s7586_s16 + $0x1f8] sm:$0xff]   ;;  %v3382_v33 = vlaneseq }
0x18a3   :  { %5528 = vmatmul.mubr.msk.bf16.vlgmr.msra.gmra.mxu1 %vm81_vm0, %v6990_v0  ;;  %5529 = vmatmul.mubr.msk.bf16.vlgmr.msra.gmra.mxu0 %vm81_vm0, %v6990_v0  ;;  %v7164_v35 = vshrl.u32 %v3382_v33, 7 }
0x18a4   :  { %3810 = vmatpush1.bf16.msra.mxu1 %v5518_v18  ;;  %3853 = vmatpush1.bf16.msra.mxu0 %v5520_v19  ;;  %v7173_v18 = vld [vmem:[%s7589_s15] sm:$0xff] }
0x18a5   :  { %3811 = vmatprep.subr.bf16.mxu1 %v5503_v20  ;;  %3854 = vmatprep.subr.bf16.mxu0 %v5505_v26  ;;  %v3388_v10 = vsub.s32 1, %v7164_v35  ;;  %v3396_v15 = vsub.s32 3, %v7164_v35  ;;  %v3384_v16 = vsub.s32 0, %v7164_v35  ;;  %v3392_v17 = vsub.s32 2, %v7164_v35 }
0x18a6   :  { %3829 = vmatprep.mubr.bf16.mxu1 %v6387_v48  ;;  %3872 = vmatprep.mubr.bf16.mxu0 %v6387_v48  ;;  %v3412_v29 = vsub.s32 7, %v7164_v35 }
0x18a7   :  { %v3389_v26 = vrot.slane %v7173_v18, %v3388_v10  ;;  %v3397_v25 = vrot.slane %v7173_v18, %v3396_v15  ;;  %v3385_v21 = vrot.slane %v7173_v18, %v3384_v16  ;;  %v3393_v22 = vrot.slane %v7173_v18, %v3392_v17 }
0x18a8   :  { %3812 = vmatpush1.bf16.msra.mxu1 %v5502_v24  ;;  %3855 = vmatpush1.bf16.msra.mxu0 %v5504_v11 }
0x18a9   :  { %3895 = vmatprep.subr.bf16.mxu1 %v5523_v27  ;;  %3938 = vmatprep.subr.bf16.mxu0 %v5525_v28  ;;  %v3404_v28 = vsub.s32 5, %v7164_v35 }
0x18ab   :  { %5530 = vmatmul.mubr.msk.bf16.vlgmr.msra.gmra.mxu1 %vm81_vm0, %v6990_v0  ;;  %5531 = vmatmul.mubr.msk.bf16.vlgmr.msra.gmra.mxu0 %vm81_vm0, %v6990_v0 }
0x18ac   :  { %3896 = vmatpush1.bf16.msra.mxu1 %v5522_v36  ;;  %3939 = vmatpush1.bf16.msra.mxu0 %v5524_v37 }
0x18ad   :  { %3897 = vmatprep.subr.bf16.mxu1 %v5507_v38  ;;  %3940 = vmatprep.subr.bf16.mxu0 %v5509_v39 }
0x18ae   :  { %3915 = vmatprep.mubr.bf16.mxu1 %v6387_v48  ;;  %3958 = vmatprep.mubr.bf16.mxu0 %v6387_v48  ;;  %v6172_v48 = vld [vmem:[%s7586_s16 + $0xf0] sm:$0xff]  }
0x18b0   :  { %3898 = vmatpush1.bf16.msra.mxu1 %v5506_v40  ;;  %3941 = vmatpush1.bf16.msra.mxu0 %v5508_v41 }
0x18b1   :  { %5759 = vmatprep.subr.bf16.mxu1 %v6167_v42  ;;  %5781 = vmatprep.subr.bf16.mxu0 %v6168_v34 }
0x18b3   :  { %5532 = vmatmul.mubr.msk.bf16.vlgmr.msra.gmra.mxu1 %vm81_vm0, %v6990_v0  ;;  %5533 = vmatmul.mubr.msk.bf16.vlgmr.msra.gmra.mxu0 %vm81_vm0, %v6990_v0  ;;  %v6192_v0 = vld [vmem:[%s7586_s16 + $0xc8] sm:$0xff]  }
0x18b4   :  { %5760 = vmatpush3.bf16.msra.mxu1 %v6169_v45  ;;  %5782 = vmatpush3.bf16.msra.mxu0 %v6170_v30 }
0x18b5   :  { %5761 = vmatprep.subr.bf16.mxu1 %v6171_v43  ;;  %5783 = vmatprep.subr.bf16.mxu0 %v6172_v48  ;;  %v3405_v48 = vrot.slane %v7173_v18, %v3404_v28 }
0x18b8   :  { %5762 = vmatpush3.bf16.msra.mxu1 %v6173_v46  ;;  %5784 = vmatpush3.bf16.msra.mxu0 %v6174_v44  ;;  %v3413_v46 = vrot.slane %v7173_v18, %v3412_v29 }
0x18b9   :  { %5763 = vmatprep.subr.bf16.mxu1 %v6175_v47  ;;  %5785 = vmatprep.subr.bf16.mxu0 %v6176_v49 }
0x18bc   :  { %5764 = vmatpush3.bf16.msra.mxu1 %v6177_v51  ;;  %5786 = vmatpush3.bf16.msra.mxu0 %v6178_v50 }
0x18bd   :  { %5765 = vmatprep.subr.bf16.mxu1 %v6179_v52  ;;  %5787 = vmatprep.subr.bf16.mxu0 %v6180_v53 }
0x18c0   :  { %5766 = vmatpush3.bf16.msra.mxu1 %v6181_v54  ;;  %5788 = vmatpush3.bf16.msra.mxu0 %v6182_v2 }
0x18c1   :  { %5767 = vmatprep.subr.bf16.mxu1 %v6183_v5  ;;  %5789 = vmatprep.subr.bf16.mxu0 %v6184_v55  ;;  %v6201_v55 = vld [vmem:[%s7586_s16 + $0x138] sm:$0xff]  }
0x18c4   :  { %5768 = vmatpush3.bf16.msra.mxu1 %v6185_v56  ;;  %5790 = vmatpush3.bf16.msra.mxu0 %v6186_v57  ;;  %v6202_v56 = vld [vmem:[%s7586_s16 + $0x1b8] sm:$0xff]  }
0x18c5   :  { %5769 = vmatprep.subr.bf16.mxu1 %v6187_v58  ;;  %5791 = vmatprep.subr.bf16.mxu0 %v6188_v59 }
0x18c8   :  { %5770 = vmatpush3.bf16.msra.mxu1 %v6189_v60  ;;  %5792 = vmatpush3.bf16.msra.mxu0 %v6190_v61  ;;  %v6203_v61 = vld [vmem:[%s7586_s16 + $0x170] sm:$0xff]  }
0x18c9   :  { %5771 = vmatprep.subr.bf16.mxu1 %v6191_v62  ;;  %5793 = vmatprep.subr.bf16.mxu0 %v6192_v0  ;;  %v6204_v62 = vld [vmem:[%s7586_s16 + $0x1f0] sm:$0xff]  }
0x18cc   :  { %5772 = vmatpush3.bf16.msra.mxu1 %v6193_v4  ;;  %5794 = vmatpush3.bf16.msra.mxu0 %v6194_v7 }
0x18cd   :  { %5773 = vmatprep.subr.bf16.mxu1 %v6195_v8  ;;  %5795 = vmatprep.subr.bf16.mxu0 %v6196_v9 }
0x18d0   :  { %5774 = vmatpush3.bf16.msra.mxu1 %v6197_v12  ;;  %5796 = vmatpush3.bf16.msra.mxu0 %v6198_v13  ;;  %v6205_v13 = vld [vmem:[%s7586_s16 + $0x130] sm:$0xff]  }
0x18d1   :  { %5803 = vmatprep.subr.bf16.mxu1 %v6199_v3  ;;  %5825 = vmatprep.subr.bf16.mxu0 %v6200_v14  ;;  %v6206_v3 = vld [vmem:[%s7586_s16 + $0x1b0] sm:$0xff]   ;;  %v6207_v14 = vld [vmem:[%s7586_s16 + $0x168] sm:$0xff]  }
0x195b   :  { %v3659_v19 = vpop.f32.mrf.mxu1  ;;  %v3702_v20 = vpop.f32.mrf.mxu0 }
0x195c   :  { %v3660_v37 = vadd.f32 %v3659_v19, %v3385_v21  ;;  %v3703_v38 = vadd.f32 %v3702_v20, %v3393_v22 }
0x195d   :  { %v3661_v23 = vpop.f32.mrf.mxu1  ;;  %v3704_v24 = vpop.f32.mrf.mxu0 }
0x195e   :  { %v3662_v31 = vadd.f32 %v3661_v23, %v3389_v26  ;;  %v3705_v6 = vadd.f32 %v3704_v24, %v3397_v25  ;;  %v3969_v50 = vmax.f32 %v3660_v37, 0.0  ;;  %v3971_v52 = vmax.f32 %v3703_v38, 0.0  ;;  %v6209_v23 = vld [vmem:[%s7586_s16 + $0x128] sm:$0xff]   ;;  %v6215_v37 = vld [vmem:[%s7586_s16 + $0x158] sm:$0xff]  }
0x195f   :  { %v3663_v11 = vpop.f32.mrf.mxu1  ;;  %v3706_v27 = vpop.f32.mrf.mxu0  ;;  %v6210_v24 = vld [vmem:[%s7586_s16 + $0x1a8] sm:$0xff]   ;;  %v6216_v38 = vld [vmem:[%s7586_s16 + $0x1d8] sm:$0xff]  }
0x1960   :  { %v3664_v32 = vadd.f32 %v3663_v11, %v3385_v21  ;;  %v3707_v36 = vadd.f32 %v3706_v27, %v3393_v22  ;;  %v3970_v44 = vmax.f32 %v3662_v31, 0.0  ;;  %v3972_v47 = vmax.f32 %v3705_v6, 0.0  ;;  %v6211_v11 = vld [vmem:[%s7586_s16 + $0x160] sm:$0xff]  }
0x1961   :  { %v3665_v39 = vpop.f32.mrf.mxu1  ;;  %v3708_v40 = vpop.f32.mrf.mxu0  ;;  %v6212_v27 = vld [vmem:[%s7586_s16 + $0x1e0] sm:$0xff]  }
0x1962   :  { %v3666_v41 = vadd.f32 %v3665_v39, %v3389_v26  ;;  %v3709_v42 = vadd.f32 %v3708_v40, %v3397_v25  ;;  %v3985_v34 = vmax.f32 %v3664_v32, 0.0  ;;  %v3987_v45 = vmax.f32 %v3707_v36, 0.0  ;;  %v6208_v25 = vld [vmem:[%s7586_s16 + $0x1e8] sm:$0xff]   ;;  %v6213_v6 = vld [vmem:[%s7586_s16 + $0x120] sm:$0xff]   ;;  %v6217_v40 = vld [vmem:[%s7586_s16 + $0x118] sm:$0xff]  }
0x1963   :  { %v7189_v30 = vpop.f32.mrf.mxu1  ;;  %v7191_v43 = vpop.f32.mrf.mxu0  ;;  %v6214_v36 = vld [vmem:[%s7586_s16 + $0x1a0] sm:$0xff]  }
0x1964   :  { %v3986_v49 = vmax.f32 %v3666_v41, 0.0  ;;  %v3988_v51 = vmax.f32 %v3709_v42, 0.0  ;;  %v4001_v57 = vpack.c.bf16 %v3985_v34, %v3969_v50  ;;  %v4003_v58 = vpack.c.bf16 %v3987_v45, %v3971_v52  ;;  %v6218_v42 = vld [vmem:[%s7586_s16 + $0x198] sm:$0xff]   ;;  %v6219_v34 = vld [vmem:[%s7586_s16 + $0x150] sm:$0xff]   ;;  %v6223_v50 = vld [vmem:[%s7586_s16 + $0x148] sm:$0xff]  }
0x1965   :  { %v3747_v53 = vpop.f32.mrf.mxu1  ;;  %v3790_v54 = vpop.f32.mrf.mxu0  ;;  %v6220_v45 = vld [vmem:[%s7586_s16 + $0x1d0] sm:$0xff]   ;;  %v6224_v52 = vld [vmem:[%s7586_s16 + $0x1c8] sm:$0xff]  }
0x1966   :  { %v4002_v2 = vpack.c.bf16 %v3986_v49, %v3970_v44  ;;  %v4004_v5 = vpack.c.bf16 %v3988_v51, %v3972_v47  ;;  %v3748_v0 = vadd.f32 %v3747_v53, %v3405_v48  ;;  %v3791_v4 = vadd.f32 %v3790_v54, %v3413_v46  ;;  %v6221_v47 = vld [vmem:[%s7586_s16 + $0x110] sm:$0xff]  }
0x1967   :  { %v7205_v59 = vpop.f32.mrf.mxu1  ;;  %v7207_v60 = vpop.f32.mrf.mxu0  ;;  %v6222_v51 = vld [vmem:[%s7586_s16 + $0x190] sm:$0xff]  }
0x1968   :  { %5080 = vmatprep.mubr.bf16.mxu1 %v4002_v2  ;;  %5121 = vmatprep.mubr.bf16.mxu0 %v4004_v5  ;;  %v3974_v33 = vmax.f32 %v3748_v0, 0.0  ;;  %v3976_v19 = vmax.f32 %v3791_v4, 0.0  ;;  %v7294_v2 = vld [vmem:[%s7589_s15 + $0x8] sm:$0xff] }
0x1969   :  { %v3751_v7 = vpop.f32.mrf.mxu1  ;;  %v3794_v8 = vpop.f32.mrf.mxu0  ;;  %5081 = vmatmul.mubr.bf16.vlgmr.msra.gmra.mxu1 %v4001_v57  ;;  %5122 = vmatmul.mubr.bf16.vlgmr.msra.gmra.mxu0 %v4003_v58  ;;  %v3421_v57 = vrot.slane %v7294_v2, %v3388_v10  ;;  %v6228_v10 = vld [vmem:[%s7586_s16 + $0x1c0] sm:$0xff]  }
0x196a   :  { %v3752_v9 = vadd.f32 %v3751_v7, %v3405_v48  ;;  %v3795_v12 = vadd.f32 %v3794_v8, %v3413_v46  ;;  %5804 = vmatpush3.bf16.msra.mxu1 %v6201_v55  ;;  %5826 = vmatpush3.bf16.msra.mxu0 %v6202_v56  ;;  %v3400_v48 = vsub.s32 4, %v7164_v35  ;;  %v3408_v46 = vsub.s32 6, %v7164_v35  ;;  %v6225_v55 = vld [vmem:[%s7586_s16 + $0x108] sm:$0xff]  }
0x196b   :  { %5805 = vmatprep.subr.bf16.mxu1 %v6203_v61  ;;  %5827 = vmatprep.subr.bf16.mxu0 %v6204_v62  ;;  %v7239_v31 = vpop.f32.mrf.mxu1  ;;  %v7244_v32 = vpop.f32.mrf.mxu0  ;;  %v6227_v61 = vld [vmem:[%s7586_s16 + $0x140] sm:$0xff]  }
0x196c   :  { %v3990_v20 = vmax.f32 %v3752_v9, 0.0  ;;  %v3992_v26 = vmax.f32 %v3795_v12, 0.0  ;;  %v3401_v53 = vrot.slane %v7173_v18, %v3400_v48  ;;  %v3409_v54 = vrot.slane %v7173_v18, %v3408_v46  ;;  %v6226_v18 = vld [vmem:[%s7586_s16 + $0x188] sm:$0xff]  }
0x196d   :  { %v3833_v39 = vpop.f32.mrf.mxu1  ;;  %v3876_v41 = vpop.f32.mrf.mxu0 }
0x196e   :  { %v4006_v21 = vpack.c.bf16 %v3990_v20, %v3974_v33  ;;  %v4008_v22 = vpack.c.bf16 %v3992_v26, %v3976_v19  ;;  %5806 = vmatpush3.bf16.msra.mxu1 %v6205_v13  ;;  %5828 = vmatpush3.bf16.msra.mxu0 %v6206_v3  ;;  %v3750_v56 = vadd.f32 %v7205_v59, %v3401_v53  ;;  %v6232_v3 = vld [vmem:[%s7586_s16 + $0x2f8] sm:$0xff]  }
0x196f   :  { %5807 = vmatprep.subr.bf16.mxu1 %v6207_v14  ;;  %5829 = vmatprep.subr.bf16.mxu0 %v6208_v25  ;;  %v7269_v44 = vpop.f32.mrf.mxu1  ;;  %v7274_v49 = vpop.f32.mrf.mxu0  ;;  %v3793_v62 = vadd.f32 %v7207_v60, %v3409_v54  ;;  %v3429_v59 = vrot.slane %v7294_v2, %v3396_v15  ;;  %v3746_v0 = vadd.f32 %v7189_v30, %v3401_v53  ;;  %v6229_v60 = vld [vmem:[%s7586_s16 + $0x100] sm:$0xff]   ;;  %v6231_v30 = vld [vmem:[%s7586_s16 + $0x278] sm:$0xff]  }
0x1970   :  { %5162 = vmatprep.mubr.bf16.mxu1 %v4006_v21  ;;  %5203 = vmatprep.mubr.bf16.mxu0 %v4008_v22  ;;  %v3789_v7 = vadd.f32 %v7191_v43, %v3409_v54  ;;  %v3989_v9 = vmax.f32 %v3750_v56, 0.0  ;;  %v3834_v12 = vadd.f32 %v3833_v39, %v3421_v57  ;;  %v6230_v15 = vld [vmem:[%s7586_s16 + $0x180] sm:$0xff]   ;;  %v6233_v26 = vld [vmem:[%s7586_s16 + $0x238] sm:$0xff]   ;;  %v6239_v39 = vld [vmem:[%s7586_s16 + $0x268] sm:$0xff]  }
0x1971   :  { %v3837_v5 = vpop.f32.mrf.mxu1  ;;  %v3880_v58 = vpop.f32.mrf.mxu0  ;;  %v3991_v13 = vmax.f32 %v3793_v62, 0.0  ;;  %v3877_v43 = vadd.f32 %v3876_v41, %v3429_v59  ;;  %v3973_v14 = vmax.f32 %v3746_v0, 0.0  ;;  %v6234_v22 = vld [vmem:[%s7586_s16 + $0x2b8] sm:$0xff]   ;;  %v6241_v41 = vld [vmem:[%s7586_s16 + $0x228] sm:$0xff]   ;;  %v6253_v62 = vld [vmem:[%s7586_s16 + $0x210] sm:$0xff]  }
0x1972   :  { %5808 = vmatpush3.bf16.msra.mxu1 %v6209_v23  ;;  %5830 = vmatpush3.bf16.msra.mxu0 %v6210_v24  ;;  %v3838_v4 = vadd.f32 %v3837_v5, %v3421_v57  ;;  %v3881_v8 = vadd.f32 %v3880_v58, %v3429_v59  ;;  %v3975_v19 = vmax.f32 %v3789_v7, 0.0  ;;  %v3978_v21 = vmax.f32 %v3834_v12, 0.0  ;;  %v6247_v53 = vld [vmem:[%s7586_s16 + $0x258] sm:$0xff]   ;;  %v6251_v58 = vld [vmem:[%s7586_s16 + $0x250] sm:$0xff]   ;;  %v6255_v0 = vld [vmem:[%s7586_s16 + $0x248] sm:$0xff]  }
0x1973   :  { %5809 = vmatprep.subr.bf16.mxu1 %v6211_v11  ;;  %5831 = vmatprep.subr.bf16.mxu0 %v6212_v27  ;;  %v4005_v25 = vpack.c.bf16 %v3989_v9, %v3973_v14  ;;  %v3980_v24 = vmax.f32 %v3877_v43, 0.0  ;;  %v6235_v11 = vld [vmem:[%s7586_s16 + $0x270] sm:$0xff]   ;;  %v6248_v54 = vld [vmem:[%s7586_s16 + $0x2d8] sm:$0xff]   ;;  %v3417_v7 = vrot.slane %v7294_v2, %v3384_v16  ;;  %v6257_v9 = vld [vmem:[%s7586_s16 + $0x208] sm:$0xff]  }
0x1974   :  { %v3994_v33 = vmax.f32 %v3838_v4, 0.0  ;;  %v3996_v20 = vmax.f32 %v3881_v8, 0.0  ;;  %v4007_v23 = vpack.c.bf16 %v3991_v13, %v3975_v19  ;;  %v6250_v57 = vld [vmem:[%s7586_s16 + $0x298] sm:$0xff]   ;;  %v6256_v4 = vld [vmem:[%s7586_s16 + $0x2c8] sm:$0xff]   ;;  %v3425_v8 = vrot.slane %v7294_v2, %v3392_v17  ;;  %v6259_v17 = vld [vmem:[%s7586_s16 + $0x240] sm:$0xff]  }
0x1975   :  { %v3836_v12 = vadd.f32 %v7269_v44, %v3417_v7  ;;  %v6258_v16 = vld [vmem:[%s7586_s16 + $0x288] sm:$0xff]   ;;  %v3445_v44 = vrot.slane %v7294_v2, %v3412_v29  ;;  %v3832_v43 = vadd.f32 %v7239_v31, %v3417_v7  ;;  %v6262_v29 = vld [vmem:[%s7586_s16 + $0x280] sm:$0xff]   ;;  %v6263_v31 = vld [vmem:[%s7586_s16 + $0x378] sm:$0xff]  }
0x1976   :  { %5810 = vmatpush3.bf16.msra.mxu1 %v6213_v6  ;;  %5832 = vmatpush3.bf16.msra.mxu0 %v6214_v36  ;;  %v4010_v27 = vpack.c.bf16 %v3994_v33, %v3978_v21  ;;  %v6236_v6 = vld [vmem:[%s7586_s16 + $0x2f0] sm:$0xff]   ;;  %v4012_v36 = vpack.c.bf16 %v3996_v20, %v3980_v24  ;;  %v3879_v13 = vadd.f32 %v7274_v49, %v3425_v8  ;;  %v6261_v49 = vld [vmem:[%s7586_s16 + $0x200] sm:$0xff]  }
0x1977   :  { %5811 = vmatprep.subr.bf16.mxu1 %v6215_v37  ;;  %5833 = vmatprep.subr.bf16.mxu0 %v6216_v38  ;;  %v6237_v37 = vld [vmem:[%s7586_s16 + $0x230] sm:$0xff]   ;;  %v3875_v14 = vadd.f32 %v7244_v32, %v3425_v8  ;;  %v3993_v19 = vmax.f32 %v3836_v12, 0.0  ;;  %v3977_v21 = vmax.f32 %v3832_v43, 0.0  ;;  %v3433_v12 = vrot.slane %v7294_v2, %v3400_v48  ;;  %v6291_v48 = vld [vmem:[%s7586_s16 + $0x340] sm:$0xff]  }
0x1978   :  { %v6238_v38 = vld [vmem:[%s7586_s16 + $0x2b0] sm:$0xff]  }
0x1979   :  { %v6285_v7 = vld [vmem:[%s7586_s16 + $0x310] sm:$0xff]  }
0x197a   :  { %5812 = vmatpush3.bf16.msra.mxu1 %v6217_v40  ;;  %5834 = vmatpush3.bf16.msra.mxu0 %v6218_v42  ;;  %v6240_v40 = vld [vmem:[%s7586_s16 + $0x2e8] sm:$0xff]   ;;  %v6286_v8 = vld [vmem:[%s7586_s16 + $0x390] sm:$0xff]  }
0x197b   :  { %5813 = vmatprep.subr.bf16.mxu1 %v6219_v34  ;;  %5835 = vmatprep.subr.bf16.mxu0 %v6220_v45  ;;  %v6242_v42 = vld [vmem:[%s7586_s16 + $0x2a8] sm:$0xff]   ;;  %v6243_v34 = vld [vmem:[%s7586_s16 + $0x260] sm:$0xff]  }
0x197c   :  { %v6244_v45 = vld [vmem:[%s7586_s16 + $0x2e0] sm:$0xff]  }
0x197e   :  { %5814 = vmatpush3.bf16.msra.mxu1 %v6221_v47  ;;  %5836 = vmatpush3.bf16.msra.mxu0 %v6222_v51  ;;  %v7366_v47 = vpop.f32.mrf.mxu1  ;;  %v6245_v51 = vld [vmem:[%s7586_s16 + $0x220] sm:$0xff]  }
0x197f   :  { %5815 = vmatprep.subr.bf16.mxu1 %v6223_v50  ;;  %5837 = vmatprep.subr.bf16.mxu0 %v6224_v52  ;;  %v7371_v50 = vpop.f32.mrf.mxu0  ;;  %v6246_v52 = vld [vmem:[%s7586_s16 + $0x2a0] sm:$0xff]  }
0x1980   :  { %v3919_v5 = vpop.f32.mrf.mxu1 }
0x1981   :  { %v3962_v56 = vpop.f32.mrf.mxu0 }
0x1982   :  { %5816 = vmatpush3.bf16.msra.mxu1 %v6225_v55  ;;  %5838 = vmatpush3.bf16.msra.mxu0 %v6226_v18  ;;  %v6249_v55 = vld [vmem:[%s7586_s16 + $0x218] sm:$0xff]   ;;  %v6252_v18 = vld [vmem:[%s7586_s16 + $0x2d0] sm:$0xff]   ;;  %v3963_v32 = vadd.f32 %v3962_v56, %v3445_v44  ;;  %v6277_v56 = vld [vmem:[%s7586_s16 + $0x320] sm:$0xff]  }
0x1983   :  { %5817 = vmatprep.subr.bf16.mxu1 %v6227_v61  ;;  %5839 = vmatprep.subr.bf16.mxu0 %v6228_v10  ;;  %v7394_v61 = vpop.f32.mrf.mxu1  ;;  %v7399_v59 = vpop.f32.mrf.mxu0  ;;  %v6254_v10 = vld [vmem:[%s7586_s16 + $0x290] sm:$0xff]  }
0x1986   :  { %5818 = vmatpush3.bf16.msra.mxu1 %v6229_v60  ;;  %5840 = vmatpush3.bf16.msra.mxu0 %v6230_v15  ;;  %v3923_v60 = vpop.f32.mrf.mxu1  ;;  %v3437_v15 = vrot.slane %v7294_v2, %v3404_v28  ;;  %v6260_v28 = vld [vmem:[%s7586_s16 + $0x2c0] sm:$0xff]  }
0x1987   :  { %5847 = vmatprep.subr.bf16.mxu1 %v6231_v30  ;;  %5869 = vmatprep.subr.bf16.mxu0 %v6232_v3  ;;  %v3966_v30 = vpop.f32.mrf.mxu0 }
0x1988   :  { %v3924_v3 = vadd.f32 %v3923_v60, %v3437_v15  ;;  %v3967_v33 = vadd.f32 %v3966_v30, %v3445_v44  ;;  %v3920_v20 = vadd.f32 %v3919_v5, %v3437_v15  ;;  %v6275_v5 = vld [vmem:[%s7586_s16 + $0x360] sm:$0xff]   ;;  %v6287_v60 = vld [vmem:[%s7586_s16 + $0x348] sm:$0xff]   ;;  %v3441_v15 = vrot.slane %v7294_v2, %v3408_v46 }
0x1989   :  { %5163 = vmatmul.mubr.bf16.vlgmr.msra.gmra.mxu1 %v4005_v25  ;;  %5204 = vmatmul.mubr.bf16.vlgmr.msra.gmra.mxu0 %v4007_v23  ;;  %v6264_v25 = vld [vmem:[%s7586_s16 + $0x3f8] sm:$0xff]   ;;  %v3979_v23 = vmax.f32 %v3875_v14, 0.0  ;;  %v6289_v30 = vld [vmem:[%s7586_s16 + $0x308] sm:$0xff]   ;;  %v6292_v46 = vld [vmem:[%s7586_s16 + $0x3c0] sm:$0xff]   ;;  %v3918_v2 = vadd.f32 %v7366_v47, %v3433_v12 }
0x198a   :  { %5848 = vmatpush3.bf16.msra.mxu1 %v6233_v26  ;;  %5244 = vmatprep.mubr.bf16.mxu1 %v4010_v27  ;;  %v3995_v26 = vmax.f32 %v3879_v13, 0.0  ;;  %v4000_v24 = vmax.f32 %v3967_v33, 0.0  ;;  %v4009_v27 = vpack.c.bf16 %v3993_v19, %v3977_v21  ;;  %v3965_v35 = vadd.f32 %v7399_v59, %v3441_v15  ;;  %v6293_v13 = vld [vmem:[%s7586_s16 + $0x300] sm:$0xff]  }
0x198b   :  { %5870 = vmatpush3.bf16.msra.mxu0 %v6234_v22  ;;  %5285 = vmatprep.mubr.bf16.mxu0 %v4012_v36  ;;  %v3998_v22 = vmax.f32 %v3924_v3, 0.0  ;;  %v6266_v36 = vld [vmem:[%s7586_s16 + $0x3b8] sm:$0xff]   ;;  %v6294_v59 = vld [vmem:[%s7586_s16 + $0x380] sm:$0xff]   ;;  %v3981_v43 = vmax.f32 %v3918_v2, 0.0 }
0x198c   :  { %5849 = vmatprep.subr.bf16.mxu1 %v6235_v11  ;;  %5871 = vmatprep.subr.bf16.mxu0 %v6236_v6  ;;  %v6265_v11 = vld [vmem:[%s7586_s16 + $0x338] sm:$0xff]   ;;  %v3982_v6 = vmax.f32 %v3920_v20, 0.0 }
0x198e   :  { %5850 = vmatpush3.bf16.msra.mxu1 %v6237_v37  ;;  %v4011_v37 = vpack.c.bf16 %v3995_v26, %v3979_v23 }
0x198f   :  { %5872 = vmatpush3.bf16.msra.mxu0 %v6238_v38  ;;  %5851 = vmatprep.subr.bf16.mxu1 %v6239_v39  ;;  %v3984_v38 = vmax.f32 %v3963_v32, 0.0  ;;  %v6267_v39 = vld [vmem:[%s7586_s16 + $0x370] sm:$0xff]  }
0x1990   :  { %5873 = vmatprep.subr.bf16.mxu0 %v6240_v40  ;;  %v4014_v40 = vpack.c.bf16 %v3998_v22, %v3982_v6  ;;  %v5534_v6 = vld [vmem:[%s7590_s17] ss:$0 sm:$0xff] }
0x1992   :  { %5852 = vmatpush3.bf16.msra.mxu1 %v6241_v41  ;;  %v6268_v41 = vld [vmem:[%s7586_s16 + $0x3f0] sm:$0xff]  }
0x1993   :  { %5874 = vmatpush3.bf16.msra.mxu0 %v6242_v42  ;;  %5853 = vmatprep.subr.bf16.mxu1 %v6243_v34  ;;  %v4016_v42 = vpack.c.bf16 %v4000_v24, %v3984_v38  ;;  %v6269_v34 = vld [vmem:[%s7586_s16 + $0x330] sm:$0xff]  }
0x1994   :  { %5875 = vmatprep.subr.bf16.mxu0 %v6244_v45  ;;  %v6270_v45 = vld [vmem:[%s7586_s16 + $0x3b0] sm:$0xff]  }
0x1996   :  { %5854 = vmatpush3.bf16.msra.mxu1 %v6245_v51  ;;  %v6271_v51 = vld [vmem:[%s7586_s16 + $0x368] sm:$0xff]  }
0x1997   :  { %5876 = vmatpush3.bf16.msra.mxu0 %v6246_v52  ;;  %5855 = vmatprep.subr.bf16.mxu1 %v6247_v53  ;;  %v6272_v52 = vld [vmem:[%s7586_s16 + $0x3e8] sm:$0xff]  }
0x1998   :  { %5877 = vmatprep.subr.bf16.mxu0 %v6248_v54  ;;  %v6273_v53 = vld [vmem:[%s7586_s16 + $0x328] sm:$0xff]  }
0x1999   :  { %v6274_v54 = vld [vmem:[%s7586_s16 + $0x3a8] sm:$0xff]  }
0x199a   :  { %5856 = vmatpush3.bf16.msra.mxu1 %v6249_v55  ;;  %v6276_v55 = vld [vmem:[%s7586_s16 + $0x3e0] sm:$0xff]  }
0x199b   :  { %5878 = vmatpush3.bf16.msra.mxu0 %v6250_v57  ;;  %5857 = vmatprep.subr.bf16.mxu1 %v6251_v58  ;;  %v6278_v57 = vld [vmem:[%s7586_s16 + $0x3a0] sm:$0xff]   ;;  %v6279_v58 = vld [vmem:[%s7586_s16 + $0x358] sm:$0xff]  }
0x199c   :  { %5879 = vmatprep.subr.bf16.mxu0 %v6252_v18  ;;  %v6280_v18 = vld [vmem:[%s7586_s16 + $0x3d8] sm:$0xff]  }
0x199e   :  { %5858 = vmatpush3.bf16.msra.mxu1 %v6253_v62  ;;  %v6281_v62 = vld [vmem:[%s7586_s16 + $0x318] sm:$0xff]  }
0x199f   :  { %5880 = vmatpush3.bf16.msra.mxu0 %v6254_v10  ;;  %5859 = vmatprep.subr.bf16.mxu1 %v6255_v0  ;;  %v6282_v10 = vld [vmem:[%s7586_s16 + $0x398] sm:$0xff]   ;;  %v6283_v0 = vld [vmem:[%s7586_s16 + $0x350] sm:$0xff]  }
0x19a0   :  { %5881 = vmatprep.subr.bf16.mxu0 %v6256_v4  ;;  %v6284_v4 = vld [vmem:[%s7586_s16 + $0x3d0] sm:$0xff]  }
0x19a2   :  { %5860 = vmatpush3.bf16.msra.mxu1 %v6257_v9  ;;  %v6288_v9 = vld [vmem:[%s7586_s16 + $0x3c8] sm:$0xff]  }
0x19a3   :  { %5882 = vmatpush3.bf16.msra.mxu0 %v6258_v16  ;;  %5861 = vmatprep.subr.bf16.mxu1 %v6259_v17  ;;  %v3922_v16 = vadd.f32 %v7394_v61, %v3433_v12  ;;  %v6290_v17 = vld [vmem:[%s7586_s16 + $0x388] sm:$0xff]   ;;  %v3961_v61 = vadd.f32 %v7371_v50, %v3441_v15 }
0x19a4   :  { %5883 = vmatprep.subr.bf16.mxu0 %v6260_v28  ;;  %v3999_v28 = vmax.f32 %v3965_v35, 0.0 }
0x19a5   :  { %v3997_v44 = vmax.f32 %v3922_v16, 0.0  ;;  %v3983_v3 = vmax.f32 %v3961_v61, 0.0 }
0x19a6   :  { %5862 = vmatpush3.bf16.msra.mxu1 %v6261_v49 }
0x19a7   :  { %5884 = vmatpush3.bf16.msra.mxu0 %v6262_v29  ;;  %5891 = vmatprep.subr.bf16.mxu1 %v6263_v31  ;;  %v4013_v47 = vpack.c.bf16 %v3997_v44, %v3981_v43  ;;  %v4015_v50 = vpack.c.bf16 %v3999_v28, %v3983_v3 }
0x19a8   :  { %5913 = vmatprep.subr.bf16.mxu0 %v6264_v25 }
0x19a9   :  { %5245 = vmatmul.mubr.bf16.vlgmr.msra.gmra.mxu1 %v4009_v27 }
0x19aa   :  { %5286 = vmatmul.mubr.bf16.vlgmr.msra.gmra.mxu0 %v4011_v37  ;;  %5892 = vmatpush3.bf16.msra.mxu1 %v6265_v11 }
0x19ab   :  { %5326 = vmatprep.mubr.bf16.mxu1 %v4014_v40  ;;  %5914 = vmatpush3.bf16.msra.mxu0 %v6266_v36 }
0x19ac   :  { %5367 = vmatprep.mubr.bf16.mxu0 %v4016_v42  ;;  %5893 = vmatprep.subr.bf16.mxu1 %v6267_v39 }
0x19ad   :  { %5915 = vmatprep.subr.bf16.mxu0 %v6268_v41 }
0x19ae   :  { %5894 = vmatpush3.bf16.msra.mxu1 %v6269_v34 }
0x19af   :  { %5916 = vmatpush3.bf16.msra.mxu0 %v6270_v45  ;;  %5895 = vmatprep.subr.bf16.mxu1 %v6271_v51 }
0x19b0   :  { %5917 = vmatprep.subr.bf16.mxu0 %v6272_v52 }
0x19b2   :  { %5896 = vmatpush3.bf16.msra.mxu1 %v6273_v53 }
0x19b3   :  { %5918 = vmatpush3.bf16.msra.mxu0 %v6274_v54  ;;  %5897 = vmatprep.subr.bf16.mxu1 %v6275_v5 }
0x19b4   :  { %5919 = vmatprep.subr.bf16.mxu0 %v6276_v55 }
0x19b6   :  { %5898 = vmatpush3.bf16.msra.mxu1 %v6277_v56 }
0x19b7   :  { %5920 = vmatpush3.bf16.msra.mxu0 %v6278_v57  ;;  %5899 = vmatprep.subr.bf16.mxu1 %v6279_v58 }
0x19b8   :  { %5921 = vmatprep.subr.bf16.mxu0 %v6280_v18 }
0x19ba   :  { %5900 = vmatpush3.bf16.msra.mxu1 %v6281_v62 }
0x19bb   :  { %5922 = vmatpush3.bf16.msra.mxu0 %v6282_v10  ;;  %5901 = vmatprep.subr.bf16.mxu1 %v6283_v0 }
0x19bc   :  { %5923 = vmatprep.subr.bf16.mxu0 %v6284_v4 }
0x19be   :  { %5902 = vmatpush3.bf16.msra.mxu1 %v6285_v7 }
0x19bf   :  { %5924 = vmatpush3.bf16.msra.mxu0 %v6286_v8  ;;  %5903 = vmatprep.subr.bf16.mxu1 %v6287_v60 }
0x19c0   :  { %5925 = vmatprep.subr.bf16.mxu0 %v6288_v9 }
0x19c2   :  { %5904 = vmatpush3.bf16.msra.mxu1 %v6289_v30 }
0x19c3   :  { %5926 = vmatpush3.bf16.msra.mxu0 %v6290_v17  ;;  %5905 = vmatprep.subr.bf16.mxu1 %v6291_v48 }
0x19c4   :  { %5927 = vmatprep.subr.bf16.mxu0 %v6292_v46 }
0x19c6   :  { %5906 = vmatpush3.bf16.msra.mxu1 %v6293_v13 }
0x19c7   :  { %5928 = vmatpush3.bf16.msra.mxu0 %v6294_v59 }
0x19c9   :  { %5327 = vmatmul.mubr.bf16.vlgmr.msra.gmra.mxu1 %v4013_v47 }
0x19ca   :  { %5368 = vmatmul.mubr.bf16.vlgmr.msra.gmra.mxu0 %v4015_v50 }
0x1a29   :  { %v5775_v14 = vpop.f32.mrf.mxu1  ;;  %v5797_v33 = vpop.f32.mrf.mxu0 }
0x1a2b   :  { %v5776_v49 = vpop.f32.mrf.mxu1  ;;  %v5798_v19 = vpop.f32.mrf.mxu0 }
0x1a2c   :  { %v5777_v27 = vadd.f32 %v5776_v49, %v5775_v14  ;;  %v5799_v42 = vadd.f32 %v5798_v19, %v5797_v33 }
0x1a2d   :  { %v5778_v20 = vpop.f32.mrf.mxu1  ;;  %v5800_v29 = vpop.f32.mrf.mxu0 }
0x1a2e   :  { %v5083_v38 = vadd.f32 %v5777_v27, %v5534_v6 }
0x1a2f   :  { %v5779_v31 = vpop.f32.mrf.mxu1  ;;  %v5801_v32 = vpop.f32.mrf.mxu0 }
0x1a30   :  { %v5780_v39 = vadd.f32 %v5779_v31, %v5778_v20  ;;  %v5124_v45 = vadd.f32 %v5799_v42, %v5083_v38  ;;  %v5802_v54 = vadd.f32 %v5801_v32, %v5800_v29 }
0x1a32   :  { %v5086_v51 = vadd.f32 %v5780_v39, %v5534_v6 }
0x1a34   :  { %v5127_v56 = vadd.f32 %v5802_v54, %v5086_v51 }
0x1a49   :  { %v5819_v26 = vpop.f32.mrf.mxu1  ;;  %v5841_v25 = vpop.f32.mrf.mxu0 }
0x1a4b   :  { %v5820_v21 = vpop.f32.mrf.mxu1  ;;  %v5842_v22 = vpop.f32.mrf.mxu0 }
0x1a4c   :  { %v5821_v34 = vadd.f32 %v5820_v21, %v5819_v26  ;;  %v5843_v57 = vadd.f32 %v5842_v22, %v5841_v25 }
0x1a4d   :  { %v5822_v23 = vpop.f32.mrf.mxu1  ;;  %v5844_v24 = vpop.f32.mrf.mxu0 }
0x1a4e   :  { %v5165_v5 = vadd.f32 %v5821_v34, %v5124_v45  ;;  %v5664_v34 = vld [vmem:[%s7592_s19] ss:$0 sm:$0xff] }
0x1a4f   :  { %v5823_v11 = vpop.f32.mrf.mxu1  ;;  %v5845_v37 = vpop.f32.mrf.mxu0 }
0x1a50   :  { %v5824_v55 = vadd.f32 %v5823_v11, %v5822_v23  ;;  %v5206_v10 = vadd.f32 %v5843_v57, %v5165_v5  ;;  %v5846_v4 = vadd.f32 %v5845_v37, %v5844_v24 }
0x1a52   :  { %v5168_v0 = vadd.f32 %v5824_v55, %v5127_v56 }
0x1a54   :  { %v5209_v12 = vadd.f32 %v5846_v4, %v5168_v0 }
0x1a69   :  { %v5863_v36 = vpop.f32.mrf.mxu1 }
0x1a6a   :  { %v5885_v40 = vpop.f32.mrf.mxu0 }
0x1a6b   :  { %v5864_v41 = vpop.f32.mrf.mxu1 }
0x1a6c   :  { %v5886_v52 = vpop.f32.mrf.mxu0  ;;  %v5865_v58 = vadd.f32 %v5864_v41, %v5863_v36  ;;  %v5663_v41 = vld [vmem:[%s7591_s18] ss:$0 sm:$0xff] }
0x1a6d   :  { %v5866_v53 = vpop.f32.mrf.mxu1  ;;  %v5887_v15 = vadd.f32 %v5886_v52, %v5885_v40 }
0x1a6e   :  { %v5888_v18 = vpop.f32.mrf.mxu0  ;;  %v5247_v7 = vadd.f32 %v5865_v58, %v5206_v10 }
0x1a6f   :  { %v5867_v62 = vpop.f32.mrf.mxu1 }
0x1a70   :  { %v5868_v8 = vadd.f32 %v5867_v62, %v5866_v53  ;;  %v5889_v60 = vpop.f32.mrf.mxu0  ;;  %v5288_v17 = vadd.f32 %v5887_v15, %v5247_v7 }
0x1a71   :  { %v5890_v61 = vadd.f32 %v5889_v60, %v5888_v18 }
0x1a72   :  { %v5250_v48 = vadd.f32 %v5868_v8, %v5209_v12 }
0x1a74   :  { %v5291_v43 = vadd.f32 %v5890_v61, %v5250_v48 }
0x1a89   :  { %v5907_v9 = vpop.f32.mrf.mxu1 }
0x1a8a   :  { %v5929_v30 = vpop.f32.mrf.mxu0 }
0x1a8b   :  { %v5908_v16 = vpop.f32.mrf.mxu1 }
0x1a8c   :  { %v5909_v35 = vadd.f32 %v5908_v16, %v5907_v9  ;;  %v5930_v46 = vpop.f32.mrf.mxu0 }
0x1a8d   :  { %v5910_v2 = vpop.f32.mrf.mxu1  ;;  %v5931_v44 = vadd.f32 %v5930_v46, %v5929_v30 }
0x1a8e   :  { %v5329_v13 = vadd.f32 %v5909_v35, %v5288_v17  ;;  %v5932_v59 = vpop.f32.mrf.mxu0 }
0x1a8f   :  { %v5911_v28 = vpop.f32.mrf.mxu1 }
0x1a90   :  { %v5370_v3 = vadd.f32 %v5931_v44, %v5329_v13  ;;  %v5912_v47 = vadd.f32 %v5911_v28, %v5910_v2  ;;  %v5933_v50 = vpop.f32.mrf.mxu0 }
0x1a91   :  { %v5934_v33 = vadd.f32 %v5933_v50, %v5932_v59 }
0x1a92   :  { %v5332_v14 = vadd.f32 %v5912_v47, %v5291_v43  ;;  %v5376_v49 = vadd.f32 %v5370_v3, %v6986_v1 }
0x1a94   :  { %v5373_v19 = vadd.f32 %v5934_v33, %v5332_v14  ;;  %v5380_v20 = vsel %vm81_vm0, %v5376_v49, 0.0 }
0x1a95   :  { %5381 = vadd.xlane.f32.xlu0 %v5380_v20 }
0x1a96   :  { %v5377_v29 = vadd.f32 %v5373_v19, %v6984_v63 }
0x1a98   :  { %v5383_v31 = vsel %vm81_vm0, %v5377_v29, 0.0 }
0x1a99   :  { %5384 = vadd.xlane.f32.xlu1 %v5383_v31 }
0x1b1e   :  { %v5382_v26 = vpop.xlane.xlu0 %5381 }
0x1b1f   :  { %v5386_v32 = vmul.f32 0.03125, %v5382_v26 }
0x1b21   :  { %v5388_v25 = vsub.f32 %v5376_v49, %v5386_v32 }
0x1b22   :  { %v5385_v21 = vpop.xlane.xlu1 %5384 }
0x1b23   :  { %v5387_v22 = vmul.f32 0.03125, %v5385_v21  ;;  %v5390_v23 = vmul.f32 %v5388_v25, %v5388_v25 }
0x1b25   :  { %v5389_v24 = vsub.f32 %v5377_v29, %v5387_v22  ;;  %v5392_v11 = vsel %vm81_vm0, %v5390_v23, 0.0 }
0x1b26   :  { %5393 = vadd.xlane.f32.xlu0 %v5392_v11 }
0x1b27   :  { %v5391_v1 = vmul.f32 %v5389_v24, %v5389_v24 }
0x1b29   :  { %v5395_v27 = vsel %vm81_vm0, %v5391_v1, 0.0 }
0x1b2a   :  { %5396 = vadd.xlane.f32.xlu1 %v5395_v27 }
0x1baf   :  { %v5394_v6 = vpop.xlane.xlu0 %5393 }
0x1bb0   :  { %v5398_v36 = vmul.f32 0.03125, %v5394_v6 }
0x1bb2   :  { %v5400_v63 = vadd.f32 1e-05, %v5398_v36 }
0x1bb3   :  { %v5397_v37 = vpop.xlane.xlu1 %5396 }
0x1bb4   :  { %6367 = vrsqrt.f32 %v5400_v63  ;;  %v5399_v38 = vmul.f32 0.03125, %v5397_v37 }
0x1bb6   :  { %v5401_v39 = vadd.f32 1e-05, %v5399_v38 }
0x1bb8   :  { %6369 = vrsqrt.f32 %v5401_v39 }
0x1bc1   :  { %v6368_v40 = vpop.eup %6367 }
0x1bc2   :  { %v5404_v42 = vmul.f32 %v6368_v40, %v5388_v25 }
0x1bc4   :  { %v5412_v45 = vmul.f32 %v5663_v41, %v5404_v42 }
0x1bc5   :  { %v6370_v51 = vpop.eup %6369 }
0x1bc6   :  { %v5420_v52 = vadd.f32 %v5664_v34, %v5412_v45  ;;  %v5405_v53 = vmul.f32 %v6370_v51, %v5389_v24 }
0x1bc8   :  { %5422 = vst.msk [vmem:[%s7593_s20] sm:$0xff] %vm81_vm0, %v5420_v52  ;;  %v5413_v54 = vmul.f32 %v5663_v41, %v5405_v53 }
0x1bca   :  { %v5421_v5 = vadd.f32 %v5664_v34, %v5413_v54 }
0x1bcc   :  { %5423 = vst.msk [vmem:[%s7593_s20 + $0x8] sm:$0xff] %vm81_vm0, %v5421_v5 }

</bundles_post_ra>
